<compile_context>
chip_gen: v6e
topology: v6e:2x2x1
jax: 0.10.0
libtpu: 0.0.40
codegen_flags: <defaults>
</compile_context>

<pallas_src>
import functools

import jax
import jax.numpy as jnp
from jax import lax
from jax.experimental import pallas as pl
from jax.experimental.pallas import tpu as pltpu
from jax.scipy.linalg import block_diag


# ----------------------------------------------------------------------------
# Fused SupHead kernel: all 4 heads lane-packed, one image per grid step
# ----------------------------------------------------------------------------

_PAD = 16  # halo rows above/below the flat (H*W, C) conv slab; >= W+1, bf16-tile aligned


def _make_suphead_kernel(H, W, n_heads, cout, classes):
    HW = H * W
    C = n_heads * cout          # packed channel width (lane dim)
    K = n_heads * classes       # packed class width

    def kernel(x_ref, wsc_ref, scs_ref, scb_ref,
               w1_ref, s1_ref, b1_ref, w2_ref, s2_ref, b2_ref,
               wseg_ref, bseg_ref, wcls_ref, bcls_ref,
               sgap_ref, cls_ref, buf_ref):
        # Zero only the halo rows (the interior is fully rewritten by each
        # conv).  16-row bf16 stores are tile-aligned and full-lane.
        buf_ref[0:_PAD, :] = jnp.zeros((_PAD, C), jnp.bfloat16)
        buf_ref[_PAD + HW:_PAD + HW + _PAD, :] = jnp.zeros((_PAD, C),
                                                           jnp.bfloat16)

        # left/right column-edge masks for the flat row index r = i*W + j
        jj = lax.broadcasted_iota(jnp.int32, (HW, 1), 0) % W
        mask_l = (jj >= 1).astype(jnp.bfloat16)        # valid when j-1 >= 0
        mask_r = (jj < W - 1).astype(jnp.bfloat16)     # valid when j+1 <  W

        # ---- shortcut 1x1 conv + folded BN (block-diagonal over heads) -----
        residual = jnp.dot(x_ref[0], wsc_ref[...],
                           preferred_element_type=jnp.float32)
        residual = residual * scs_ref[...] + scb_ref[...]        # (HW, C) f32

        # ---- 3x3 "same" conv + folded BN as 9 accumulated bf16 matmuls -----
        def conv3x3_bn(inp, w_ref, scale, bias):
            # aligned full-lane interior write (no zero-fill of the interior)
            buf_ref[_PAD:_PAD + HW, :] = inp.astype(jnp.bfloat16)
            acc = jnp.zeros((HW, C), jnp.float32)
            for t in range(9):
                dh, dw = t // 3 - 1, t % 3 - 1
                start = _PAD + dh * W + dw               # static shift, |.| <= W+1
                tap = buf_ref[start:start + HW, :]       # (HW, C) bf16 window
                if dw == -1:
                    tap = tap * mask_l
                elif dw == 1:
                    tap = tap * mask_r
                acc = acc + jnp.dot(tap, w_ref[t],
                                    preferred_element_type=jnp.float32)
            return acc * scale + bias

        h1 = jnp.maximum(conv3x3_bn(residual, w1_ref, s1_ref[...], b1_ref[...]),
                         0.0)
        xo = jnp.maximum(conv3x3_bn(h1, w2_ref, s2_ref[...], b2_ref[...])
                         + residual, 0.0)                         # (HW, C) f32

        # ---- seg head: 1x1 conv(+bias) -> per-head softmax -> GAP ----------
        seg = (jnp.dot(xo.astype(jnp.bfloat16), wseg_ref[...],
                       preferred_element_type=jnp.float32) + bseg_ref[...])

        # ---- cls head: GAP -> 1x1 conv(+bias) -> per-head softmax ----------
        pooled = jnp.mean(xo, axis=0, keepdims=True)              # (1, C) f32
        logits = (jnp.dot(pooled.astype(jnp.bfloat16), wcls_ref[...],
                          preferred_element_type=jnp.float32) + bcls_ref[...])

        sgap_parts, cls_parts = [], []
        for hd in range(n_heads):
            sl = slice(hd * classes, (hd + 1) * classes)
            s = seg[:, sl]
            s = jnp.exp(s - jnp.max(s, axis=-1, keepdims=True))
            p = s / jnp.sum(s, axis=-1, keepdims=True)            # (HW, cls)
            sgap_parts.append(jnp.mean(p, axis=0, keepdims=True)) # (1, cls)
            l = logits[:, sl]
            l = jnp.exp(l - jnp.max(l, axis=-1, keepdims=True))
            cls_parts.append(l / jnp.sum(l, axis=-1, keepdims=True))
        sgap_ref[0] = jnp.concatenate(sgap_parts, axis=-1)        # (1, K)
        cls_ref[0] = jnp.concatenate(cls_parts, axis=-1)          # (1, K)

    return kernel


def pack_suphead_params(head_params):
    """Pack per-head weights block-diagonally along the channel/lane axis."""
    hp = head_params
    packed = {
        "wsc": block_diag(*[p["w_sc"][0, 0] for p in hp]),        # (sumCin, nC)
        "w1": jnp.stack([block_diag(*[p["w1"][t // 3, t % 3] for p in hp])
                         for t in range(9)]),                     # (9, nC, nC)
        "w2": jnp.stack([block_diag(*[p["w2"][t // 3, t % 3] for p in hp])
                         for t in range(9)]),
        "wseg": block_diag(*[p["w_seg"][0, 0] for p in hp]),      # (nC, nCls)
        "wcls": block_diag(*[p["w_cls"] for p in hp]),            # (nC, nCls)
    }
    cat = lambda k: jnp.concatenate([p[k] for p in hp]).reshape(1, -1)
    packed.update(scs=cat("sc_scale"), scb=cat("sc_bias"),
                  s1=cat("bn1_scale"), b1=cat("bn1_bias"),
                  s2=cat("bn2_scale"), b2=cat("bn2_bias"),
                  bseg=cat("b_seg"), bcls=cat("b_cls"))
    return packed


def suphead_all(feats, head_params, classes):
    """All 4 SupHeads in one pallas_call (grid over batch, 'parallel').

    Returns (seg_softmax_gap, class_pred), each (n_heads, N, classes) f32.
    seg_softmax_gap == GAP(softmax(seg_pred)), the only thing the training
    branch consumes from seg_pred."""
    n_heads = len(head_params)
    N, H, W, _ = feats[0].shape
    HW = H * W
    cout = head_params[0]["w1"].shape[-1]
    C = n_heads * cout
    K = n_heads * classes
    assert W + 1 < _PAD and HW % 8 == 0

    packed = pack_suphead_params(head_params)
    cin_tot = packed["wsc"].shape[0]
    cin_pad = pl.cdiv(cin_tot, 128) * 128
    wsc = jnp.pad(packed["wsc"], ((0, cin_pad - cin_tot), (0, 0)))

    # concatenated (not Cmax-padded) input channels; minimal pad to lane width
    xcat = jnp.concatenate(feats, axis=-1)
    xcat = jnp.pad(xcat, ((0, 0), (0, 0), (0, 0), (0, cin_pad - cin_tot)))
    xcat = xcat.reshape(N, HW, cin_pad).astype(jnp.bfloat16)

    bf = lambda a: a.astype(jnp.bfloat16)
    f32 = lambda a: a.astype(jnp.float32)

    def full(shape):
        nd = len(shape)
        return pl.BlockSpec(shape, lambda n: (0,) * nd)

    sgap, clsp = pl.pallas_call(
        _make_suphead_kernel(H, W, n_heads, cout, classes),
        out_shape=(jax.ShapeDtypeStruct((N, 1, K), jnp.float32),
                   jax.ShapeDtypeStruct((N, 1, K), jnp.float32)),
        grid=(N,),
        in_specs=[
            pl.BlockSpec((1, HW, cin_pad), lambda n: (n, 0, 0)),   # packed input
            full((cin_pad, C)), full((1, C)), full((1, C)),        # shortcut+BN
            full((9, C, C)), full((1, C)), full((1, C)),           # conv1+BN
            full((9, C, C)), full((1, C)), full((1, C)),           # conv2+BN
            full((C, K)), full((1, K)),                            # seg head
            full((C, K)), full((1, K)),                            # cls head
        ],
        out_specs=(pl.BlockSpec((1, 1, K), lambda n: (n, 0, 0)),
                   pl.BlockSpec((1, 1, K), lambda n: (n, 0, 0))),
        scratch_shapes=[pltpu.VMEM((HW + 2 * _PAD, C), jnp.bfloat16)],
        compiler_params=pltpu.CompilerParams(
            dimension_semantics=("parallel",),
            vmem_limit_bytes=32 * 1024 * 1024),
    )(xcat, bf(wsc), f32(packed["scs"]), f32(packed["scb"]),
      bf(packed["w1"]), f32(packed["s1"]), f32(packed["b1"]),
      bf(packed["w2"]), f32(packed["s2"]), f32(packed["b2"]),
      bf(packed["wseg"]), f32(packed["bseg"]),
      bf(packed["wcls"]), f32(packed["bcls"]))

    sgap = sgap.reshape(N, n_heads, classes).transpose(1, 0, 2)
    clsp = clsp.reshape(N, n_heads, classes).transpose(1, 0, 2)
    return sgap, clsp


# ----------------------------------------------------------------------------
# Plain-JAX glue (tiny ops, left to XLA per perf review)
# ----------------------------------------------------------------------------

def bilinear_align_corners(x, out_h, out_w):
    """F.interpolate(..., mode='bilinear', align_corners=True) on NHWC."""
    N, H, W, C = x.shape
    ys = jnp.linspace(0.0, H - 1.0, out_h) if H > 1 else jnp.zeros((out_h,))
    xs = jnp.linspace(0.0, W - 1.0, out_w) if W > 1 else jnp.zeros((out_w,))
    y0 = jnp.floor(ys).astype(jnp.int32)
    x0 = jnp.floor(xs).astype(jnp.int32)
    y1 = jnp.clip(y0 + 1, 0, H - 1)
    x1 = jnp.clip(x0 + 1, 0, W - 1)
    wy = (ys - y0.astype(jnp.float32))[None, :, None, None]
    wx = (xs - x0.astype(jnp.float32))[None, None, :, None]
    rows0, rows1 = x[:, y0], x[:, y1]
    r00, r01 = rows0[:, :, x0], rows0[:, :, x1]
    r10, r11 = rows1[:, :, x0], rows1[:, :, x1]
    top = r00 * (1.0 - wx) + r01 * wx
    bot = r10 * (1.0 - wx) + r11 * wx
    return top * (1.0 - wy) + bot * wy


def categorical_cross_entropy(y_pred, y_true):
    y_pred = jnp.clip(y_pred, 1e-9, 1.0 - 1e-9)
    return jnp.mean(-jnp.sum(y_true * jnp.log(y_pred), axis=1))


# ----------------------------------------------------------------------------
# Parameters (deterministic init, BN folded to scale/bias)
# ----------------------------------------------------------------------------

def _bn_fold(key, c):
    k1, k2, k3, k4 = jax.random.split(key, 4)
    gamma = 1.0 + 0.1 * jax.random.normal(k1, (c,), jnp.float32)
    beta = 0.1 * jax.random.normal(k2, (c,), jnp.float32)
    mean = 0.1 * jax.random.normal(k3, (c,), jnp.float32)
    var = 1.0 + 0.1 * jax.random.uniform(k4, (c,), jnp.float32)
    scale = gamma / jnp.sqrt(var + 1e-5)
    bias = beta - mean * scale
    return scale, bias


def init_suphead(key, in_features, out_features, classes):
    ks = jax.random.split(key, 9)
    p = {}
    p["w_sc"] = 0.1 * jax.random.normal(ks[0], (1, 1, in_features, out_features))
    p["sc_scale"], p["sc_bias"] = _bn_fold(ks[1], out_features)
    p["w1"] = 0.05 * jax.random.normal(ks[2], (3, 3, out_features, out_features))
    p["bn1_scale"], p["bn1_bias"] = _bn_fold(ks[3], out_features)
    p["w2"] = 0.05 * jax.random.normal(ks[4], (3, 3, out_features, out_features))
    p["bn2_scale"], p["bn2_bias"] = _bn_fold(ks[5], out_features)
    p["w_seg"] = 0.1 * jax.random.normal(ks[6], (1, 1, out_features, classes))
    p["b_seg"] = 0.01 * jax.random.normal(ks[7], (classes,))
    p["w_cls"] = 0.1 * jax.random.normal(ks[8], (out_features, classes))
    p["b_cls"] = jnp.zeros((classes,), jnp.float32)
    return p


# ----------------------------------------------------------------------------
# Pure-JAX / XLA reference of one SupHead (for correctness check in __main__)
# ----------------------------------------------------------------------------

def suphead_reference(x, p):
    q = lambda a: a.astype(jnp.bfloat16).astype(jnp.float32)
    residual = jnp.einsum("nhwc,cd->nhwd", q(x), q(p["w_sc"][0, 0]))
    residual = residual * p["sc_scale"] + p["sc_bias"]

    def conv(z, wgt):
        return lax.conv_general_dilated(
            q(z), q(wgt), (1, 1), "SAME",
            dimension_numbers=("NHWC", "HWIO", "NHWC"))

    h1 = jax.nn.relu(conv(residual, p["w1"]) * p["bn1_scale"] + p["bn1_bias"])
    xo = jax.nn.relu(conv(h1, p["w2"]) * p["bn2_scale"] + p["bn2_bias"]
                     + residual)
    seg = jnp.einsum("nhwc,ck->nhwk", q(xo), q(p["w_seg"][0, 0])) + p["b_seg"]
    sgap = jnp.mean(jax.nn.softmax(seg, axis=-1), axis=(1, 2))
    pooled = jnp.mean(xo, axis=(1, 2))
    logits = q(pooled) @ q(p["w_cls"]) + p["b_cls"]
    return sgap, jax.nn.softmax(logits, axis=-1)


# ----------------------------------------------------------------------------
# PSPNetDeepSup forward (training branch; backbone stubbed)
# ----------------------------------------------------------------------------

def pspnet_deepsup_forward(x_img, feats, class_label, params, classes,
                           zoom_factor=8):
    """x_img: NCHW input image (used only for size checks, as in the module).
    feats:   (x1, x2, x3, x4) NHWC stand-in backbone feature maps."""
    N, _, H_in, W_in = x_img.shape
    assert (H_in - 1) % 8 == 0 and (W_in - 1) % 8 == 0
    h = int((H_in - 1) / 8 * zoom_factor + 1)
    w = int((W_in - 1) / 8 * zoom_factor + 1)

    x1, x2, x3, x4 = feats

    # --- stand-in for pspnet.cls: 1x1 conv on x4, then bilinear zoom --------
    # (tiny; left to XLA per perf review instead of a grid=(1,) pallas_call)
    x_main = (jnp.einsum("nhwc,ck->nhwk", x4, params["w_main"])
              + params["b_main"])
    if zoom_factor != 1:
        x_main = bilinear_align_corners(x_main, h, w)     # (N, h, w, classes)

    # seg distribution target: GAP(softmax(x_main)), detached as in PyTorch
    seg_dist = jax.lax.stop_gradient(
        jnp.mean(jax.nn.softmax(x_main, axis=-1), axis=(1, 2)))

    # --- all four deep-supervision heads in one fused pallas_call -----------
    seg_sgap, class_pred = suphead_all(feats, params["sup"], classes)

    # PyTorch convention: sum of per-head (batch-mean) CCE, divided by 4
    seg_losses = sum(categorical_cross_entropy(seg_sgap[i], seg_dist)
                     for i in range(4)) / 4.0
    class_losses = sum(categorical_cross_entropy(class_pred[i], class_label)
                       for i in range(4)) / 4.0

    # TODO(synk): main_loss = pspnet.criterion(x, segmentation_label) not
    # implementable (criterion / segmentation labels not provided).
    main_loss = jnp.float32(0.0)

    pred = jnp.argmax(x_main, axis=-1)                    # == x.max(1)[1]
    return pred, main_loss, seg_losses, class_losses


# ----------------------------------------------------------------------------
# main
# ----------------------------------------------------------------------------

if __name__ == "__main__":
    key = jax.random.PRNGKey(0)
    N = 2
    CLASSES = 16             # scaled down from 150
    OUT_F = 32               # scaled down from 512 (4 heads x 32 = 128 lanes)
    IN_F = (8, 16, 32, 64)   # scaled down from (256, 512, 1024, 2048)
    HF = WF = 8              # feature-map spatial size (stride-8 backbone)
    H_IMG = W_IMG = 17       # satisfies (H-1) % 8 == 0

    keys = jax.random.split(key, 12)

    # module input (NCHW, like PyTorch) and deterministic stand-in features
    x_img = jax.random.normal(keys[0], (N, 3, H_IMG, W_IMG), jnp.float32)
    feats = tuple(
        jax.random.normal(keys[1 + i], (N, HF, WF, IN_F[i]), jnp.float32)
        for i in range(4))

    # class label = one-hot distribution over classes
    lbl = jax.random.randint(keys[5], (N,), 0, CLASSES)
    class_label = jax.nn.one_hot(lbl, CLASSES, dtype=jnp.float32)

    params = {
        "sup": [init_suphead(keys[6 + i], IN_F[i], OUT_F, CLASSES)
                for i in range(4)],
        "w_main": 0.1 * jax.random.normal(keys[10], (IN_F[3], CLASSES)),
        "b_main": 0.01 * jax.random.normal(keys[11], (CLASSES,)),
    }

    fwd = jax.jit(functools.partial(pspnet_deepsup_forward,
                                    classes=CLASSES, zoom_factor=8))
    pred, main_loss, seg_losses, class_losses = fwd(
        x_img, feats, class_label, params)
    jax.block_until_ready((pred, main_loss, seg_losses, class_losses))

    # correctness check: fused Pallas SupHead stack vs plain-JAX/XLA reference
    kern_sgap, kern_cls = jax.jit(
        functools.partial(suphead_all, classes=CLASSES))(feats, params["sup"])
    refs = [suphead_reference(feats[i], params["sup"][i]) for i in range(4)]
    ref_sgap = jnp.stack([r[0] for r in refs])
    ref_cls = jnp.stack([r[1] for r in refs])
    assert jnp.allclose(kern_sgap, ref_sgap, rtol=2e-2, atol=2e-3), "seg mismatch"
    assert jnp.allclose(kern_cls, ref_cls, rtol=2e-2, atol=2e-3), "cls mismatch"

    assert pred.shape == (N, H_IMG, W_IMG)
    assert bool(jnp.isfinite(seg_losses)) and bool(jnp.isfinite(class_losses))
    print("KERNEL_OK")
</pallas_src>

<mosaic_0001>
module attributes {stable_mosaic.version = 11 : i64} {
  func.func @kernel(%arg0: i32, %arg1: memref<1x64x128xbf16, #tpu.memory_space<vmem>>, %arg2: memref<128x128xbf16, #tpu.memory_space<vmem>>, %arg3: memref<1x128xf32, #tpu.memory_space<vmem>>, %arg4: memref<1x128xf32, #tpu.memory_space<vmem>>, %arg5: memref<9x128x128xbf16, #tpu.memory_space<vmem>>, %arg6: memref<1x128xf32, #tpu.memory_space<vmem>>, %arg7: memref<1x128xf32, #tpu.memory_space<vmem>>, %arg8: memref<9x128x128xbf16, #tpu.memory_space<vmem>>, %arg9: memref<1x128xf32, #tpu.memory_space<vmem>>, %arg10: memref<1x128xf32, #tpu.memory_space<vmem>>, %arg11: memref<128x64xbf16, #tpu.memory_space<vmem>>, %arg12: memref<1x64xf32, #tpu.memory_space<vmem>>, %arg13: memref<128x64xbf16, #tpu.memory_space<vmem>>, %arg14: memref<1x64xf32, #tpu.memory_space<vmem>>, %arg15: memref<1x1x64xf32, #tpu.memory_space<vmem>>, %arg16: memref<1x1x64xf32, #tpu.memory_space<vmem>>, %arg17: memref<96x128xbf16, #tpu.memory_space<vmem>>) attributes {dimension_semantics = [#tpu.dimension_semantics<parallel>], iteration_bounds = array<i64: 2>, scalar_prefetch = 0 : i64, scratch_operands = 1 : i64, tpu.core_type = #tpu.core_type<tc>, window_params = [{transform_indices = @transform_0, window_bounds = array<i64: 1, 64, 128>}, {pipeline_mode = #tpu.pipeline_mode<synchronous>, transform_indices = @transform_1, window_bounds = array<i64: 128, 128>}, {pipeline_mode = #tpu.pipeline_mode<synchronous>, transform_indices = @transform_2, window_bounds = array<i64: 1, 128>}, {pipeline_mode = #tpu.pipeline_mode<synchronous>, transform_indices = @transform_3, window_bounds = array<i64: 1, 128>}, {pipeline_mode = #tpu.pipeline_mode<synchronous>, transform_indices = @transform_4, window_bounds = array<i64: 9, 128, 128>}, {pipeline_mode = #tpu.pipeline_mode<synchronous>, transform_indices = @transform_5, window_bounds = array<i64: 1, 128>}, {pipeline_mode = #tpu.pipeline_mode<synchronous>, transform_indices = @transform_6, window_bounds = array<i64: 1, 128>}, {pipeline_mode = #tpu.pipeline_mode<synchronous>, transform_indices = @transform_7, window_bounds = array<i64: 9, 128, 128>}, {pipeline_mode = #tpu.pipeline_mode<synchronous>, transform_indices = @transform_8, window_bounds = array<i64: 1, 128>}, {pipeline_mode = #tpu.pipeline_mode<synchronous>, transform_indices = @transform_9, window_bounds = array<i64: 1, 128>}, {pipeline_mode = #tpu.pipeline_mode<synchronous>, transform_indices = @transform_10, window_bounds = array<i64: 128, 64>}, {pipeline_mode = #tpu.pipeline_mode<synchronous>, transform_indices = @transform_11, window_bounds = array<i64: 1, 64>}, {pipeline_mode = #tpu.pipeline_mode<synchronous>, transform_indices = @transform_12, window_bounds = array<i64: 128, 64>}, {pipeline_mode = #tpu.pipeline_mode<synchronous>, transform_indices = @transform_13, window_bounds = array<i64: 1, 64>}, {transform_indices = @transform_14, window_bounds = array<i64: 1, 1, 64>}, {transform_indices = @transform_15, window_bounds = array<i64: 1, 1, 64>}]} {
    %cst = arith.constant 0.000000e+00 : bf16
    %0 = vector.broadcast %cst : bf16 to vector<16x128xbf16>
    %c0 = arith.constant 0 : index
    %c0_0 = arith.constant 0 : index
    %1 = vector.load %arg17[%c0, %c0_0] : memref<96x128xbf16, #tpu.memory_space<vmem>>, vector<16x128xbf16>
    tpu.vector_store %arg17[%c0, %c0_0], %0 {strides = array<i32>} : memref<96x128xbf16, #tpu.memory_space<vmem>>, vector<16x128xbf16>,
    %cst_1 = arith.constant 0.000000e+00 : bf16
    %2 = vector.broadcast %cst_1 : bf16 to vector<16x128xbf16>
    %c80 = arith.constant 80 : index
    %c0_2 = arith.constant 0 : index
    %3 = vector.load %arg17[%c80, %c0_2] : memref<96x128xbf16, #tpu.memory_space<vmem>>, vector<16x128xbf16>
    tpu.vector_store %arg17[%c80, %c0_2], %2 {strides = array<i32>} : memref<96x128xbf16, #tpu.memory_space<vmem>>, vector<16x128xbf16>,
    %4 = tpu.iota {dimensions = array<i32: 0>} : vector<64x1xi32>
    %c8_i32 = arith.constant 8 : i32
    %c0_i32 = arith.constant 0 : i32
    %5 = arith.cmpi eq, %c8_i32, %c0_i32 : i32
    %c1_i32 = arith.constant 1 : i32
    %6 = arith.select %5, %c1_i32, %c8_i32 : i32
    %7 = vector.broadcast %6 : i32 to vector<64x1xi32>
    %8 = arith.remsi %4, %7 : vector<64x1xi32>
    %c0_i32_3 = arith.constant 0 : i32
    %9 = vector.broadcast %c0_i32_3 : i32 to vector<64x1xi32>
    %10 = arith.cmpi ne, %8, %9 : vector<64x1xi32>
    %c0_i32_4 = arith.constant 0 : i32
    %11 = vector.broadcast %c0_i32_4 : i32 to vector<64x1xi32>
    %12 = arith.cmpi slt, %8, %11 : vector<64x1xi32>
    %c0_i32_5 = arith.constant 0 : i32
    %13 = arith.cmpi slt, %6, %c0_i32_5 : i32
    %14 = vector.broadcast %13 : i1 to vector<64x1xi1>
    %15 = vector.broadcast %14 : vector<64x1xi1> to vector<64x1xi1>
    %16 = arith.xori %12, %15 : vector<64x1xi1>
    %17 = arith.andi %16, %10 : vector<64x1xi1>
    %18 = vector.broadcast %6 : i32 to vector<64x1xi32>
    %19 = arith.addi %8, %18 : vector<64x1xi32>
    %20 = arith.select %17, %19, %8 : vector<64x1xi1>, vector<64x1xi32>
    %c1_i32_6 = arith.constant 1 : i32
    %21 = vector.broadcast %c1_i32_6 : i32 to vector<64x1xi32>
    %22 = arith.cmpi sge, %20, %21 : vector<64x1xi32>
    %23 = arith.extui %22 : vector<64x1xi1> to vector<64x1xi32>
    %24 = arith.sitofp %23 : vector<64x1xi32> to vector<64x1xf32>
    %25 = arith.truncf %24 : vector<64x1xf32> to vector<64x1xbf16>
    %c7_i32 = arith.constant 7 : i32
    %26 = vector.broadcast %c7_i32 : i32 to vector<64x1xi32>
    %27 = arith.cmpi slt, %20, %26 : vector<64x1xi32>
    %28 = arith.extui %27 : vector<64x1xi1> to vector<64x1xi32>
    %29 = arith.sitofp %28 : vector<64x1xi32> to vector<64x1xf32>
    %30 = arith.truncf %29 : vector<64x1xf32> to vector<64x1xbf16>
    %c0_7 = arith.constant 0 : index
    %c0_8 = arith.constant 0 : index
    %c0_9 = arith.constant 0 : index
    %31 = vector.load %arg1[%c0_7, %c0_8, %c0_9] : memref<1x64x128xbf16, #tpu.memory_space<vmem>>, vector<1x64x128xbf16>
    %32 = vector.shape_cast %31 : vector<1x64x128xbf16> to vector<64x128xbf16>
    %c0_10 = arith.constant 0 : index
    %c0_11 = arith.constant 0 : index
    %33 = vector.load %arg2[%c0_10, %c0_11] : memref<128x128xbf16, #tpu.memory_space<vmem>>, vector<128x128xbf16>
    %cst_12 = arith.constant dense<0.000000e+00> : vector<64x128xf32>
    %34 = tpu.matmul %32, %33, %cst_12 {dimension_numbers = #tpu.dot_dimension_numbers<[1], [0], [0], [1], [0, 0, 1, 1], [], []>} : vector<64x128xbf16>, vector<128x128xbf16>, vector<64x128xf32> -> vector<64x128xf32>
    %c0_13 = arith.constant 0 : index
    %c0_14 = arith.constant 0 : index
    %35 = vector.load %arg3[%c0_13, %c0_14] : memref<1x128xf32, #tpu.memory_space<vmem>>, vector<1x128xf32>
    %36 = vector.broadcast %35 : vector<1x128xf32> to vector<64x128xf32>
    %37 = arith.mulf %34, %36 : vector<64x128xf32>
    %c0_15 = arith.constant 0 : index
    %c0_16 = arith.constant 0 : index
    %38 = vector.load %arg4[%c0_15, %c0_16] : memref<1x128xf32, #tpu.memory_space<vmem>>, vector<1x128xf32>
    %39 = vector.broadcast %38 : vector<1x128xf32> to vector<64x128xf32>
    %40 = arith.addf %37, %39 : vector<64x128xf32>
    %c0_17 = arith.constant 0 : index
    %c0_18 = arith.constant 0 : index
    %41 = vector.load %arg6[%c0_17, %c0_18] : memref<1x128xf32, #tpu.memory_space<vmem>>, vector<1x128xf32>
    %c0_19 = arith.constant 0 : index
    %c0_20 = arith.constant 0 : index
    %42 = vector.load %arg7[%c0_19, %c0_20] : memref<1x128xf32, #tpu.memory_space<vmem>>, vector<1x128xf32>
    %43 = arith.truncf %40 : vector<64x128xf32> to vector<64x128xbf16>
    %c16 = arith.constant 16 : index
    %c0_21 = arith.constant 0 : index
    %44 = vector.load %arg17[%c16, %c0_21] : memref<96x128xbf16, #tpu.memory_space<vmem>>, vector<64x128xbf16>
    tpu.vector_store %arg17[%c16, %c0_21], %43 {strides = array<i32>} : memref<96x128xbf16, #tpu.memory_space<vmem>>, vector<64x128xbf16>,
    %cst_22 = arith.constant 0.000000e+00 : f32
    %45 = vector.broadcast %cst_22 : f32 to vector<64x128xf32>
    %c7 = arith.constant 7 : index
    %c0_23 = arith.constant 0 : index
    %46 = vector.load %arg17[%c7, %c0_23] : memref<96x128xbf16, #tpu.memory_space<vmem>>, vector<64x128xbf16>
    %47 = vector.broadcast %25 : vector<64x1xbf16> to vector<64x128xbf16>
    %48 = arith.mulf %46, %47 : vector<64x128xbf16>
    %c0_24 = arith.constant 0 : index
    %c0_25 = arith.constant 0 : index
    %c0_26 = arith.constant 0 : index
    %49 = vector.load %arg5[%c0_24, %c0_25, %c0_26] : memref<9x128x128xbf16, #tpu.memory_space<vmem>>, vector<1x128x128xbf16>
    %50 = vector.shape_cast %49 : vector<1x128x128xbf16> to vector<128x128xbf16>
    %cst_27 = arith.constant dense<0.000000e+00> : vector<64x128xf32>
    %51 = tpu.matmul %48, %50, %cst_27 {dimension_numbers = #tpu.dot_dimension_numbers<[1], [0], [0], [1], [0, 0, 1, 1], [], []>} : vector<64x128xbf16>, vector<128x128xbf16>, vector<64x128xf32> -> vector<64x128xf32>
    %52 = arith.addf %45, %51 : vector<64x128xf32>
    %c8 = arith.constant 8 : index
    %c0_28 = arith.constant 0 : index
    %53 = vector.load %arg17[%c8, %c0_28] : memref<96x128xbf16, #tpu.memory_space<vmem>>, vector<64x128xbf16>
    %c1 = arith.constant 1 : index
    %c0_29 = arith.constant 0 : index
    %c0_30 = arith.constant 0 : index
    %54 = vector.load %arg5[%c1, %c0_29, %c0_30] : memref<9x128x128xbf16, #tpu.memory_space<vmem>>, vector<1x128x128xbf16>
    %55 = vector.shape_cast %54 : vector<1x128x128xbf16> to vector<128x128xbf16>
    %cst_31 = arith.constant dense<0.000000e+00> : vector<64x128xf32>
    %56 = tpu.matmul %53, %55, %cst_31 {dimension_numbers = #tpu.dot_dimension_numbers<[1], [0], [0], [1], [0, 0, 1, 1], [], []>} : vector<64x128xbf16>, vector<128x128xbf16>, vector<64x128xf32> -> vector<64x128xf32>
    %57 = arith.addf %52, %56 : vector<64x128xf32>
    %c9 = arith.constant 9 : index
    %c0_32 = arith.constant 0 : index
    %58 = vector.load %arg17[%c9, %c0_32] : memref<96x128xbf16, #tpu.memory_space<vmem>>, vector<64x128xbf16>
    %59 = vector.broadcast %30 : vector<64x1xbf16> to vector<64x128xbf16>
    %60 = arith.mulf %58, %59 : vector<64x128xbf16>
    %c2 = arith.constant 2 : index
    %c0_33 = arith.constant 0 : index
    %c0_34 = arith.constant 0 : index
    %61 = vector.load %arg5[%c2, %c0_33, %c0_34] : memref<9x128x128xbf16, #tpu.memory_space<vmem>>, vector<1x128x128xbf16>
    %62 = vector.shape_cast %61 : vector<1x128x128xbf16> to vector<128x128xbf16>
    %cst_35 = arith.constant dense<0.000000e+00> : vector<64x128xf32>
    %63 = tpu.matmul %60, %62, %cst_35 {dimension_numbers = #tpu.dot_dimension_numbers<[1], [0], [0], [1], [0, 0, 1, 1], [], []>} : vector<64x128xbf16>, vector<128x128xbf16>, vector<64x128xf32> -> vector<64x128xf32>
    %64 = arith.addf %57, %63 : vector<64x128xf32>
    %c15 = arith.constant 15 : index
    %c0_36 = arith.constant 0 : index
    %65 = vector.load %arg17[%c15, %c0_36] : memref<96x128xbf16, #tpu.memory_space<vmem>>, vector<64x128xbf16>
    %66 = vector.broadcast %25 : vector<64x1xbf16> to vector<64x128xbf16>
    %67 = arith.mulf %65, %66 : vector<64x128xbf16>
    %c3 = arith.constant 3 : index
    %c0_37 = arith.constant 0 : index
    %c0_38 = arith.constant 0 : index
    %68 = vector.load %arg5[%c3, %c0_37, %c0_38] : memref<9x128x128xbf16, #tpu.memory_space<vmem>>, vector<1x128x128xbf16>
    %69 = vector.shape_cast %68 : vector<1x128x128xbf16> to vector<128x128xbf16>
    %cst_39 = arith.constant dense<0.000000e+00> : vector<64x128xf32>
    %70 = tpu.matmul %67, %69, %cst_39 {dimension_numbers = #tpu.dot_dimension_numbers<[1], [0], [0], [1], [0, 0, 1, 1], [], []>} : vector<64x128xbf16>, vector<128x128xbf16>, vector<64x128xf32> -> vector<64x128xf32>
    %71 = arith.addf %64, %70 : vector<64x128xf32>
    %c16_40 = arith.constant 16 : index
    %c0_41 = arith.constant 0 : index
    %72 = vector.load %arg17[%c16_40, %c0_41] : memref<96x128xbf16, #tpu.memory_space<vmem>>, vector<64x128xbf16>
    %c4 = arith.constant 4 : index
    %c0_42 = arith.constant 0 : index
    %c0_43 = arith.constant 0 : index
    %73 = vector.load %arg5[%c4, %c0_42, %c0_43] : memref<9x128x128xbf16, #tpu.memory_space<vmem>>, vector<1x128x128xbf16>
    %74 = vector.shape_cast %73 : vector<1x128x128xbf16> to vector<128x128xbf16>
    %cst_44 = arith.constant dense<0.000000e+00> : vector<64x128xf32>
    %75 = tpu.matmul %72, %74, %cst_44 {dimension_numbers = #tpu.dot_dimension_numbers<[1], [0], [0], [1], [0, 0, 1, 1], [], []>} : vector<64x128xbf16>, vector<128x128xbf16>, vector<64x128xf32> -> vector<64x128xf32>
    %76 = arith.addf %71, %75 : vector<64x128xf32>
    %c17 = arith.constant 17 : index
    %c0_45 = arith.constant 0 : index
    %77 = vector.load %arg17[%c17, %c0_45] : memref<96x128xbf16, #tpu.memory_space<vmem>>, vector<64x128xbf16>
    %78 = vector.broadcast %30 : vector<64x1xbf16> to vector<64x128xbf16>
    %79 = arith.mulf %77, %78 : vector<64x128xbf16>
    %c5 = arith.constant 5 : index
    %c0_46 = arith.constant 0 : index
    %c0_47 = arith.constant 0 : index
    %80 = vector.load %arg5[%c5, %c0_46, %c0_47] : memref<9x128x128xbf16, #tpu.memory_space<vmem>>, vector<1x128x128xbf16>
    %81 = vector.shape_cast %80 : vector<1x128x128xbf16> to vector<128x128xbf16>
    %cst_48 = arith.constant dense<0.000000e+00> : vector<64x128xf32>
    %82 = tpu.matmul %79, %81, %cst_48 {dimension_numbers = #tpu.dot_dimension_numbers<[1], [0], [0], [1], [0, 0, 1, 1], [], []>} : vector<64x128xbf16>, vector<128x128xbf16>, vector<64x128xf32> -> vector<64x128xf32>
    %83 = arith.addf %76, %82 : vector<64x128xf32>
    %c23 = arith.constant 23 : index
    %c0_49 = arith.constant 0 : index
    %84 = vector.load %arg17[%c23, %c0_49] : memref<96x128xbf16, #tpu.memory_space<vmem>>, vector<64x128xbf16>
    %85 = vector.broadcast %25 : vector<64x1xbf16> to vector<64x128xbf16>
    %86 = arith.mulf %84, %85 : vector<64x128xbf16>
    %c6 = arith.constant 6 : index
    %c0_50 = arith.constant 0 : index
    %c0_51 = arith.constant 0 : index
    %87 = vector.load %arg5[%c6, %c0_50, %c0_51] : memref<9x128x128xbf16, #tpu.memory_space<vmem>>, vector<1x128x128xbf16>
    %88 = vector.shape_cast %87 : vector<1x128x128xbf16> to vector<128x128xbf16>
    %cst_52 = arith.constant dense<0.000000e+00> : vector<64x128xf32>
    %89 = tpu.matmul %86, %88, %cst_52 {dimension_numbers = #tpu.dot_dimension_numbers<[1], [0], [0], [1], [0, 0, 1, 1], [], []>} : vector<64x128xbf16>, vector<128x128xbf16>, vector<64x128xf32> -> vector<64x128xf32>
    %90 = arith.addf %83, %89 : vector<64x128xf32>
    %c24 = arith.constant 24 : index
    %c0_53 = arith.constant 0 : index
    %91 = vector.load %arg17[%c24, %c0_53] : memref<96x128xbf16, #tpu.memory_space<vmem>>, vector<64x128xbf16>
    %c7_54 = arith.constant 7 : index
    %c0_55 = arith.constant 0 : index
    %c0_56 = arith.constant 0 : index
    %92 = vector.load %arg5[%c7_54, %c0_55, %c0_56] : memref<9x128x128xbf16, #tpu.memory_space<vmem>>, vector<1x128x128xbf16>
    %93 = vector.shape_cast %92 : vector<1x128x128xbf16> to vector<128x128xbf16>
    %cst_57 = arith.constant dense<0.000000e+00> : vector<64x128xf32>
    %94 = tpu.matmul %91, %93, %cst_57 {dimension_numbers = #tpu.dot_dimension_numbers<[1], [0], [0], [1], [0, 0, 1, 1], [], []>} : vector<64x128xbf16>, vector<128x128xbf16>, vector<64x128xf32> -> vector<64x128xf32>
    %95 = arith.addf %90, %94 : vector<64x128xf32>
    %c25 = arith.constant 25 : index
    %c0_58 = arith.constant 0 : index
    %96 = vector.load %arg17[%c25, %c0_58] : memref<96x128xbf16, #tpu.memory_space<vmem>>, vector<64x128xbf16>
    %97 = vector.broadcast %30 : vector<64x1xbf16> to vector<64x128xbf16>
    %98 = arith.mulf %96, %97 : vector<64x128xbf16>
    %c8_59 = arith.constant 8 : index
    %c0_60 = arith.constant 0 : index
    %c0_61 = arith.constant 0 : index
    %99 = vector.load %arg5[%c8_59, %c0_60, %c0_61] : memref<9x128x128xbf16, #tpu.memory_space<vmem>>, vector<1x128x128xbf16>
    %100 = vector.shape_cast %99 : vector<1x128x128xbf16> to vector<128x128xbf16>
    %cst_62 = arith.constant dense<0.000000e+00> : vector<64x128xf32>
    %101 = tpu.matmul %98, %100, %cst_62 {dimension_numbers = #tpu.dot_dimension_numbers<[1], [0], [0], [1], [0, 0, 1, 1], [], []>} : vector<64x128xbf16>, vector<128x128xbf16>, vector<64x128xf32> -> vector<64x128xf32>
    %102 = arith.addf %95, %101 : vector<64x128xf32>
    %103 = vector.broadcast %41 : vector<1x128xf32> to vector<64x128xf32>
    %104 = arith.mulf %102, %103 : vector<64x128xf32>
    %105 = vector.broadcast %42 : vector<1x128xf32> to vector<64x128xf32>
    %106 = arith.addf %104, %105 : vector<64x128xf32>
    %cst_63 = arith.constant 0.000000e+00 : f32
    %107 = vector.broadcast %cst_63 : f32 to vector<64x128xf32>
    %108 = arith.maximumf %106, %107 : vector<64x128xf32>
    %c0_64 = arith.constant 0 : index
    %c0_65 = arith.constant 0 : index
    %109 = vector.load %arg9[%c0_64, %c0_65] : memref<1x128xf32, #tpu.memory_space<vmem>>, vector<1x128xf32>
    %c0_66 = arith.constant 0 : index
    %c0_67 = arith.constant 0 : index
    %110 = vector.load %arg10[%c0_66, %c0_67] : memref<1x128xf32, #tpu.memory_space<vmem>>, vector<1x128xf32>
    %111 = arith.truncf %108 : vector<64x128xf32> to vector<64x128xbf16>
    %c16_68 = arith.constant 16 : index
    %c0_69 = arith.constant 0 : index
    %112 = vector.load %arg17[%c16_68, %c0_69] : memref<96x128xbf16, #tpu.memory_space<vmem>>, vector<64x128xbf16>
    tpu.vector_store %arg17[%c16_68, %c0_69], %111 {strides = array<i32>} : memref<96x128xbf16, #tpu.memory_space<vmem>>, vector<64x128xbf16>,
    %cst_70 = arith.constant 0.000000e+00 : f32
    %113 = vector.broadcast %cst_70 : f32 to vector<64x128xf32>
    %c7_71 = arith.constant 7 : index
    %c0_72 = arith.constant 0 : index
    %114 = vector.load %arg17[%c7_71, %c0_72] : memref<96x128xbf16, #tpu.memory_space<vmem>>, vector<64x128xbf16>
    %115 = vector.broadcast %25 : vector<64x1xbf16> to vector<64x128xbf16>
    %116 = arith.mulf %114, %115 : vector<64x128xbf16>
    %c0_73 = arith.constant 0 : index
    %c0_74 = arith.constant 0 : index
    %c0_75 = arith.constant 0 : index
    %117 = vector.load %arg8[%c0_73, %c0_74, %c0_75] : memref<9x128x128xbf16, #tpu.memory_space<vmem>>, vector<1x128x128xbf16>
    %118 = vector.shape_cast %117 : vector<1x128x128xbf16> to vector<128x128xbf16>
    %cst_76 = arith.constant dense<0.000000e+00> : vector<64x128xf32>
    %119 = tpu.matmul %116, %118, %cst_76 {dimension_numbers = #tpu.dot_dimension_numbers<[1], [0], [0], [1], [0, 0, 1, 1], [], []>} : vector<64x128xbf16>, vector<128x128xbf16>, vector<64x128xf32> -> vector<64x128xf32>
    %120 = arith.addf %113, %119 : vector<64x128xf32>
    %c8_77 = arith.constant 8 : index
    %c0_78 = arith.constant 0 : index
    %121 = vector.load %arg17[%c8_77, %c0_78] : memref<96x128xbf16, #tpu.memory_space<vmem>>, vector<64x128xbf16>
    %c1_79 = arith.constant 1 : index
    %c0_80 = arith.constant 0 : index
    %c0_81 = arith.constant 0 : index
    %122 = vector.load %arg8[%c1_79, %c0_80, %c0_81] : memref<9x128x128xbf16, #tpu.memory_space<vmem>>, vector<1x128x128xbf16>
    %123 = vector.shape_cast %122 : vector<1x128x128xbf16> to vector<128x128xbf16>
    %cst_82 = arith.constant dense<0.000000e+00> : vector<64x128xf32>
    %124 = tpu.matmul %121, %123, %cst_82 {dimension_numbers = #tpu.dot_dimension_numbers<[1], [0], [0], [1], [0, 0, 1, 1], [], []>} : vector<64x128xbf16>, vector<128x128xbf16>, vector<64x128xf32> -> vector<64x128xf32>
    %125 = arith.addf %120, %124 : vector<64x128xf32>
    %c9_83 = arith.constant 9 : index
    %c0_84 = arith.constant 0 : index
    %126 = vector.load %arg17[%c9_83, %c0_84] : memref<96x128xbf16, #tpu.memory_space<vmem>>, vector<64x128xbf16>
    %127 = vector.broadcast %30 : vector<64x1xbf16> to vector<64x128xbf16>
    %128 = arith.mulf %126, %127 : vector<64x128xbf16>
    %c2_85 = arith.constant 2 : index
    %c0_86 = arith.constant 0 : index
    %c0_87 = arith.constant 0 : index
    %129 = vector.load %arg8[%c2_85, %c0_86, %c0_87] : memref<9x128x128xbf16, #tpu.memory_space<vmem>>, vector<1x128x128xbf16>
    %130 = vector.shape_cast %129 : vector<1x128x128xbf16> to vector<128x128xbf16>
    %cst_88 = arith.constant dense<0.000000e+00> : vector<64x128xf32>
    %131 = tpu.matmul %128, %130, %cst_88 {dimension_numbers = #tpu.dot_dimension_numbers<[1], [0], [0], [1], [0, 0, 1, 1], [], []>} : vector<64x128xbf16>, vector<128x128xbf16>, vector<64x128xf32> -> vector<64x128xf32>
    %132 = arith.addf %125, %131 : vector<64x128xf32>
    %c15_89 = arith.constant 15 : index
    %c0_90 = arith.constant 0 : index
    %133 = vector.load %arg17[%c15_89, %c0_90] : memref<96x128xbf16, #tpu.memory_space<vmem>>, vector<64x128xbf16>
    %134 = vector.broadcast %25 : vector<64x1xbf16> to vector<64x128xbf16>
    %135 = arith.mulf %133, %134 : vector<64x128xbf16>
    %c3_91 = arith.constant 3 : index
    %c0_92 = arith.constant 0 : index
    %c0_93 = arith.constant 0 : index
    %136 = vector.load %arg8[%c3_91, %c0_92, %c0_93] : memref<9x128x128xbf16, #tpu.memory_space<vmem>>, vector<1x128x128xbf16>
    %137 = vector.shape_cast %136 : vector<1x128x128xbf16> to vector<128x128xbf16>
    %cst_94 = arith.constant dense<0.000000e+00> : vector<64x128xf32>
    %138 = tpu.matmul %135, %137, %cst_94 {dimension_numbers = #tpu.dot_dimension_numbers<[1], [0], [0], [1], [0, 0, 1, 1], [], []>} : vector<64x128xbf16>, vector<128x128xbf16>, vector<64x128xf32> -> vector<64x128xf32>
    %139 = arith.addf %132, %138 : vector<64x128xf32>
    %c16_95 = arith.constant 16 : index
    %c0_96 = arith.constant 0 : index
    %140 = vector.load %arg17[%c16_95, %c0_96] : memref<96x128xbf16, #tpu.memory_space<vmem>>, vector<64x128xbf16>
    %c4_97 = arith.constant 4 : index
    %c0_98 = arith.constant 0 : index
    %c0_99 = arith.constant 0 : index
    %141 = vector.load %arg8[%c4_97, %c0_98, %c0_99] : memref<9x128x128xbf16, #tpu.memory_space<vmem>>, vector<1x128x128xbf16>
    %142 = vector.shape_cast %141 : vector<1x128x128xbf16> to vector<128x128xbf16>
    %cst_100 = arith.constant dense<0.000000e+00> : vector<64x128xf32>
    %143 = tpu.matmul %140, %142, %cst_100 {dimension_numbers = #tpu.dot_dimension_numbers<[1], [0], [0], [1], [0, 0, 1, 1], [], []>} : vector<64x128xbf16>, vector<128x128xbf16>, vector<64x128xf32> -> vector<64x128xf32>
    %144 = arith.addf %139, %143 : vector<64x128xf32>
    %c17_101 = arith.constant 17 : index
    %c0_102 = arith.constant 0 : index
    %145 = vector.load %arg17[%c17_101, %c0_102] : memref<96x128xbf16, #tpu.memory_space<vmem>>, vector<64x128xbf16>
    %146 = vector.broadcast %30 : vector<64x1xbf16> to vector<64x128xbf16>
    %147 = arith.mulf %145, %146 : vector<64x128xbf16>
    %c5_103 = arith.constant 5 : index
    %c0_104 = arith.constant 0 : index
    %c0_105 = arith.constant 0 : index
    %148 = vector.load %arg8[%c5_103, %c0_104, %c0_105] : memref<9x128x128xbf16, #tpu.memory_space<vmem>>, vector<1x128x128xbf16>
    %149 = vector.shape_cast %148 : vector<1x128x128xbf16> to vector<128x128xbf16>
    %cst_106 = arith.constant dense<0.000000e+00> : vector<64x128xf32>
    %150 = tpu.matmul %147, %149, %cst_106 {dimension_numbers = #tpu.dot_dimension_numbers<[1], [0], [0], [1], [0, 0, 1, 1], [], []>} : vector<64x128xbf16>, vector<128x128xbf16>, vector<64x128xf32> -> vector<64x128xf32>
    %151 = arith.addf %144, %150 : vector<64x128xf32>
    %c23_107 = arith.constant 23 : index
    %c0_108 = arith.constant 0 : index
    %152 = vector.load %arg17[%c23_107, %c0_108] : memref<96x128xbf16, #tpu.memory_space<vmem>>, vector<64x128xbf16>
    %153 = vector.broadcast %25 : vector<64x1xbf16> to vector<64x128xbf16>
    %154 = arith.mulf %152, %153 : vector<64x128xbf16>
    %c6_109 = arith.constant 6 : index
    %c0_110 = arith.constant 0 : index
    %c0_111 = arith.constant 0 : index
    %155 = vector.load %arg8[%c6_109, %c0_110, %c0_111] : memref<9x128x128xbf16, #tpu.memory_space<vmem>>, vector<1x128x128xbf16>
    %156 = vector.shape_cast %155 : vector<1x128x128xbf16> to vector<128x128xbf16>
    %cst_112 = arith.constant dense<0.000000e+00> : vector<64x128xf32>
    %157 = tpu.matmul %154, %156, %cst_112 {dimension_numbers = #tpu.dot_dimension_numbers<[1], [0], [0], [1], [0, 0, 1, 1], [], []>} : vector<64x128xbf16>, vector<128x128xbf16>, vector<64x128xf32> -> vector<64x128xf32>
    %158 = arith.addf %151, %157 : vector<64x128xf32>
    %c24_113 = arith.constant 24 : index
    %c0_114 = arith.constant 0 : index
    %159 = vector.load %arg17[%c24_113, %c0_114] : memref<96x128xbf16, #tpu.memory_space<vmem>>, vector<64x128xbf16>
    %c7_115 = arith.constant 7 : index
    %c0_116 = arith.constant 0 : index
    %c0_117 = arith.constant 0 : index
    %160 = vector.load %arg8[%c7_115, %c0_116, %c0_117] : memref<9x128x128xbf16, #tpu.memory_space<vmem>>, vector<1x128x128xbf16>
    %161 = vector.shape_cast %160 : vector<1x128x128xbf16> to vector<128x128xbf16>
    %cst_118 = arith.constant dense<0.000000e+00> : vector<64x128xf32>
    %162 = tpu.matmul %159, %161, %cst_118 {dimension_numbers = #tpu.dot_dimension_numbers<[1], [0], [0], [1], [0, 0, 1, 1], [], []>} : vector<64x128xbf16>, vector<128x128xbf16>, vector<64x128xf32> -> vector<64x128xf32>
    %163 = arith.addf %158, %162 : vector<64x128xf32>
    %c25_119 = arith.constant 25 : index
    %c0_120 = arith.constant 0 : index
    %164 = vector.load %arg17[%c25_119, %c0_120] : memref<96x128xbf16, #tpu.memory_space<vmem>>, vector<64x128xbf16>
    %165 = vector.broadcast %30 : vector<64x1xbf16> to vector<64x128xbf16>
    %166 = arith.mulf %164, %165 : vector<64x128xbf16>
    %c8_121 = arith.constant 8 : index
    %c0_122 = arith.constant 0 : index
    %c0_123 = arith.constant 0 : index
    %167 = vector.load %arg8[%c8_121, %c0_122, %c0_123] : memref<9x128x128xbf16, #tpu.memory_space<vmem>>, vector<1x128x128xbf16>
    %168 = vector.shape_cast %167 : vector<1x128x128xbf16> to vector<128x128xbf16>
    %cst_124 = arith.constant dense<0.000000e+00> : vector<64x128xf32>
    %169 = tpu.matmul %166, %168, %cst_124 {dimension_numbers = #tpu.dot_dimension_numbers<[1], [0], [0], [1], [0, 0, 1, 1], [], []>} : vector<64x128xbf16>, vector<128x128xbf16>, vector<64x128xf32> -> vector<64x128xf32>
    %170 = arith.addf %163, %169 : vector<64x128xf32>
    %171 = vector.broadcast %109 : vector<1x128xf32> to vector<64x128xf32>
    %172 = arith.mulf %170, %171 : vector<64x128xf32>
    %173 = vector.broadcast %110 : vector<1x128xf32> to vector<64x128xf32>
    %174 = arith.addf %172, %173 : vector<64x128xf32>
    %175 = arith.addf %174, %40 : vector<64x128xf32>
    %cst_125 = arith.constant 0.000000e+00 : f32
    %176 = vector.broadcast %cst_125 : f32 to vector<64x128xf32>
    %177 = arith.maximumf %175, %176 : vector<64x128xf32>
    %178 = arith.truncf %177 : vector<64x128xf32> to vector<64x128xbf16>
    %c0_126 = arith.constant 0 : index
    %c0_127 = arith.constant 0 : index
    %179 = vector.load %arg11[%c0_126, %c0_127] : memref<128x64xbf16, #tpu.memory_space<vmem>>, vector<128x64xbf16>
    %cst_128 = arith.constant dense<0.000000e+00> : vector<64x64xf32>
    %180 = tpu.matmul %178, %179, %cst_128 {dimension_numbers = #tpu.dot_dimension_numbers<[1], [0], [0], [1], [0, 0, 1, 1], [], []>} : vector<64x128xbf16>, vector<128x64xbf16>, vector<64x64xf32> -> vector<64x64xf32>
    %c0_129 = arith.constant 0 : index
    %c0_130 = arith.constant 0 : index
    %181 = vector.load %arg12[%c0_129, %c0_130] : memref<1x64xf32, #tpu.memory_space<vmem>>, vector<1x64xf32>
    %182 = vector.broadcast %181 : vector<1x64xf32> to vector<64x64xf32>
    %183 = arith.addf %180, %182 : vector<64x64xf32>
    %cst_131 = arith.constant dense<0.000000e+00> : vector<128xf32>
    %184 = vector.multi_reduction <add>, %177, %cst_131 [0] : vector<64x128xf32> to vector<128xf32>
    %185 = vector.shape_cast %184 : vector<128xf32> to vector<1x128xf32>
    %cst_132 = arith.constant 6.400000e+01 : f32
    %186 = vector.broadcast %cst_132 : f32 to vector<1x128xf32>
    %187 = arith.divf %185, %186 : vector<1x128xf32>
    %188 = arith.truncf %187 : vector<1x128xf32> to vector<1x128xbf16>
    %c0_133 = arith.constant 0 : index
    %c0_134 = arith.constant 0 : index
    %189 = vector.load %arg13[%c0_133, %c0_134] : memref<128x64xbf16, #tpu.memory_space<vmem>>, vector<128x64xbf16>
    %cst_135 = arith.constant dense<0.000000e+00> : vector<1x64xf32>
    %190 = tpu.matmul %188, %189, %cst_135 {dimension_numbers = #tpu.dot_dimension_numbers<[1], [0], [0], [1], [0, 0, 1, 1], [], []>} : vector<1x128xbf16>, vector<128x64xbf16>, vector<1x64xf32> -> vector<1x64xf32>
    %c0_136 = arith.constant 0 : index
    %c0_137 = arith.constant 0 : index
    %191 = vector.load %arg14[%c0_136, %c0_137] : memref<1x64xf32, #tpu.memory_space<vmem>>, vector<1x64xf32>
    %192 = arith.addf %190, %191 : vector<1x64xf32>
    %193 = vector.extract_strided_slice %183 {offsets = [0, 0], sizes = [64, 16], strides = [1, 1]} : vector<64x64xf32> to vector<64x16xf32>
    %cst_138 = arith.constant dense<0xFF800000> : vector<64xf32>
    %194 = vector.multi_reduction <maximumf>, %193, %cst_138 [1] : vector<64x16xf32> to vector<64xf32>
    %195 = vector.shape_cast %194 : vector<64xf32> to vector<64x1xf32>
    %196 = vector.broadcast %195 : vector<64x1xf32> to vector<64x16xf32>
    %197 = arith.subf %193, %196 : vector<64x16xf32>
    %198 = math.exp %197 : vector<64x16xf32>
    %cst_139 = arith.constant dense<0.000000e+00> : vector<64xf32>
    %199 = vector.multi_reduction <add>, %198, %cst_139 [1] : vector<64x16xf32> to vector<64xf32>
    %200 = vector.shape_cast %199 : vector<64xf32> to vector<64x1xf32>
    %201 = vector.broadcast %200 : vector<64x1xf32> to vector<64x16xf32>
    %202 = arith.divf %198, %201 : vector<64x16xf32>
    %cst_140 = arith.constant dense<0.000000e+00> : vector<16xf32>
    %203 = vector.multi_reduction <add>, %202, %cst_140 [0] : vector<64x16xf32> to vector<16xf32>
    %204 = vector.shape_cast %203 : vector<16xf32> to vector<1x16xf32>
    %cst_141 = arith.constant 6.400000e+01 : f32
    %205 = vector.broadcast %cst_141 : f32 to vector<1x16xf32>
    %206 = arith.divf %204, %205 : vector<1x16xf32>
    %207 = vector.extract_strided_slice %192 {offsets = [0, 0], sizes = [1, 16], strides = [1, 1]} : vector<1x64xf32> to vector<1x16xf32>
    %cst_142 = arith.constant dense<0xFF800000> : vector<1xf32>
    %208 = vector.multi_reduction <maximumf>, %207, %cst_142 [1] : vector<1x16xf32> to vector<1xf32>
    %209 = vector.shape_cast %208 : vector<1xf32> to vector<1x1xf32>
    %210 = vector.broadcast %209 : vector<1x1xf32> to vector<1x16xf32>
    %211 = arith.subf %207, %210 : vector<1x16xf32>
    %212 = math.exp %211 : vector<1x16xf32>
    %cst_143 = arith.constant dense<0.000000e+00> : vector<1xf32>
    %213 = vector.multi_reduction <add>, %212, %cst_143 [1] : vector<1x16xf32> to vector<1xf32>
    %214 = vector.shape_cast %213 : vector<1xf32> to vector<1x1xf32>
    %215 = vector.broadcast %214 : vector<1x1xf32> to vector<1x16xf32>
    %216 = arith.divf %212, %215 : vector<1x16xf32>
    %217 = vector.extract_strided_slice %183 {offsets = [0, 16], sizes = [64, 16], strides = [1, 1]} : vector<64x64xf32> to vector<64x16xf32>
    %cst_144 = arith.constant dense<0xFF800000> : vector<64xf32>
    %218 = vector.multi_reduction <maximumf>, %217, %cst_144 [1] : vector<64x16xf32> to vector<64xf32>
    %219 = vector.shape_cast %218 : vector<64xf32> to vector<64x1xf32>
    %220 = vector.broadcast %219 : vector<64x1xf32> to vector<64x16xf32>
    %221 = arith.subf %217, %220 : vector<64x16xf32>
    %222 = math.exp %221 : vector<64x16xf32>
    %cst_145 = arith.constant dense<0.000000e+00> : vector<64xf32>
    %223 = vector.multi_reduction <add>, %222, %cst_145 [1] : vector<64x16xf32> to vector<64xf32>
    %224 = vector.shape_cast %223 : vector<64xf32> to vector<64x1xf32>
    %225 = vector.broadcast %224 : vector<64x1xf32> to vector<64x16xf32>
    %226 = arith.divf %222, %225 : vector<64x16xf32>
    %cst_146 = arith.constant dense<0.000000e+00> : vector<16xf32>
    %227 = vector.multi_reduction <add>, %226, %cst_146 [0] : vector<64x16xf32> to vector<16xf32>
    %228 = vector.shape_cast %227 : vector<16xf32> to vector<1x16xf32>
    %cst_147 = arith.constant 6.400000e+01 : f32
    %229 = vector.broadcast %cst_147 : f32 to vector<1x16xf32>
    %230 = arith.divf %228, %229 : vector<1x16xf32>
    %231 = vector.extract_strided_slice %192 {offsets = [0, 16], sizes = [1, 16], strides = [1, 1]} : vector<1x64xf32> to vector<1x16xf32>
    %cst_148 = arith.constant dense<0xFF800000> : vector<1xf32>
    %232 = vector.multi_reduction <maximumf>, %231, %cst_148 [1] : vector<1x16xf32> to vector<1xf32>
    %233 = vector.shape_cast %232 : vector<1xf32> to vector<1x1xf32>
    %234 = vector.broadcast %233 : vector<1x1xf32> to vector<1x16xf32>
    %235 = arith.subf %231, %234 : vector<1x16xf32>
    %236 = math.exp %235 : vector<1x16xf32>
    %cst_149 = arith.constant dense<0.000000e+00> : vector<1xf32>
    %237 = vector.multi_reduction <add>, %236, %cst_149 [1] : vector<1x16xf32> to vector<1xf32>
    %238 = vector.shape_cast %237 : vector<1xf32> to vector<1x1xf32>
    %239 = vector.broadcast %238 : vector<1x1xf32> to vector<1x16xf32>
    %240 = arith.divf %236, %239 : vector<1x16xf32>
    %241 = vector.extract_strided_slice %183 {offsets = [0, 32], sizes = [64, 16], strides = [1, 1]} : vector<64x64xf32> to vector<64x16xf32>
    %cst_150 = arith.constant dense<0xFF800000> : vector<64xf32>
    %242 = vector.multi_reduction <maximumf>, %241, %cst_150 [1] : vector<64x16xf32> to vector<64xf32>
    %243 = vector.shape_cast %242 : vector<64xf32> to vector<64x1xf32>
    %244 = vector.broadcast %243 : vector<64x1xf32> to vector<64x16xf32>
    %245 = arith.subf %241, %244 : vector<64x16xf32>
    %246 = math.exp %245 : vector<64x16xf32>
    %cst_151 = arith.constant dense<0.000000e+00> : vector<64xf32>
    %247 = vector.multi_reduction <add>, %246, %cst_151 [1] : vector<64x16xf32> to vector<64xf32>
    %248 = vector.shape_cast %247 : vector<64xf32> to vector<64x1xf32>
    %249 = vector.broadcast %248 : vector<64x1xf32> to vector<64x16xf32>
    %250 = arith.divf %246, %249 : vector<64x16xf32>
    %cst_152 = arith.constant dense<0.000000e+00> : vector<16xf32>
    %251 = vector.multi_reduction <add>, %250, %cst_152 [0] : vector<64x16xf32> to vector<16xf32>
    %252 = vector.shape_cast %251 : vector<16xf32> to vector<1x16xf32>
    %cst_153 = arith.constant 6.400000e+01 : f32
    %253 = vector.broadcast %cst_153 : f32 to vector<1x16xf32>
    %254 = arith.divf %252, %253 : vector<1x16xf32>
    %255 = vector.extract_strided_slice %192 {offsets = [0, 32], sizes = [1, 16], strides = [1, 1]} : vector<1x64xf32> to vector<1x16xf32>
    %cst_154 = arith.constant dense<0xFF800000> : vector<1xf32>
    %256 = vector.multi_reduction <maximumf>, %255, %cst_154 [1] : vector<1x16xf32> to vector<1xf32>
    %257 = vector.shape_cast %256 : vector<1xf32> to vector<1x1xf32>
    %258 = vector.broadcast %257 : vector<1x1xf32> to vector<1x16xf32>
    %259 = arith.subf %255, %258 : vector<1x16xf32>
    %260 = math.exp %259 : vector<1x16xf32>
    %cst_155 = arith.constant dense<0.000000e+00> : vector<1xf32>
    %261 = vector.multi_reduction <add>, %260, %cst_155 [1] : vector<1x16xf32> to vector<1xf32>
    %262 = vector.shape_cast %261 : vector<1xf32> to vector<1x1xf32>
    %263 = vector.broadcast %262 : vector<1x1xf32> to vector<1x16xf32>
    %264 = arith.divf %260, %263 : vector<1x16xf32>
    %265 = vector.extract_strided_slice %183 {offsets = [0, 48], sizes = [64, 16], strides = [1, 1]} : vector<64x64xf32> to vector<64x16xf32>
    %cst_156 = arith.constant dense<0xFF800000> : vector<64xf32>
    %266 = vector.multi_reduction <maximumf>, %265, %cst_156 [1] : vector<64x16xf32> to vector<64xf32>
    %267 = vector.shape_cast %266 : vector<64xf32> to vector<64x1xf32>
    %268 = vector.broadcast %267 : vector<64x1xf32> to vector<64x16xf32>
    %269 = arith.subf %265, %268 : vector<64x16xf32>
    %270 = math.exp %269 : vector<64x16xf32>
    %cst_157 = arith.constant dense<0.000000e+00> : vector<64xf32>
    %271 = vector.multi_reduction <add>, %270, %cst_157 [1] : vector<64x16xf32> to vector<64xf32>
    %272 = vector.shape_cast %271 : vector<64xf32> to vector<64x1xf32>
    %273 = vector.broadcast %272 : vector<64x1xf32> to vector<64x16xf32>
    %274 = arith.divf %270, %273 : vector<64x16xf32>
    %cst_158 = arith.constant dense<0.000000e+00> : vector<16xf32>
    %275 = vector.multi_reduction <add>, %274, %cst_158 [0] : vector<64x16xf32> to vector<16xf32>
    %276 = vector.shape_cast %275 : vector<16xf32> to vector<1x16xf32>
    %cst_159 = arith.constant 6.400000e+01 : f32
    %277 = vector.broadcast %cst_159 : f32 to vector<1x16xf32>
    %278 = arith.divf %276, %277 : vector<1x16xf32>
    %279 = vector.extract_strided_slice %192 {offsets = [0, 48], sizes = [1, 16], strides = [1, 1]} : vector<1x64xf32> to vector<1x16xf32>
    %cst_160 = arith.constant dense<0xFF800000> : vector<1xf32>
    %280 = vector.multi_reduction <maximumf>, %279, %cst_160 [1] : vector<1x16xf32> to vector<1xf32>
    %281 = vector.shape_cast %280 : vector<1xf32> to vector<1x1xf32>
    %282 = vector.broadcast %281 : vector<1x1xf32> to vector<1x16xf32>
    %283 = arith.subf %279, %282 : vector<1x16xf32>
    %284 = math.exp %283 : vector<1x16xf32>
    %cst_161 = arith.constant dense<0.000000e+00> : vector<1xf32>
    %285 = vector.multi_reduction <add>, %284, %cst_161 [1] : vector<1x16xf32> to vector<1xf32>
    %286 = vector.shape_cast %285 : vector<1xf32> to vector<1x1xf32>
    %287 = vector.broadcast %286 : vector<1x1xf32> to vector<1x16xf32>
    %288 = arith.divf %284, %287 : vector<1x16xf32>
    %289 = tpu.concatenate %206, %230, %254, %278 in 1 : vector<1x16xf32>, vector<1x16xf32>, vector<1x16xf32>, vector<1x16xf32> -> vector<1x64xf32>
    %c0_162 = arith.constant 0 : index
    %c0_163 = arith.constant 0 : index
    %c0_164 = arith.constant 0 : index
    %290 = vector.load %arg15[%c0_162, %c0_163, %c0_164] : memref<1x1x64xf32, #tpu.memory_space<vmem>>, vector<1x1x64xf32>
    %291 = vector.shape_cast %290 : vector<1x1x64xf32> to vector<1x64xf32>
    %292 = vector.shape_cast %289 : vector<1x64xf32> to vector<1x1x64xf32>
    tpu.vector_store %arg15[%c0_162, %c0_163, %c0_164], %292 {strides = array<i32>} : memref<1x1x64xf32, #tpu.memory_space<vmem>>, vector<1x1x64xf32>,
    %293 = tpu.concatenate %216, %240, %264, %288 in 1 : vector<1x16xf32>, vector<1x16xf32>, vector<1x16xf32>, vector<1x16xf32> -> vector<1x64xf32>
    %c0_165 = arith.constant 0 : index
    %c0_166 = arith.constant 0 : index
    %c0_167 = arith.constant 0 : index
    %294 = vector.load %arg16[%c0_165, %c0_166, %c0_167] : memref<1x1x64xf32, #tpu.memory_space<vmem>>, vector<1x1x64xf32>
    %295 = vector.shape_cast %294 : vector<1x1x64xf32> to vector<1x64xf32>
    %296 = vector.shape_cast %293 : vector<1x64xf32> to vector<1x1x64xf32>
    tpu.vector_store %arg16[%c0_165, %c0_166, %c0_167], %296 {strides = array<i32>} : memref<1x1x64xf32, #tpu.memory_space<vmem>>, vector<1x1x64xf32>,
    return
  }
  func.func @transform_0(%arg0: i32) -> (i32, i32, i32) {
    %c0_i32 = arith.constant 0 : i32
    %c0_i32_0 = arith.constant 0 : i32
    %c0_i32_1 = arith.constant 0 : i32
    return %arg0, %c0_i32, %c0_i32_0 : i32, i32, i32
  }
  func.func @transform_1(%arg0: i32) -> (i32, i32) {
    %c0_i32 = arith.constant 0 : i32
    %c0_i32_0 = arith.constant 0 : i32
    %c0_i32_1 = arith.constant 0 : i32
    return %c0_i32, %c0_i32_0 : i32, i32
  }
  func.func @transform_2(%arg0: i32) -> (i32, i32) {
    %c0_i32 = arith.constant 0 : i32
    %c0_i32_0 = arith.constant 0 : i32
    %c0_i32_1 = arith.constant 0 : i32
    return %c0_i32, %c0_i32_0 : i32, i32
  }
  func.func @transform_3(%arg0: i32) -> (i32, i32) {
    %c0_i32 = arith.constant 0 : i32
    %c0_i32_0 = arith.constant 0 : i32
    %c0_i32_1 = arith.constant 0 : i32
    return %c0_i32, %c0_i32_0 : i32, i32
  }
  func.func @transform_4(%arg0: i32) -> (i32, i32, i32) {
    %c0_i32 = arith.constant 0 : i32
    %c0_i32_0 = arith.constant 0 : i32
    %c0_i32_1 = arith.constant 0 : i32
    %c0_i32_2 = arith.constant 0 : i32
    return %c0_i32, %c0_i32_0, %c0_i32_1 : i32, i32, i32
  }
  func.func @transform_5(%arg0: i32) -> (i32, i32) {
    %c0_i32 = arith.constant 0 : i32
    %c0_i32_0 = arith.constant 0 : i32
    %c0_i32_1 = arith.constant 0 : i32
    return %c0_i32, %c0_i32_0 : i32, i32
  }
  func.func @transform_6(%arg0: i32) -> (i32, i32) {
    %c0_i32 = arith.constant 0 : i32
    %c0_i32_0 = arith.constant 0 : i32
    %c0_i32_1 = arith.constant 0 : i32
    return %c0_i32, %c0_i32_0 : i32, i32
  }
  func.func @transform_7(%arg0: i32) -> (i32, i32, i32) {
    %c0_i32 = arith.constant 0 : i32
    %c0_i32_0 = arith.constant 0 : i32
    %c0_i32_1 = arith.constant 0 : i32
    %c0_i32_2 = arith.constant 0 : i32
    return %c0_i32, %c0_i32_0, %c0_i32_1 : i32, i32, i32
  }
  func.func @transform_8(%arg0: i32) -> (i32, i32) {
    %c0_i32 = arith.constant 0 : i32
    %c0_i32_0 = arith.constant 0 : i32
    %c0_i32_1 = arith.constant 0 : i32
    return %c0_i32, %c0_i32_0 : i32, i32
  }
  func.func @transform_9(%arg0: i32) -> (i32, i32) {
    %c0_i32 = arith.constant 0 : i32
    %c0_i32_0 = arith.constant 0 : i32
    %c0_i32_1 = arith.constant 0 : i32
    return %c0_i32, %c0_i32_0 : i32, i32
  }
  func.func @transform_10(%arg0: i32) -> (i32, i32) {
    %c0_i32 = arith.constant 0 : i32
    %c0_i32_0 = arith.constant 0 : i32
    %c0_i32_1 = arith.constant 0 : i32
    return %c0_i32, %c0_i32_0 : i32, i32
  }
  func.func @transform_11(%arg0: i32) -> (i32, i32) {
    %c0_i32 = arith.constant 0 : i32
    %c0_i32_0 = arith.constant 0 : i32
    %c0_i32_1 = arith.constant 0 : i32
    return %c0_i32, %c0_i32_0 : i32, i32
  }
  func.func @transform_12(%arg0: i32) -> (i32, i32) {
    %c0_i32 = arith.constant 0 : i32
    %c0_i32_0 = arith.constant 0 : i32
    %c0_i32_1 = arith.constant 0 : i32
    return %c0_i32, %c0_i32_0 : i32, i32
  }
  func.func @transform_13(%arg0: i32) -> (i32, i32) {
    %c0_i32 = arith.constant 0 : i32
    %c0_i32_0 = arith.constant 0 : i32
    %c0_i32_1 = arith.constant 0 : i32
    return %c0_i32, %c0_i32_0 : i32, i32
  }
  func.func @transform_14(%arg0: i32) -> (i32, i32, i32) {
    %c0_i32 = arith.constant 0 : i32
    %c0_i32_0 = arith.constant 0 : i32
    %c0_i32_1 = arith.constant 0 : i32
    return %arg0, %c0_i32, %c0_i32_0 : i32, i32, i32
  }
  func.func @transform_15(%arg0: i32) -> (i32, i32, i32) {
    %c0_i32 = arith.constant 0 : i32
    %c0_i32_0 = arith.constant 0 : i32
    %c0_i32_1 = arith.constant 0 : i32
    return %arg0, %c0_i32, %c0_i32_0 : i32, i32, i32
  }
}

</mosaic_0001>

<bundles_post_ra>
// kernel: pspnet_deepsup_forward.1
= control target key start
LH: loop header
LB: loop body
LE: loop exit
PB: predicated region body
PF: predicated region fallthrough
CT: control target
= control target key end

     0   :  { %s7673_s18 = smov 0   ;;  %s9501_s0 = inlined_call_operand.vmem [shape: bf16[2,64,128], index: 0, kind: input, shape index: {}]   ;;  %s9502_s1 = inlined_call_operand.vmem [shape: bf16[128,128], index: 1, kind: input, shape index: {}]   ;;  %s9503_s2 = inlined_call_operand.vmem [shape: f32[1,128], index: 2, kind: input, shape index: {}]   ;;  %s9504_s3 = inlined_call_operand.vmem [shape: f32[1,128], index: 3, kind: input, shape index: {}]   ;;  %s9505_s4 = inlined_call_operand.vmem [shape: bf16[9,128,128], index: 4, kind: input, shape index: {}]   ;;  %s9506_s5 = inlined_call_operand.vmem [shape: f32[1,128], index: 5, kind: input, shape index: {}]   ;;  %s9507_s6 = inlined_call_operand.vmem [shape: f32[1,128], index: 6, kind: input, shape index: {}]   ;;  %s9508_s7 = inlined_call_operand.vmem [shape: bf16[9,128,128], index: 7, kind: input, shape index: {}]   ;;  %s9509_s8 = inlined_call_operand.vmem [shape: f32[1,128], index: 8, kind: input, shape index: {}]   ;;  %s9510_s9 = inlined_call_operand.vmem [shape: f32[1,128], index: 9, kind: input, shape index: {}]   ;;  %s9511_s10 = inlined_call_operand.vmem [shape: bf16[128,64], index: 10, kind: input, shape index: {}]   ;;  %s9512_s11 = inlined_call_operand.vmem [shape: f32[1,64], index: 11, kind: input, shape index: {}]   ;;  %s9513_s12 = inlined_call_operand.vmem [shape: bf16[128,64], index: 12, kind: input, shape index: {}]   ;;  %s9514_s13 = inlined_call_operand.vmem [shape: f32[1,64], index: 13, kind: input, shape index: {}]   ;;  %s9515_s14 = inlined_call_operand.vmem [shape: f32[2,1,64], index: 14, kind: output, shape index: {0}]   ;;  %s9516_s15 = inlined_call_operand.vmem [shape: f32[2,1,64], index: 15, kind: output, shape index: {1}]  }
   0x1 LB: > { %s5847_s19 = sadd.s32 4294967295, %s7583_s18   ;;  %p5851_p0 = scmp.ge.s32.totalorder %s7583_s18, 1  ;;  %s7583_s18 = sphi %s7673_s18, %s26_s18  }
   0x2   : > { %p440_p1 = scmp.lt.s32.totalorder %s7583_s18, 3 }
   0x4   : > { %p441_p2 = pnand %p5851_p0, %p440_p1 }
   0x6   : > { %444 = sbr.rel (%p441_p2) target bundleno = 1847 (0x737), region = 76 }
   0xb   : > { %v7237_v0 = vld [vmem:[%s9502_s1 + $0x38] sm:$0xff]   ;;  %p489_p3 = scmp.lt.s32.totalorder %s5847_s19, 1  ;;  %v7238_v1 = vld [vmem:[%s9502_s1 + $0x30] sm:$0xff]   ;;  %v7239_v2 = vld [vmem:[%s9502_s1 + $0x28] sm:$0xff]   ;;  %v7585_v23 = vmov 0   ;;  %v505_v31 = vlaneseq  ;;  %v9517_v39 = vmov 0.0  }
   0xc   : > { %6721 = vmatprep.subr.bf16.mxu0 %v7237_v0  ;;  %v7240_v3 = vld [vmem:[%s9502_s1 + $0x20] sm:$0xff]   ;;  %v7241_v5 = vld [vmem:[%s9502_s1 + $0x18] sm:$0xff]   ;;  %v7250_v7 = vld [vmem:[%s9505_s4 + $0x70] sm:$0xff]   ;;  %501 = vst [vmem:[#allocation2] sm:$0xf] %v7585_v23  ;;  %s7592_s27 = smov 80  }
   0xd   : > { %s9653_s19 = smov (!%p489_p3, %s5847_s19), 1  ;;  %6722 = vmatpush3.bf16.msra.mxu0 %v7237_v0  ;;  %v7249_v6 = vld [vmem:[%s9505_s4 + $0x78] sm:$0xff]   ;;  %v7242_v8 = vld [vmem:[%s9502_s1 + $0x10] sm:$0xff]   ;;  %v7251_v9 = vld [vmem:[%s9505_s4 + $0x68] sm:$0xff]   ;;  %502 = vst [vmem:[#allocation2 + $0x4] sm:$0xf] %v7585_v23 }
   0xe   : > { %6723 = vmatprep.subr.bf16.mxu0 %v7238_v1  ;;  %s6407_s26 = sshll.u32 %s9653_s19, 5  ;;  %6745 = vmatprep.subr.bf16.mxu1 %v7249_v6  ;;  %v7243_v10 = vld [vmem:[%s9502_s1 + $0x8] sm:$0xff]   ;;  %v7244_v11 = vld [vmem:[%s9502_s1] sm:$0xff]   ;;  %v7252_v15 = vld [vmem:[%s9505_s4 + $0x38] sm:$0xff]   ;;  %503 = vst [vmem:[#allocation2 + $0x28] sm:$0xf] %v7585_v23  ;;  %s496_s16 = scalar_lea.vmem %s9515_s14, %s9653_s19 }
   0xf   : > { %s7696_s29 = scalar_lea.vmem %s9501_s0, %s6407_s26  ;;  %6746 = vmatpush3.bf16.msra.mxu1 %v7249_v6  ;;  %v7253_v16 = vld [vmem:[%s9505_s4 + $0x60] sm:$0xff]   ;;  %v7254_v17 = vld [vmem:[%s9505_s4 + $0x30] sm:$0xff]   ;;  %v7255_v18 = vld [vmem:[%s9505_s4 + $0x58] sm:$0xff]   ;;  %504 = vst [vmem:[#allocation2 + $0x2c] sm:$0xf] %v7585_v23  ;;  %v506_v32 = vshrl.u32 %v505_v31, 7  ;;  %s499_s21 = scalar_lea.vmem %s9516_s15, %s9653_s19 }
  0x10   : > { %v7245_v4 = vld [vmem:[%s7696_s29] sm:$0xff]   ;;  %6747 = vmatprep.subr.bf16.mxu1 %v7250_v7  ;;  %v7246_v12 = vld [vmem:[%s7696_s29 + $0x8] sm:$0xff]   ;;  %v7247_v13 = vld [vmem:[%s7696_s29 + $0x10] sm:$0xff]   ;;  %v7586_v36 = vmov 839922192   ;;  %s7590_s26 = smov 112  }
  0x11   : > { %6724 = vmatpush3.bf16.msra.mxu0 %v7238_v1  ;;  %6737 = vmatprep.mubr.bf16.mxu0 %v7245_v4  ;;  %v7248_v14 = vld [vmem:[%s7696_s29 + $0x18] sm:$0xff]   ;;  %v7256_v19 = vld [vmem:[%s9505_s4 + $0x28] sm:$0xff]   ;;  %v7257_v20 = vld [vmem:[%s9505_s4 + $0x50] sm:$0xff]   ;;  %v507_v33 = vadd.s32 8, %v506_v32  ;;  %v518_v34 = vand.u32 7, %v506_v32  ;;  %v913_v37 = vunpack.c.l.s4 %v7586_v36  ;;  %v508_v42 = vadd.s32 16, %v506_v32 }
  0x12   : > { %6725 = vmatprep.subr.bf16.mxu0 %v7239_v2  ;;  %v7258_v21 = vld [vmem:[%s9505_s4 + $0x20] sm:$0xff]   ;;  %v7259_v22 = vld [vmem:[%s9505_s4 + $0x48] sm:$0xff]   ;;  %v7260_v24 = vld [vmem:[%s9505_s4 + $0x18] sm:$0xff]   ;;  %v7779_v43 = vadd.s32 24, %v506_v32  ;;  %v7588_v46 = vmov 1985246804  }
  0x13   : > { %6748 = vmatpush3.bf16.msra.mxu1 %v7250_v7  ;;  %v7261_v25 = vld [vmem:[%s9505_s4 + $0x40] sm:$0xff]   ;;  %v7262_v26 = vld [vmem:[%s9505_s4 + $0x10] sm:$0xff]   ;;  %v7762_v27 = vld [vmem:[%s9505_s4 + $0xb8] sm:$0xff]   ;;  %v525_v35 = vand.u32 7, %v507_v33  ;;  %vm610_vm0 = vcmp.ge.s32.totalorder %v518_v34, 1  ;;  %v914_v38 = vunpack.c.0.s8 %v913_v37  ;;  %v920_v47 = vunpack.c.l.s4 %v7588_v46  ;;  %s7591_s29 = smov 96  }
  0x14   : > { %6749 = vmatprep.subr.bf16.mxu1 %v7251_v9  ;;  %v7266_v28 = vld [vmem:[%s9505_s4 + $0x8] sm:$0xff]   ;;  %v7268_v29 = vld [vmem:[%s9505_s4] sm:$0xff]   ;;  %v7774_v30 = vld [vmem:[%s9505_s4 + $0xf8] sm:$0xff]   ;;  %v5854_v40 = vsel %vm610_vm0, 1.0, %v9517_v39  ;;  %v532_v49 = vand.u32 7, %v508_v42  ;;  %v539_v50 = vand.u32 7, %v7779_v43 }
  0x15   : > { %6726 = vmatpush3.bf16.msra.mxu0 %v7239_v2  ;;  %vm611_vm1 = vcmp.ge.s32.totalorder %v525_v35, 1  ;;  %v7781_v45 = vsub.s32 %v914_v38, %v506_v32  ;;  %v921_v51 = vunpack.c.0.s8 %v920_v47  ;;  %v7785_v52 = vadd.s32 32, %v506_v32 }
  0x16   : > { %6727 = vmatprep.subr.bf16.mxu0 %v7240_v3  ;;  %v5855_v41 = vsel %vm611_vm1, 1.0, %v9517_v39  ;;  %v7787_v53 = vadd.s32 40, %v506_v32  ;;  %vm612_vm2 = vcmp.ge.s32.totalorder %v532_v49, 1  ;;  %vm613_vm3 = vcmp.ge.s32.totalorder %v539_v50, 1 }
  0x17   : > { %6750 = vmatpush3.bf16.msra.mxu1 %v7251_v9  ;;  %v634_v44 = vpack.c.bf16 %v5855_v41, %v5854_v40  ;;  %v7789_v56 = vsub.s32 %v921_v51, %v506_v32  ;;  %v546_v57 = vand.u32 7, %v7785_v52  ;;  %v5856_v59 = vsel %vm612_vm2, 1.0, %v9517_v39 }
  0x18   : > { %6751 = vmatprep.subr.bf16.mxu1 %v7253_v16  ;;  %v553_v58 = vand.u32 7, %v7787_v53  ;;  %v5857_v60 = vsel %vm613_vm3, 1.0, %v9517_v39  ;;  %v7807_v6 = vadd.s32 56, %v506_v32  ;;  %vm968_vm6 = vsmask.f32 3328 }
  0x19   : > { %6728 = vmatpush3.bf16.msra.mxu0 %v7240_v3  ;;  %v918_v48 = vrot.slane %v634_v44, %v7781_v45  ;;  %v925_v63 = vrot.slane %v634_v44, %v7789_v56  ;;  %vm614_vm4 = vcmp.ge.s32.totalorder %v546_v57, 1  ;;  %v635_v0 = vpack.c.bf16 %v5857_v60, %v5856_v59 }
  0x1a   : > { %6729 = vmatprep.subr.bf16.mxu0 %v7241_v5  ;;  %vm615_vm5 = vcmp.ge.s32.totalorder %v553_v58, 1  ;;  %v5858_v2 = vsel %vm614_vm4, 1.0, %v9517_v39  ;;  %vm969_vm7 = vsmask.f32 7440  ;;  %vm7824_vm9 = vcmp.lt.s32.totalorder %v518_v34, 7 }
  0x1b   : > { %6752 = vmatpush3.bf16.msra.mxu1 %v7253_v16  ;;  %v972_v54 = vshll.u32 %v918_v48, 16  ;;  %v975_v55 = vshrl.u32 %v918_v48, 16  ;;  %v5859_v3 = vsel %vm615_vm5, 1.0, %v9517_v39  ;;  %v981_v4 = vshll.u32 %v925_v63, 16  ;;  %vm7812_vm8 = vmor %vm968_vm6, %vm969_vm7  ;;  %v7817_v16 = vld [vmem:[#allocation2 + $0x4] sm:$0xf] }
  0x1c   : > { %6753 = vmatprep.subr.bf16.mxu1 %v7255_v18  ;;  %v932_v7 = vrot.slane %v635_v0, %v7781_v45  ;;  %v636_v9 = vpack.c.bf16 %v5859_v3, %v5858_v2  ;;  %vm7828_vm10 = vcmp.lt.s32.totalorder %v525_v35, 7  ;;  %v985_v23 = vshrl.u32 %v925_v63, 16 }
  0x1d   : > { %6730 = vmatpush3.bf16.msra.mxu0 %v7241_v5  ;;  %v7795_v61 = vrot.slane %v972_v54, 5  ;;  %v977_v62 = vrot.slane %v975_v55, 4  ;;  %v7805_v5 = vadd.s32 48, %v506_v32  ;;  %vm7839_vm13 = vcmp.lt.s32.totalorder %v532_v49, 7 }
  0x1e   : > { %6731 = vmatprep.subr.bf16.mxu0 %v7242_v8  ;;  %v953_v37 = vrot.slane %v636_v9, %v7789_v56  ;;  %vm641_vm14 = vcmp.lt.s32.totalorder %v539_v50, 7  ;;  %v5862_v38 = vsel %vm7824_vm9, 1.0, %v9517_v39  ;;  %v5863_v40 = vsel %vm7828_vm10, 1.0, %v9517_v39 }
  0x1f   : > { %6754 = vmatpush3.bf16.msra.mxu1 %v7255_v18  ;;  %9565 = vst [vmem:[#allocation3_spill] sm:$0xff] %v7795_v61  ;;  %v978_v1 = vor.u32 %v977_v62, %v7795_v61  ;;  %v991_v18 = vshll.u32 %v932_v7, 16  ;;  %v987_v41 = vrot.slane %v985_v23, 4  ;;  %v5864_v50 = vsel %vm7839_vm13, 1.0, %v9517_v39 }
  0x20   : > { %6755 = vmatprep.subr.bf16.mxu1 %v7257_v20  ;;  %v1025_v46 = vshrl.u32 %v953_v37, 16  ;;  %v662_v51 = vpack.c.bf16 %v5863_v40, %v5862_v38  ;;  %v1021_v55 = vshll.u32 %v953_v37, 16  ;;  %v5865_v59 = vsel %vm641_vm14, 1.0, %v9517_v39 }
  0x21   : > { %6732 = vmatpush3.bf16.msra.mxu0 %v7242_v8  ;;  %v979_v8 = vrot.slane %v978_v1, 4  ;;  %v993_v31 = vrot.slane %v991_v18, 5  ;;  %vm642_vm15 = vcmp.lt.s32.totalorder %v546_v57, 7  ;;  %vm643_vm0 = vcmp.lt.s32.totalorder %v553_v58, 7 }
  0x22   : > { %6733 = vmatprep.subr.bf16.mxu0 %v7243_v10  ;;  %v1027_v1 = vrot.slane %v1025_v46, 4  ;;  %v5866_v52 = vsel %vm642_vm15, 1.0, %v9517_v39  ;;  %v5867_v53 = vsel %vm643_vm0, 1.0, %v9517_v39  ;;  %v663_v57 = vpack.c.bf16 %v5865_v59, %v5864_v50 }
  0x23   : > { %6756 = vmatpush3.bf16.msra.mxu1 %v7257_v20  ;;  %vm1492_vm1 = vsmask.f32 256  ;;  %vm1493_vm2 = vsmask.f32 4368  ;;  %vm1261_vm6 = vsmask.f32 4352 }
  0x24   : > { %6757 = vmatprep.subr.bf16.mxu1 %v7259_v22  ;;  %vm7962_vm5 = vmor %vm1492_vm1, %vm1493_vm2  ;;  %vm1624_vm7 = vsmask.f32 7424  ;;  %vm5287_vm9 = vcmask 261248   ;;  %vm5164_vm10 = vcmask 130048   ;;  %vm5589_vm13 = vcmask 385280  }
  0x25   : > { %6734 = vmatpush3.bf16.msra.mxu0 %v7243_v10  ;;  %v983_v10 = vrot.slane %v981_v4, 5  ;;  %vm5275_vm14 = vcmask 122880   ;;  %vm5430_vm15 = vcmask 254080   ;;  %vm5748_vm0 = vcmask 516480  }
  0x26   : > { %6735 = vmatprep.subr.bf16.mxu0 %v7244_v11  ;;  %vm5765_vm1 = vcmask 261120   ;;  %vm5767_vm2 = vcmask 392192  }
  0x27   : > { %6758 = vmatpush3.bf16.msra.mxu1 %v7259_v22  ;;  %v988_v60 = vor.u32 %v987_v41, %v983_v10  ;;  %v7872_v22 = vrot.slane %v662_v51, %v7789_v56 }
  0x28   : > { %6759 = vmatprep.subr.bf16.mxu1 %v7261_v25 }
  0x29   : > { %6736 = vmatpush3.bf16.msra.mxu0 %v7244_v11  ;;  %v560_v11 = vand.u32 7, %v7805_v5  ;;  %v1507_v5 = vshll.u32 %v7872_v22, 16 }
  0x2a   : > { %6769 = vmatprep.subr.bf16.mxu0 %v7252_v15 }
  0x2b   : > { %6760 = vmatpush3.bf16.msra.mxu1 %v7261_v25  ;;  %vm616_vm11 = vcmp.ge.s32.totalorder %v560_v11, 1  ;;  %vm644_vm3 = vcmp.lt.s32.totalorder %v560_v11, 7 }
  0x2c   : > { %6738 = vmatmul.mubr.bf16.vlgmr.msra.gmra.mxu0 %v7246_v12  ;;  %6793 = vmatprep.subr.bf16.mxu1 %v7762_v27  ;;  %v567_v12 = vand.u32 7, %v7807_v6  ;;  %v5860_v35 = vsel %vm616_vm11, 1.0, %v9517_v39  ;;  %v7923_v6 = vld [vmem:[%s9504_s3] ss:$0 sm:$0xff]  ;;  %vm5446_vm11 = vcmask 392448  }
  0x2d   : > { %6741 = vmatprep.mubr.bf16.mxu0 %v7247_v13  ;;  %6770 = vmatpush3.bf16.msra.mxu0 %v7252_v15  ;;  %v899_v15 = vld [vmem:[#allocation2] sm:$0x8] }
  0x2e   : > { %6771 = vmatprep.subr.bf16.mxu0 %v7254_v17  ;;  %vm617_vm12 = vcmp.ge.s32.totalorder %v567_v12, 1  ;;  %vm645_vm4 = vcmp.lt.s32.totalorder %v567_v12, 7 }
  0x2f   : > { %v5861_v36 = vsel %vm617_vm12, 1.0, %v9517_v39  ;;  %vm5605_vm12 = vcmask 523648  }
  0x30   : > { %v637_v48 = vpack.c.bf16 %v5861_v36, %v5860_v35 }
  0x31   : > { %6772 = vmatpush3.bf16.msra.mxu0 %v7254_v17  ;;  %v7821_v17 = vsel %vm7812_vm8, %v979_v8, %v983_v10  ;;  %v1023_v8 = vrot.slane %v1021_v55, 5  ;;  %v989_v10 = vrot.slane %v988_v60, 4  ;;  %v5868_v60 = vsel %vm644_vm3, 1.0, %v9517_v39 }
  0x32   : > { %6773 = vmatprep.subr.bf16.mxu0 %v7256_v19  ;;  %9568 = vst [vmem:[#allocation4_spill] sm:$0xff] %v7821_v17  ;;  %v1060_v25 = vmul.bf16 %v7821_v17, %v7817_v16  ;;  %v960_v2 = vrot.slane %v637_v48, %v7781_v45  ;;  %vm5769_vm3 = vcmask 516096  }
  0x33   : > { %v1028_v18 = vor.u32 %v1027_v1, %v1023_v8 }
  0x34   : > { %6742 = vmatmul.mubr.bf16.gmra.mxu0 %v7248_v14  ;;  %v939_v14 = vrot.slane %v635_v0, %v7789_v56  ;;  %v1031_v20 = vshll.u32 %v960_v2, 16 }
  0x35   : > { %6774 = vmatpush3.bf16.msra.mxu0 %v7256_v19  ;;  %v946_v19 = vrot.slane %v636_v9, %v7781_v45  ;;  %v967_v9 = vrot.slane %v637_v48, %v7789_v56 }
  0x36   : > { %6775 = vmatprep.subr.bf16.mxu0 %v7258_v21  ;;  %v1033_v40 = vrot.slane %v1031_v20, 5 }
  0x37   : > { %v1011_v32 = vshll.u32 %v946_v19, 16  ;;  %v1015_v33 = vshrl.u32 %v946_v19, 16 }
  0x39   : > { %6776 = vmatpush3.bf16.msra.mxu0 %v7258_v21  ;;  %v995_v21 = vshrl.u32 %v932_v7, 16  ;;  %v1013_v47 = vrot.slane %v1011_v32, 5  ;;  %v1017_v49 = vrot.slane %v1015_v33, 4  ;;  %v7862_v7 = vrot.slane %v662_v51, %v7781_v45 }
  0x3a   : > { %6777 = vmatprep.subr.bf16.mxu0 %v7260_v24  ;;  %v664_v32 = vpack.c.bf16 %v5867_v53, %v5866_v52 }
  0x3b   : > { %v997_v34 = vrot.slane %v995_v21, 4  ;;  %v1018_v3 = vor.u32 %v1017_v49, %v1013_v47  ;;  %v1035_v21 = vshrl.u32 %v960_v2, 16  ;;  %v1496_v36 = vshrl.u32 %v7862_v7, 16 }
  0x3c   : > { %v1470_v50 = vrot.slane %v664_v32, %v7781_v45  ;;  %v1477_v59 = vrot.slane %v664_v32, %v7789_v56 }
  0x3d   : > { %6778 = vmatpush3.bf16.msra.mxu0 %v7260_v24  ;;  %v1059_v24 = vmul.bf16 %v7795_v61, %v899_v15  ;;  %v998_v54 = vor.u32 %v997_v34, %v993_v31  ;;  %v1019_v19 = vrot.slane %v1018_v3, 4  ;;  %v1029_v34 = vrot.slane %v1028_v18, 4 }
  0x3e   : > { %6779 = vmatprep.subr.bf16.mxu0 %v7262_v26  ;;  %v1037_v41 = vrot.slane %v1035_v21, 4  ;;  %v7917_v55 = vrot.slane %v1496_v36, 7  ;;  %v1540_v21 = vshrl.u32 %v1477_v59, 16 }
  0x3f   : > { %v5920_v42 = vcombine.low %v1059_v24, %v1060_v25  ;;  %v999_v4 = vrot.slane %v998_v54, 4  ;;  %v1041_v24 = vshll.u32 %v967_v9, 16  ;;  %v1045_v25 = vshrl.u32 %v967_v9, 16 }
  0x40   : > { %v7900_v38 = vsel %vm7812_vm8, %v1019_v19, %v1023_v8  ;;  %v7915_v54 = vsel %vm7812_vm8, %v1029_v34, %v1033_v40  ;;  %v1038_v12 = vor.u32 %v1037_v41, %v1033_v40  ;;  %v1531_v9 = vshrl.u32 %v1470_v50, 16 }
  0x41   : > { %6780 = vmatpush3.bf16.msra.mxu0 %v7262_v26  ;;  %v1001_v26 = vshll.u32 %v939_v14, 16  ;;  %v1263_v62 = vshrl.u32 %v5920_v42, 16  ;;  %v1266_v63 = vshll.u32 %v5920_v42, 16  ;;  %9578 = vst [vmem:[#allocation8_spill] sm:$0xff] %v7900_v38  ;;  %v1504_v42 = vshrl.u32 %v7872_v22, 16  ;;  %9579 = vst [vmem:[#allocation9_spill] sm:$0xff] %v7915_v54 }
  0x42   : > { %6781 = vmatprep.subr.bf16.mxu0 %v7266_v28  ;;  %v1502_v19 = vrot.slane %v7917_v55, 4  ;;  %v1534_v40 = vshll.u32 %v1470_v50, 16  ;;  %v7971_v50 = vrot.slane %v1540_v21, 7 }
  0x43   : > { %v1003_v43 = vrot.slane %v1001_v26, 5  ;;  %v7867_v58 = vrot.slane %v1263_v62, 3  ;;  %v7880_v26 = vsel %vm7812_vm8, %v989_v10, %v993_v31  ;;  %v7896_v31 = vld [vmem:[%s9503_s2] ss:$0 sm:$0xff]  ;;  %v5869_v62 = vsel %vm645_vm4, 1.0, %v9517_v39 }
  0x44   : > { %9576 = vst [vmem:[#allocation6_spill] sm:$0xff] %v7880_v26  ;;  %v7931_v2 = vrot.slane %v1504_v42, 7  ;;  %v1039_v42 = vrot.slane %v1038_v12, 4 }
  0x45   : > { %6782 = vmatpush3.bf16.msra.mxu0 %v7266_v28  ;;  %v1005_v28 = vshrl.u32 %v939_v14, 16  ;;  %v7869_v14 = vrot.slane %v1266_v63, 4  ;;  %v7876_v23 = vsel %vm7812_vm8, %v999_v4, %v1003_v43 }
  0x46   : > { %6783 = vmatprep.subr.bf16.mxu0 %v7268_v29  ;;  %9575 = vst [vmem:[#allocation5_spill] sm:$0xff] %v7876_v23 }
  0x47   : > { %v1007_v44 = vrot.slane %v1005_v28, 4  ;;  %v7883_v28 = vrot.slane %v663_v57, %v7781_v45 }
  0x49   : > { %6784 = vmatpush3.bf16.msra.mxu0 %v7268_v29  ;;  %v1008_v0 = vor.u32 %v1007_v44, %v1003_v43  ;;  %v1463_v29 = vrot.slane %v663_v57, %v7789_v56  ;;  %v7903_v43 = vrot.slane %v1041_v24, 5  ;;  %v1047_v44 = vrot.slane %v1045_v25, 4 }
  0x4a   : > { %6817 = vmatprep.subr.bf16.mxu0 %v7774_v30  ;;  %v1513_v48 = vshrl.u32 %v7883_v28, 16  ;;  %v665_v57 = vpack.c.bf16 %v5869_v62, %v5868_v60  ;;  %v1516_v20 = vshll.u32 %v7883_v28, 16 }
  0x4b   : > { %v1009_v15 = vrot.slane %v1008_v0, 4  ;;  %v1522_v49 = vshrl.u32 %v1463_v29, 16  ;;  %v1048_v1 = vor.u32 %v1047_v44, %v7903_v43  ;;  %v1525_v8 = vshll.u32 %v1463_v29, 16 }
  0x4c   : > { %v1515_v4 = vrot.slane %v1513_v48, 7  ;;  %v1509_v48 = vor.u32 %v1507_v5, %v7931_v2  ;;  %v7980_v60 = vrot.slane %v665_v57, %v7789_v56  ;;  %v1786_v56 = vld [vmem:[#allocation2 + $0x4] sm:$0x8] }
  0x4d   : > { %v7888_v33 = vsel %vm7812_vm8, %v1009_v15, %v1013_v47  ;;  %v1499_v47 = vshll.u32 %v7862_v7, 16  ;;  %v7933_v7 = vrot.slane %v1522_v49, 7  ;;  %v1511_v49 = vrot.slane %v7931_v2, 4 }
  0x4e   : > { %9577 = vst [vmem:[#allocation7_spill] sm:$0xff] %v7888_v33  ;;  %v1520_v34 = vrot.slane %v1515_v4, 4  ;;  %v7977_v12 = vrot.slane %v1048_v1, 4  ;;  %v1518_v62 = vor.u32 %v1516_v20, %v1515_v4  ;;  %v1558_v20 = vshrl.u32 %v7980_v60, 16 }
  0x4f   : > { %v7943_v18 = vor.u32 %v1499_v47, %v7917_v55  ;;  %v1527_v36 = vor.u32 %v1525_v8, %v7933_v7 }
  0x50   : > { %9588 = vst [vmem:[#allocation16_spill] sm:$0xff] %v7977_v12 }
  0x51   : > { %9582 = vst [vmem:[#allocation12_spill] sm:$0xff] %v7943_v18  ;;  %v7984_v5 = vsel %vm7962_vm5, %v1520_v34, %v1527_v36  ;;  %v8016_v34 = vsel %vm7962_vm5, %v1502_v19, %v1509_v48  ;;  %v1788_v36 = vmul.bf16 %v1786_v56, %v7795_v61  ;;  %v8031_v19 = vsel %vm7962_vm5, %v1511_v49, %v1518_v62 }
  0x52   : > { %9589 = vst [vmem:[#allocation17_spill] sm:$0xff] %v7984_v5  ;;  %9594 = vst [vmem:[#allocation22_spill] sm:$0xff] %v8016_v34 }
  0x53   : > { %9595 = vst [vmem:[#allocation23_spill] sm:$0xff] %v8031_v19 }
  0xec   : > { %v6739_v37 = vpop.f32.mrf.mxu0 }
  0xed   : > { %v836_v51 = vmul.f32 %v6739_v37, %v7896_v31  ;;  %v1533_v37 = vrot.slane %v1531_v9, 7 }
  0xee   : > { %v796_v46 = vpop.f32.mrf.mxu0 }
  0xef   : > { %v834_v63 = vmul.f32 %v7896_v31, %v796_v46  ;;  %v7936_v10 = vadd.f32 %v7923_v6, %v836_v51  ;;  %v7967_v46 = vrot.slane %v665_v57, %v7781_v45  ;;  %v1543_v51 = vshll.u32 %v1477_v59, 16 }
  0xf0   : > { %v6740_v11 = vpop.f32.mrf.mxu0  ;;  %v1536_v59 = vor.u32 %v1534_v40, %v1533_v37  ;;  %v1538_v4 = vrot.slane %v1533_v37, 4 }
  0xf1   : > { %v837_v0 = vmul.f32 %v6740_v11, %v7896_v31  ;;  %9580 = vst [vmem:[#allocation10_spill] sm:$0xff] %v7936_v10  ;;  %v7948_v22 = vadd.f32 %v7923_v6, %v834_v63  ;;  %v1529_v63 = vrot.slane %v7933_v7, 4  ;;  %v1549_v8 = vshrl.u32 %v7967_v46, 16 }
  0xf2   : > { %v799_v3 = vpop.f32.mrf.mxu0  ;;  %v1545_v9 = vor.u32 %v1543_v51, %v7971_v50  ;;  %v1552_v7 = vshll.u32 %v7967_v46, 16  ;;  %v7273_v46 = vld [vmem:[%s9505_s4 + $0xa0] sm:$0xff]  }
  0xf3   : > { %v7939_v52 = vadd.f32 %v7923_v6, %v837_v0  ;;  %v835_v53 = vmul.f32 %v7896_v31, %v799_v3  ;;  %9583 = vst [vmem:[#allocation13_spill] sm:$0xff] %v7948_v22  ;;  %v1423_v3 = vld [vmem:[#allocation2 + $0x4] sm:$0xf]  ;;  %v8037_v48 = vsel %vm7962_vm5, %v1529_v63, %v1536_v59  ;;  %v7267_v63 = vld [vmem:[%s9505_s4 + $0xb0] sm:$0xff]  }
  0xf4   : > { %v6743_v15 = vpop.f32.mrf.mxu0  ;;  %9596 = vst [vmem:[#allocation24_spill] sm:$0xff] %v8037_v48  ;;  %v8041_v51 = vsel %vm7962_vm5, %v1538_v4, %v1545_v9 }
  0xf5   : > { %9581 = vst [vmem:[#allocation11_spill] sm:$0xff] %v7939_v52  ;;  %v6432_v24 = vpack.c.bf16 %v7939_v52, %v7936_v10  ;;  %v7953_v25 = vadd.f32 %v7923_v6, %v835_v53  ;;  %v840_v29 = vmul.f32 %v6743_v15, %v7896_v31  ;;  %9597 = vst [vmem:[#allocation25_spill] sm:$0xff] %v8041_v51 }
  0xf6   : > { %v812_v32 = vpop.f32.mrf.mxu0 }
  0xf7   : > { %9584 = vst [vmem:[#allocation14_spill] sm:$0xff] %v7953_v25  ;;  %6465 = vst [vmem:[#allocation2 + $0x10] sm:$0xff] %v6432_v24   ;;  %v6427_v28 = vpack.c.bf16 %v7953_v25, %v7948_v22  ;;  %v838_v41 = vmul.f32 %v7896_v31, %v812_v32  ;;  %v7974_v55 = vadd.f32 %v7923_v6, %v840_v29 }
  0xf8   : > { %v6744_v47 = vpop.f32.mrf.mxu0  ;;  %v8010_v29 = vsel %vm7812_vm8, %v1039_v42, %v7903_v43  ;;  %v8025_v43 = vrot.slane %v1549_v8, 7  ;;  %vm7589_vm8 = vmmov 0  }
  0xf9   : > { %6464 = vst [vmem:[#allocation2 + $0x8] sm:$0xff] %v6427_v28   ;;  %9587 = vst [vmem:[#allocation15_spill] sm:$0xff] %v7974_v55  ;;  %v841_v11 = vmul.f32 %v6744_v47, %v7896_v31  ;;  %v7988_v0 = vadd.f32 %v7923_v6, %v838_v41 }
  0xfa   : > { %v815_v45 = vpop.f32.mrf.mxu0  ;;  %9593 = vst [vmem:[#allocation21_spill] sm:$0xff] %v8010_v29 }
  0xfb   : > { %9590 = vst [vmem:[#allocation18_spill] sm:$0xff] %v7988_v0  ;;  %v7991_v2 = vadd.f32 %v7923_v6, %v841_v11  ;;  %v839_v1 = vmul.f32 %v7896_v31, %v815_v45  ;;  %v1554_v31 = vor.u32 %v1552_v7, %v8025_v43 }
  0xfd   : > { %9591 = vst [vmem:[#allocation19_spill] sm:$0xff] %v7991_v2  ;;  %v6442_v57 = vpack.c.bf16 %v7991_v2, %v7974_v55  ;;  %v8001_v15 = vadd.f32 %v7923_v6, %v839_v1  ;;  %v1575_v6 = vmul.bf16 %v7943_v18, %v1423_v3 }
  0xfe   : > { %v903_v21 = vld [vmem:[#allocation2 + $0x10] sm:$0xf]  ;;  %v8005_v24 = vld [vmem:[#allocation2 + $0x14] sm:$0xf] }
  0xff   : > { %9592 = vst [vmem:[#allocation20_spill] sm:$0xff] %v8001_v15  ;;  %v8012_v32 = vld [vmem:[#allocation2 + $0x10] sm:$0xf]  ;;  %6467 = vst [vmem:[#allocation2 + $0x20] sm:$0xff] %v6442_v57   ;;  %v6437_v37 = vpack.c.bf16 %v8001_v15, %v7988_v0  ;;  %v1063_v40 = vmul.bf16 %v7888_v33, %v903_v21  ;;  %v1064_v13 = vmul.bf16 %v7900_v38, %v8005_v24  ;;  %v8061_v57 = vrot.slane %v1558_v20, 7 }
 0x100   : > { %v901_v28 = vld [vmem:[#allocation2 + $0x8] sm:$0xf]  ;;  %v902_v41 = vld [vmem:[#allocation2 + $0xc] sm:$0xf]  ;;  %v1578_v47 = vmul.bf16 %v7984_v5, %v8012_v32  ;;  %v1791_v9 = vmul.bf16 %v8012_v32, %v7876_v23 }
 0x101   : > { %v8027_v42 = vld [vmem:[#allocation2 + $0x8] sm:$0xf]  ;;  %6466 = vst [vmem:[#allocation2 + $0x18] sm:$0xff] %v6437_v37   ;;  %v1061_v11 = vmul.bf16 %v7880_v26, %v901_v28  ;;  %v5908_v45 = vcombine.low %v7817_v16, %v901_v28  ;;  %v1062_v1 = vmul.bf16 %v7876_v23, %v902_v41  ;;  %v5909_v49 = vcombine.low %v902_v41, %v903_v21  ;;  %v8046_v62 = vld [vmem:[#allocation2 + $0xc] sm:$0xf] }
 0x102   : > { %v5922_v59 = vcombine.low %v1063_v40, %v1064_v13  ;;  %v1576_v3 = vmul.bf16 %v8016_v34, %v8027_v42  ;;  %v1577_v56 = vmul.bf16 %v8031_v19, %v8046_v62  ;;  %v1789_v16 = vmul.bf16 %v8027_v42, %v7821_v17 }
 0x103   : > { %6761 = vmatprep.mubr.bf16.mxu1 %v5908_v45  ;;  %v5921_v8 = vcombine.low %v1061_v11, %v1062_v1  ;;  %v1790_v4 = vmul.bf16 %v8046_v62, %v7880_v26  ;;  %v7270_v1 = vld [vmem:[%s9505_s4 + $0xa8] sm:$0xff]  }
 0x104   : > { %6762 = vmatmul.mubr.bf16.vlgmr.msra.gmra.mxu1 %v5909_v49  ;;  %v1280_v21 = vshrl.u32 %v5922_v59, 16  ;;  %v1283_v37 = vshll.u32 %v5922_v59, 16  ;;  %v5949_v40 = vcombine.low %v1575_v6, %v1576_v3  ;;  %v8063_v13 = vcombine.low %v1577_v56, %v1578_v47 }
 0x105   : > { %6794 = vmatpush3.bf16.msra.mxu1 %v7762_v27  ;;  %v1271_v28 = vshrl.u32 %v5921_v8, 16  ;;  %v1274_v41 = vshll.u32 %v5921_v8, 16  ;;  %v5978_v45 = vcombine.low %v1788_v36, %v1789_v16  ;;  %v5979_v59 = vcombine.low %v1790_v4, %v1791_v9 }
 0x106   : > { %6795 = vmatprep.subr.bf16.mxu1 %v7267_v63  ;;  %v907_v20 = vld [vmem:[#allocation2 + $0x20] sm:$0xf]  ;;  %v1282_v39 = vrot.slane %v1280_v21, 3  ;;  %v1285_v49 = vrot.slane %v1283_v37, 4  ;;  %v1628_v53 = vshll.u32 %v5949_v40, 16  ;;  %v1633_v27 = vshll.u32 %v8063_v13, 16 }
 0x107   : > { %v1067_v6 = vmul.bf16 %v7977_v12, %v907_v20  ;;  %v1273_v47 = vrot.slane %v1271_v28, 3  ;;  %v1276_v3 = vrot.slane %v1274_v41, 4  ;;  %v1626_v8 = vshrl.u32 %v5949_v40, 16 }
 0x108   : > { %v905_v56 = vld [vmem:[#allocation2 + $0x18] sm:$0xf]  ;;  %v906_v36 = vld [vmem:[#allocation2 + $0x1c] sm:$0xf]  ;;  %v8072_v16 = vor.u32 %v1285_v49, %v1282_v39  ;;  %v1630_v11 = vrot.slane %v1628_v53, 1  ;;  %v8080_v39 = vrot.slane %v1633_v27, 1 }
 0x109   : > { %6796 = vmatpush3.bf16.msra.mxu1 %v7267_v63  ;;  %v1065_v21 = vmul.bf16 %v7915_v54, %v905_v56  ;;  %v5910_v4 = vcombine.low %v8005_v24, %v905_v56  ;;  %v1066_v9 = vmul.bf16 %v8010_v29, %v906_v36  ;;  %v5911_v37 = vcombine.low %v906_v36, %v907_v20  ;;  %v8099_v56 = vld [vmem:[#allocation2 + $0x18] sm:$0xf]  ;;  %v8134_v44 = vld [vmem:[#allocation2 + $0x1c] sm:$0xf] }
 0x10a   : > { %6797 = vmatprep.subr.bf16.mxu1 %v7270_v1  ;;  %v5924_v28 = vcombine.low %v1067_v6, %v1067_v6  ;;  %v1277_v41 = vor.u32 %v1276_v3, %v1273_v47  ;;  %v1631_v35 = vor.u32 %v1630_v11, %v1626_v8  ;;  %v1838_v7 = vshrl.u32 %v5978_v45, 16  ;;  %v7274_v6 = vld [vmem:[%s9505_s4 + $0xf0] sm:$0xff]  }
 0x10b   : > { %6765 = vmatprep.mubr.bf16.mxu1 %v5910_v4  ;;  %v5923_v53 = vcombine.low %v1065_v21, %v1066_v9  ;;  %v1841_v63 = vshll.u32 %v5978_v45, 16  ;;  %v1846_v40 = vshrl.u32 %v5979_v59, 16  ;;  %v9598_v24 = vor.u32 %v7869_v14, %v7867_v58 }
 0x10c   : > { %6766 = vmatmul.mubr.bf16.gmra.mxu1 %v5911_v37  ;;  %v1287_v11 = vsel %vm1261_vm6, %v1277_v41, %v8072_v16  ;;  %v1636_v49 = vsel %vm1624_vm7, %v1631_v35, %v8080_v39  ;;  %v9599_v45 = vshll.u32 %v7980_v60, 16  ;;  %v1298_v14 = vshrl.u32 %v5924_v28, 16  ;;  %v7275_v35 = vld [vmem:[%s9505_s4 + $0x98] sm:$0xff]  }
 0x10d   : > { %v1278_v20 = vsel %vm1261_vm6, %v9598_v24, %v1277_v41  ;;  %6798 = vmatpush3.bf16.msra.mxu1 %v7270_v1  ;;  %v1289_v3 = vshrl.u32 %v5923_v53, 16  ;;  %v1292_v58 = vshll.u32 %v5923_v53, 16  ;;  %v1301_v27 = vshll.u32 %v5924_v28, 16  ;;  %6809 = vmatprep.mubr.bf16.mxu1 %v1636_v49  ;;  %v8105_v28 = vld [vmem:[#allocation2 + $0x14] sm:$0xf]  ;;  %v7276_v41 = vld [vmem:[%s9505_s4 + $0xe8] sm:$0xff]  }
 0x10e   : > { %v1563_v47 = vor.u32 %v9599_v45, %v8061_v57  ;;  %6785 = vmatprep.mubr.bf16.mxu0 %v1278_v20  ;;  %v1840_v36 = vrot.slane %v1838_v7, 3  ;;  %v1843_v8 = vrot.slane %v1841_v63, 4  ;;  %v1848_v21 = vrot.slane %v1846_v40, 3  ;;  %6799 = vmatprep.subr.bf16.mxu1 %v7273_v46  ;;  %v8136_v45 = vld [vmem:[#allocation2 + $0x20] sm:$0xf] }
 0x10f   : > { %6786 = vmatmul.mubr.bf16.vlgmr.msra.gmra.mxu0 %v1287_v11  ;;  %v1849_v4 = vshll.u32 %v5979_v59, 16  ;;  %v1291_v60 = vrot.slane %v1289_v3, 3  ;;  %v1294_v1 = vrot.slane %v1292_v58, 4  ;;  %v1300_v9 = vrot.slane %v1298_v14, 3  ;;  %v7279_v14 = vld [vmem:[%s9505_s4 + $0x88] sm:$0xff]  }
 0x110   : > { %6818 = vmatpush3.bf16.msra.mxu0 %v7774_v30  ;;  %v1303_v37 = vrot.slane %v1301_v27, 4  ;;  %v1580_v7 = vmul.bf16 %v8041_v51, %v8099_v56  ;;  %v9600_v30 = vrot.slane %v7971_v50, 4  ;;  %v9602_v24 = vrot.slane %v8025_v43, 4 }
 0x111   : > { %6819 = vmatprep.subr.bf16.mxu0 %v7274_v6  ;;  %v1851_v53 = vrot.slane %v1849_v4, 4  ;;  %6800 = vmatpush3.bf16.msra.mxu1 %v7273_v46  ;;  %v1295_v59 = vor.u32 %v1294_v1, %v1291_v60  ;;  %v1844_v11 = vor.u32 %v1843_v8, %v1840_v36  ;;  %v7277_v46 = vld [vmem:[%s9505_s4 + $0x90] sm:$0xff]   ;;  %v1579_v50 = vmul.bf16 %v8037_v48, %v8105_v28  ;;  %v7280_v36 = vld [vmem:[%s9505_s4 + $0xd8] sm:$0xff]   ;;  %v7281_v60 = vld [vmem:[%s9505_s4 + $0x80] sm:$0xff]  }
 0x112   : > { %v1304_v63 = vor.u32 %v1303_v37, %v1300_v9  ;;  %v8116_v40 = vsel %vm7962_vm5, %v9600_v30, %v1554_v31  ;;  %v8122_v20 = vsel %vm7962_vm5, %v9602_v24, %v1563_v47  ;;  %6801 = vmatprep.subr.bf16.mxu1 %v7275_v35  ;;  %v7278_v47 = vld [vmem:[%s9505_s4 + $0xe0] sm:$0xff]   ;;  %v8151_v27 = vrot.slane %v8061_v57, 4 }
 0x113   : > { %9601 = vst [vmem:[#allocation26_spill] sm:$0xff] %v8116_v40  ;;  %9603 = vst [vmem:[#allocation27_spill] sm:$0xff] %v8122_v20  ;;  %v8124_v49 = vor.u32 %v1851_v53, %v1848_v21  ;;  %v1296_v31 = vsel %vm1261_vm6, %v8072_v16, %v1295_v59  ;;  %v5951_v3 = vcombine.low %v1579_v50, %v1580_v7  ;;  %v1431_v21 = vld [vmem:[#allocation2 + $0x24] sm:$0x1] }
 0x114   : > { %6820 = vmatpush3.bf16.msra.mxu0 %v7274_v6  ;;  %v1305_v43 = vsel %vm1261_vm6, %v1295_v59, %v1304_v63  ;;  %6789 = vmatprep.mubr.bf16.mxu0 %v1296_v31  ;;  %v1581_v58 = vmul.bf16 %v8116_v40, %v8134_v44  ;;  %v1582_v6 = vmul.bf16 %v8122_v20, %v8136_v45  ;;  %v7283_v63 = vld [vmem:[%s9505_s4 + $0x138] sm:$0xff]   ;;  %v2168_v31 = vld [vmem:[#allocation2 + $0x8] sm:$0xf] }
 0x115   : > { %6821 = vmatprep.subr.bf16.mxu0 %v7276_v41  ;;  %6802 = vmatpush3.bf16.msra.mxu1 %v7275_v35  ;;  %v1853_v16 = vsel %vm1261_vm6, %v1844_v11, %v8124_v49  ;;  %9604 = vst [vmem:[#allocation28_spill] sm:$0xff] %v8151_v27  ;;  %v1641_v35 = vshll.u32 %v5951_v3, 16  ;;  %v1793_v4 = vmul.bf16 %v8099_v56, %v7900_v38  ;;  %v1645_v30 = vshrl.u32 %v5951_v3, 16  ;;  %v8177_v11 = vld [vmem:[#allocation2 + $0x24] sm:$0xf] }
 0x116   : > { %6803 = vmatprep.subr.bf16.mxu1 %v7277_v46  ;;  %v8156_v8 = vcombine.low %v1581_v58, %v1582_v6  ;;  %v1794_v57 = vmul.bf16 %v8134_v44, %v7915_v54  ;;  %v1795_v1 = vmul.bf16 %v8136_v45, %v8010_v29  ;;  %v1583_v9 = vmul.bf16 %v8151_v27, %v1431_v21  ;;  %v7284_v6 = vld [vmem:[%s9505_s4 + $0xc8] sm:$0xff]  }
 0x117   : > { %6790 = vmatmul.mubr.bf16.gmra.mxu0 %v1305_v43  ;;  %v1792_v37 = vmul.bf16 %v8105_v28, %v7888_v33  ;;  %v1643_v53 = vrot.slane %v1641_v35, 1  ;;  %v8180_v43 = vld [vmem:[#allocation2 + $0xc] sm:$0xf] }
 0x118   : > { %6822 = vmatpush3.bf16.msra.mxu0 %v7276_v41  ;;  %6833 = vmatprep.mubr.bf16.mxu0 %v1853_v16  ;;  %v7282_v41 = vld [vmem:[%s9505_s4 + $0xd0] sm:$0xff]   ;;  %v1649_v7 = vshll.u32 %v8156_v8, 16  ;;  %v5981_v24 = vcombine.low %v1794_v57, %v1795_v1  ;;  %v5953_v50 = vcombine.low %v1583_v9, %v1583_v9  ;;  %v2178_v57 = vmul.bf16 %v8180_v43, %v8016_v34 }
 0x119   : > { %6823 = vmatprep.subr.bf16.mxu0 %v7278_v47  ;;  %6804 = vmatpush3.bf16.msra.mxu1 %v7277_v46  ;;  %v5980_v59 = vcombine.low %v1792_v37, %v1793_v4  ;;  %v1637_v46 = vshrl.u32 %v8063_v13, 16  ;;  %v1796_v13 = vmul.bf16 %v8177_v11, %v7977_v12  ;;  %v2177_v4 = vmul.bf16 %v2168_v31, %v7943_v18  ;;  %v7286_v37 = vld [vmem:[%s9505_s4 + $0xc0] sm:$0xff]  }
 0x11a   : > { %6805 = vmatprep.subr.bf16.mxu1 %v7279_v14  ;;  %v1651_v58 = vrot.slane %v1649_v7, 1  ;;  %v1864_v35 = vshrl.u32 %v5981_v24, 16  ;;  %v1867_v21 = vshll.u32 %v5981_v24, 16  ;;  %v1657_v1 = vshll.u32 %v5953_v50, 16  ;;  %v8200_v24 = vld [vmem:[#allocation2 + $0x10] sm:$0xf] }
 0x11b   : > { %v1639_v16 = vor.u32 %v1637_v46, %v8080_v39  ;;  %v1855_v3 = vshrl.u32 %v5980_v59, 16  ;;  %v6035_v50 = vcombine.low %v2177_v4, %v2178_v57  ;;  %v6007_v57 = vcombine.low %v8027_v42, %v8046_v62  ;;  %v7292_v42 = vld [vmem:[%s9505_s4 + $0x118] sm:$0xff]  }
 0x11c   : > { %6824 = vmatpush3.bf16.msra.mxu0 %v7278_v47  ;;  %v1647_v47 = vor.u32 %v1645_v30, %v1643_v53  ;;  %v5982_v30 = vcombine.low %v1796_v13, %v1796_v13  ;;  %v1869_v46 = vrot.slane %v1867_v21, 4 }
 0x11d   : > { %6825 = vmatprep.subr.bf16.mxu0 %v7280_v36  ;;  %6806 = vmatpush3.bf16.msra.mxu1 %v7279_v14  ;;  %v1858_v14 = vshll.u32 %v5980_v59, 16  ;;  %v1644_v39 = vsel %vm1624_vm7, %v1639_v16, %v1643_v53  ;;  %v1857_v7 = vrot.slane %v1855_v3, 3  ;;  %v1866_v53 = vrot.slane %v1864_v35, 3 }
 0x11e   : > { %6807 = vmatprep.subr.bf16.mxu1 %v7281_v60  ;;  %v1652_v9 = vsel %vm1624_vm7, %v1647_v47, %v1651_v58  ;;  %v1659_v47 = vrot.slane %v1657_v1, 1  ;;  %v2179_v16 = vmul.bf16 %v8200_v24, %v8031_v19  ;;  %v1873_v13 = vshrl.u32 %v5982_v30, 16 }
 0x11f   : > { %v1860_v59 = vrot.slane %v1858_v14, 4  ;;  %v1876_v35 = vshll.u32 %v5982_v30, 16  ;;  %v1870_v21 = vor.u32 %v1869_v46, %v1866_v53  ;;  %v7294_v53 = vld [vmem:[%s9505_s4 + $0x110] sm:$0xff]  }
 0x120   : > { %6826 = vmatpush3.bf16.msra.mxu0 %v7280_v36  ;;  %v7285_v36 = vld [vmem:[%s9505_s4 + $0x130] sm:$0xff]   ;;  %v1875_v1 = vrot.slane %v1873_v13, 3  ;;  %v8254_v13 = vld [vmem:[#allocation2 + $0x1c] sm:$0xf] }
 0x121   : > { %6827 = vmatprep.subr.bf16.mxu0 %v7282_v41  ;;  %6808 = vmatpush3.bf16.msra.mxu1 %v7281_v60  ;;  %v1653_v60 = vshrl.u32 %v8156_v8, 16  ;;  %v7287_v8 = vld [vmem:[%s9505_s4 + $0x128] sm:$0xff]   ;;  %v1861_v14 = vor.u32 %v1860_v59, %v1857_v7  ;;  %v2227_v7 = vshrl.u32 %v6035_v50, 16 }
 0x122   : > { %6841 = vmatprep.subr.bf16.mxu1 %v7283_v63 }
 0x123   : > { %v1655_v31 = vor.u32 %v1653_v60, %v1651_v58  ;;  %v7290_v58 = vld [vmem:[%s9505_s4 + $0x120] sm:$0xff]   ;;  %v1862_v60 = vsel %vm1261_vm6, %v8124_v49, %v1861_v14  ;;  %v7293_v49 = vld [vmem:[%s9505_s4 + $0x168] sm:$0xff]  }
 0x124   : > { %6828 = vmatpush3.bf16.msra.mxu0 %v7282_v41  ;;  %6810 = vmatmul.mubr.bf16.vlgmr.msra.gmra.mxu1 %v1644_v39  ;;  %v8202_v41 = vld [vmem:[#allocation2 + $0x14] sm:$0xf] }
 0x125   : > { %6829 = vmatprep.subr.bf16.mxu0 %v7284_v6  ;;  %6813 = vmatprep.mubr.bf16.mxu1 %v1652_v9  ;;  %v2180_v3 = vmul.bf16 %v8202_v41, %v7984_v5  ;;  %v1660_v4 = vsel %vm1624_vm7, %v1655_v31, %v1659_v47  ;;  %v1878_v9 = vrot.slane %v1876_v35, 4  ;;  %v7295_v31 = vld [vmem:[%s9505_s4 + $0x160] sm:$0xff]   ;;  %v2387_v47 = vld [vmem:[#allocation2 + $0x8] sm:$0x8] }
 0x126   : > { %6842 = vmatpush3.bf16.msra.mxu1 %v7283_v63  ;;  %v7289_v63 = vld [vmem:[%s9505_s4 + $0x178] sm:$0xff]   ;;  %v2389_v35 = vmul.bf16 %v2387_v47, %v7795_v61 }
 0x127   : > { %6843 = vmatprep.subr.bf16.mxu1 %v7285_v36  ;;  %v8223_v39 = vcombine.low %v2179_v16, %v2180_v3  ;;  %v1879_v30 = vor.u32 %v1878_v9, %v1875_v1  ;;  %v7296_v16 = vld [vmem:[%s9505_s4 + $0x108] sm:$0xff]   ;;  %v7297_v3 = vld [vmem:[%s9505_s4 + $0x158] sm:$0xff]   ;;  %v8273_v9 = vld [vmem:[#allocation2 + $0x20] sm:$0xf] }
 0x128   : > { %6830 = vmatpush3.bf16.msra.mxu0 %v7284_v6  ;;  %v2229_v6 = vshll.u32 %v6035_v50, 16 }
 0x129   : > { %6831 = vmatprep.subr.bf16.mxu0 %v7286_v37  ;;  %v2234_v59 = vshll.u32 %v8223_v39, 16  ;;  %v1880_v50 = vsel %vm1261_vm6, %v1870_v21, %v1879_v30 }
 0x12a   : > { %6844 = vmatpush3.bf16.msra.mxu1 %v7285_v36  ;;  %v7291_v36 = vld [vmem:[%s9505_s4 + $0x170] sm:$0xff]   ;;  %v2231_v62 = vrot.slane %v2229_v6, 1  ;;  %v2391_v6 = vmul.bf16 %v8200_v24, %v7880_v26 }
 0x12b   : > { %6845 = vmatprep.subr.bf16.mxu1 %v7287_v8  ;;  %v8238_v46 = vrot.slane %v2234_v59, 1 }
 0x12c   : > { %6832 = vmatpush3.bf16.msra.mxu0 %v7286_v37  ;;  %6814 = vmatmul.mubr.bf16.gmra.mxu1 %v1660_v4  ;;  %v1871_v37 = vsel %vm1261_vm6, %v1861_v14, %v1870_v21  ;;  %v8252_v14 = vld [vmem:[#allocation2 + $0x18] sm:$0xf]  ;;  %v2390_v21 = vmul.bf16 %v8180_v43, %v7821_v17  ;;  %v2392_v4 = vmul.bf16 %v8202_v41, %v7876_v23 }
 0x12d   : > { %6865 = vmatprep.subr.bf16.mxu0 %v7289_v63  ;;  %6857 = vmatprep.mubr.bf16.mxu1 %v6007_v57  ;;  %v2181_v57 = vmul.bf16 %v8252_v14, %v8037_v48 }
 0x12e   : > { %6846 = vmatpush3.bf16.msra.mxu1 %v7287_v8  ;;  %v2232_v8 = vor.u32 %v2231_v62, %v2227_v7  ;;  %v6064_v1 = vcombine.low %v2389_v35, %v2390_v21  ;;  %v6065_v62 = vcombine.low %v2391_v6, %v2392_v4  ;;  %v7303_v7 = vld [vmem:[%s9505_s4 + $0x148] sm:$0xff]   ;;  %v7305_v35 = vld [vmem:[%s9505_s4 + $0x140] sm:$0xff]  }
 0x12f   : > { %6834 = vmatmul.mubr.bf16.vlgmr.msra.gmra.mxu0 %v1862_v60  ;;  %6847 = vmatprep.subr.bf16.mxu1 %v7290_v58  ;;  %v7299_v60 = vld [vmem:[%s9505_s4 + $0x150] sm:$0xff]   ;;  %v7307_v4 = vld [vmem:[%s9505_s4 + $0x1a8] sm:$0xff]  }
 0x130   : > { %6837 = vmatprep.mubr.bf16.mxu0 %v1871_v37  ;;  %6866 = vmatpush3.bf16.msra.mxu0 %v7289_v63  ;;  %v2237_v63 = vsel %vm1624_vm7, %v2232_v8, %v8238_v46  ;;  %v8275_v37 = vld [vmem:[#allocation2 + $0x24] sm:$0xf]  ;;  %v2439_v59 = vshrl.u32 %v6064_v1, 16  ;;  %v2442_v30 = vshll.u32 %v6064_v1, 16  ;;  %v2183_v8 = vmul.bf16 %v8273_v9, %v8116_v40  ;;  %v7308_v1 = vld [vmem:[%s9505_s4 + $0x1f8] sm:$0xff]  }
 0x131   : > { %6867 = vmatprep.subr.bf16.mxu0 %v7291_v36  ;;  %v2447_v47 = vshrl.u32 %v6065_v62, 16 }
 0x132   : > { %6848 = vmatpush3.bf16.msra.mxu1 %v7290_v58  ;;  %v7298_v58 = vld [vmem:[%s9505_s4 + $0x100] sm:$0xff]  }
 0x133   : > { %6849 = vmatprep.subr.bf16.mxu1 %v7292_v42 }
 0x134   : > { %6868 = vmatpush3.bf16.msra.mxu0 %v7291_v36  ;;  %v2182_v36 = vmul.bf16 %v8254_v13, %v8041_v51 }
 0x135   : > { %6869 = vmatprep.subr.bf16.mxu0 %v7293_v49 }
 0x136   : > { %6850 = vmatpush3.bf16.msra.mxu1 %v7292_v42  ;;  %v7301_v42 = vld [vmem:[%s9505_s4 + $0x1b8] sm:$0xff]  }
 0x137   : > { %6838 = vmatmul.mubr.bf16.gmra.mxu0 %v1880_v50  ;;  %6851 = vmatprep.subr.bf16.mxu1 %v7294_v53  ;;  %v7304_v50 = vld [vmem:[%s9505_s4 + $0x1b0] sm:$0xff]  }
 0x138   : > { %6870 = vmatpush3.bf16.msra.mxu0 %v7293_v49  ;;  %6881 = vmatprep.mubr.bf16.mxu0 %v2237_v63  ;;  %v6037_v49 = vcombine.low %v2181_v57, %v2182_v36  ;;  %v2450_v63 = vshll.u32 %v6065_v62, 16 }
 0x139   : > { %6871 = vmatprep.subr.bf16.mxu0 %v7295_v31 }
 0x13a   : > { %6852 = vmatpush3.bf16.msra.mxu1 %v7294_v53  ;;  %v2184_v53 = vmul.bf16 %v8275_v37, %v8122_v20  ;;  %v2242_v21 = vshll.u32 %v6037_v49, 16  ;;  %v2246_v57 = vshrl.u32 %v6037_v49, 16 }
 0x13b   : > { %6853 = vmatprep.subr.bf16.mxu1 %v7296_v16 }
 0x13c   : > { %6872 = vmatpush3.bf16.msra.mxu0 %v7295_v31  ;;  %v6008_v31 = vcombine.low %v8012_v32, %v8105_v28  ;;  %v2441_v32 = vrot.slane %v2439_v59, 3  ;;  %v2444_v28 = vrot.slane %v2442_v30, 4  ;;  %v2244_v36 = vrot.slane %v2242_v21, 1 }
 0x13d   : > { %6873 = vmatprep.subr.bf16.mxu0 %v7297_v3  ;;  %v6010_v30 = vcombine.low %v8136_v45, %v8177_v11  ;;  %v7310_v45 = vld [vmem:[%s9505_s4 + $0x1f0] sm:$0xff]   ;;  %v2395_v21 = vmul.bf16 %v8273_v9, %v7915_v54 }
 0x13e   : > { %6854 = vmatpush3.bf16.msra.mxu1 %v7296_v16  ;;  %v2176_v16 = vld [vmem:[#allocation2 + $0x28] sm:$0x1]  ;;  %v2248_v49 = vor.u32 %v2246_v57, %v2244_v36 }
 0x13f   : > { %6855 = vmatprep.subr.bf16.mxu1 %v7298_v58  ;;  %v2185_v6 = vmul.bf16 %v2176_v16, %v8151_v27  ;;  %v2393_v16 = vmul.bf16 %v8252_v14, %v7888_v33  ;;  %v8340_v57 = vld [vmem:[#allocation2 + $0x28] sm:$0xf] }
 0x140   : > { %6874 = vmatpush3.bf16.msra.mxu0 %v7297_v3  ;;  %v6009_v3 = vcombine.low %v8099_v56, %v8134_v44  ;;  %v2449_v56 = vrot.slane %v2447_v47, 3  ;;  %v2452_v44 = vrot.slane %v2450_v63, 4  ;;  %v7311_v63 = vld [vmem:[%s9505_s4 + $0x198] sm:$0xff]  }
 0x141   : > { %6875 = vmatprep.subr.bf16.mxu0 %v7299_v60  ;;  %v6039_v59 = vcombine.low %v2185_v6, %v2185_v6  ;;  %v7314_v6 = vld [vmem:[%s9505_s4 + $0x190] sm:$0xff]  }
 0x142   : > { %6856 = vmatpush3.bf16.msra.mxu1 %v7298_v58  ;;  %v6038_v58 = vcombine.low %v2183_v8, %v2184_v53  ;;  %v8307_v8 = vor.u32 %v2452_v44, %v2449_v56  ;;  %v7315_v56 = vld [vmem:[%s9505_s4 + $0x1e0] sm:$0xff]  }
 0x143   : > { %6889 = vmatprep.subr.bf16.mxu1 %v7301_v42  ;;  %v2258_v47 = vshll.u32 %v6039_v59, 16  ;;  %v2397_v59 = vmul.bf16 %v8340_v57, %v7977_v12 }
 0x144   : > { %6876 = vmatpush3.bf16.msra.mxu0 %v7299_v60  ;;  %v2445_v60 = vor.u32 %v2444_v28, %v2441_v32  ;;  %v2250_v62 = vshll.u32 %v6038_v58, 16  ;;  %v2396_v32 = vmul.bf16 %v8275_v37, %v8010_v29 }
 0x145   : > { %6858 = vmatmul.mubr.bf16.vlgmr.msra.gmra.mxu1 %v6008_v31  ;;  %6877 = vmatprep.subr.bf16.mxu0 %v7303_v7 }
 0x146   : > { %6861 = vmatprep.mubr.bf16.mxu1 %v6009_v3  ;;  %6890 = vmatpush3.bf16.msra.mxu1 %v7301_v42  ;;  %v2238_v42 = vshrl.u32 %v8223_v39, 16  ;;  %v2454_v39 = vsel %vm1261_vm6, %v2445_v60, %v8307_v8  ;;  %v2252_v31 = vrot.slane %v2250_v62, 1  ;;  %v2394_v3 = vmul.bf16 %v8254_v13, %v7900_v38 }
 0x147   : > { %6891 = vmatprep.subr.bf16.mxu1 %v7304_v50  ;;  %v6067_v44 = vcombine.low %v2395_v21, %v2396_v32  ;;  %v6093_v60 = vcombine.low %v8180_v43, %v8200_v24  ;;  %v7320_v21 = vld [vmem:[%s9505_s4 + $0x238] sm:$0xff]  }
 0x148   : > { %6878 = vmatpush3.bf16.msra.mxu0 %v7303_v7  ;;  %v7309_v7 = vld [vmem:[%s9505_s4 + $0x1a0] sm:$0xff]   ;;  %v2240_v53 = vor.u32 %v2238_v42, %v8238_v46  ;;  %v2253_v46 = vsel %vm1624_vm7, %v2248_v49, %v2252_v31  ;;  %v7317_v49 = vld [vmem:[%s9505_s4 + $0x1d8] sm:$0xff]  }
 0x149   : > { %6879 = vmatprep.subr.bf16.mxu0 %v7305_v35  ;;  %v2465_v43 = vshrl.u32 %v6067_v44, 16  ;;  %v2468_v24 = vshll.u32 %v6067_v44, 16  ;;  %v7321_v44 = vld [vmem:[%s9505_s4 + $0x1c8] sm:$0xff]  }
 0x14a   : > { %6892 = vmatpush3.bf16.msra.mxu1 %v7304_v50  ;;  %v2245_v11 = vsel %vm1624_vm7, %v2240_v53, %v2244_v36  ;;  %v2254_v50 = vshrl.u32 %v6038_v58, 16  ;;  %v2260_v58 = vrot.slane %v2258_v47, 1  ;;  %v2772_v53 = vld [vmem:[#allocation2 + $0x18] sm:$0xf]  ;;  %v2771_v47 = vld [vmem:[#allocation2 + $0x14] sm:$0xf] }
 0x14b   : > { %6893 = vmatprep.subr.bf16.mxu1 %v7307_v4  ;;  %v2780_v32 = vmul.bf16 %v2771_v47, %v8031_v19 }
 0x14c   : > { %6880 = vmatpush3.bf16.msra.mxu0 %v7305_v35  ;;  %v7312_v35 = vld [vmem:[%s9505_s4 + $0x1e8] sm:$0xff]   ;;  %v2256_v28 = vor.u32 %v2254_v50, %v2252_v31  ;;  %v6068_v50 = vcombine.low %v2397_v59, %v2397_v59 }
 0x14d   : > { %6862 = vmatmul.mubr.bf16.gmra.mxu1 %v6010_v30  ;;  %6913 = vmatprep.subr.bf16.mxu0 %v7308_v1  ;;  %v2769_v30 = vld [vmem:[#allocation2 + $0xc] sm:$0xf] }
 0x14e   : > { %6894 = vmatpush3.bf16.msra.mxu1 %v7307_v4  ;;  %6905 = vmatprep.mubr.bf16.mxu1 %v2454_v39  ;;  %v6066_v4 = vcombine.low %v2393_v16, %v2394_v3  ;;  %v2261_v36 = vsel %vm1624_vm7, %v2256_v28, %v2260_v58  ;;  %v7318_v39 = vld [vmem:[%s9505_s4 + $0x180] sm:$0xff]   ;;  %v2778_v31 = vmul.bf16 %v2769_v30, %v7943_v18  ;;  %v2470_v16 = vrot.slane %v2468_v24, 4  ;;  %v7324_v24 = vld [vmem:[%s9505_s4 + $0x228] sm:$0xff]  }
 0x14f   : > { %6882 = vmatmul.mubr.bf16.vlgmr.msra.gmra.mxu0 %v2245_v11  ;;  %6895 = vmatprep.subr.bf16.mxu1 %v7309_v7 }
 0x150   : > { %6885 = vmatprep.mubr.bf16.mxu0 %v2253_v46  ;;  %6914 = vmatpush3.bf16.msra.mxu0 %v7308_v1  ;;  %v7316_v1 = vld [vmem:[%s9505_s4 + $0x188] sm:$0xff]   ;;  %v2456_v62 = vshrl.u32 %v6066_v4, 16  ;;  %v2459_v42 = vshll.u32 %v6066_v4, 16  ;;  %v7319_v46 = vld [vmem:[%s9505_s4 + $0x1d0] sm:$0xff]   ;;  %v2477_v4 = vshll.u32 %v6068_v50, 16 }
 0x151   : > { %6915 = vmatprep.subr.bf16.mxu0 %v7310_v45 }
 0x152   : > { %6896 = vmatpush3.bf16.msra.mxu1 %v7309_v7  ;;  %v2770_v7 = vld [vmem:[#allocation2 + $0x10] sm:$0xf]  ;;  %v2461_v11 = vrot.slane %v2459_v42, 4  ;;  %v2479_v59 = vrot.slane %v2477_v4, 4  ;;  %v2777_v4 = vld [vmem:[#allocation2 + $0x2c] sm:$0x1] }
 0x153   : > { %6897 = vmatprep.subr.bf16.mxu1 %v7311_v63  ;;  %v2779_v3 = vmul.bf16 %v2770_v7, %v8016_v34 }
 0x154   : > { %6916 = vmatpush3.bf16.msra.mxu0 %v7310_v45  ;;  %v2458_v45 = vrot.slane %v2456_v62, 3 }
 0x155   : > { %6917 = vmatprep.subr.bf16.mxu0 %v7312_v35  ;;  %v6121_v28 = vcombine.low %v2778_v31, %v2779_v3  ;;  %v2774_v3 = vld [vmem:[#allocation2 + $0x20] sm:$0xf] }
 0x156   : > { %6898 = vmatpush3.bf16.msra.mxu1 %v7311_v63  ;;  %v2467_v63 = vrot.slane %v2465_v43, 3  ;;  %v2462_v58 = vor.u32 %v2461_v11, %v2458_v45  ;;  %v7327_v45 = vld [vmem:[%s9505_s4 + $0x220] sm:$0xff]  }
 0x157   : > { %6886 = vmatmul.mubr.bf16.gmra.mxu0 %v2261_v36  ;;  %6899 = vmatprep.subr.bf16.mxu1 %v7314_v6 }
 0x158   : > { %6918 = vmatpush3.bf16.msra.mxu0 %v7312_v35  ;;  %6929 = vmatprep.mubr.bf16.mxu0 %v6093_v60  ;;  %v2781_v35 = vmul.bf16 %v2772_v53, %v7984_v5  ;;  %v7322_v60 = vld [vmem:[%s9505_s4 + $0x230] sm:$0xff]   ;;  %v2463_v62 = vsel %vm1261_vm6, %v8307_v8, %v2462_v58  ;;  %v2828_v53 = vshrl.u32 %v6121_v28, 16 }
 0x159   : > { %6919 = vmatprep.subr.bf16.mxu0 %v7315_v56 }
 0x15a   : > { %6900 = vmatpush3.bf16.msra.mxu1 %v7314_v6  ;;  %v2474_v6 = vshrl.u32 %v6068_v50, 16  ;;  %v8369_v36 = vcombine.low %v2780_v32, %v2781_v35  ;;  %v6094_v50 = vcombine.low %v8202_v41, %v8252_v14  ;;  %v7330_v41 = vld [vmem:[%s9505_s4 + $0x210] sm:$0xff]   ;;  %v2783_v35 = vmul.bf16 %v2774_v3, %v8041_v51  ;;  %v7331_v32 = vld [vmem:[%s9505_s4 + $0x208] sm:$0xff]  }
 0x15b   : > { %6901 = vmatprep.subr.bf16.mxu1 %v7316_v1  ;;  %v7338_v3 = vld [vmem:[%s9508_s7 + $0x30] sm:$0xff]  }
 0x15c   : > { %6920 = vmatpush3.bf16.msra.mxu0 %v7315_v56  ;;  %v2471_v56 = vor.u32 %v2470_v16, %v2467_v63  ;;  %v2476_v42 = vrot.slane %v2474_v6, 3  ;;  %v2835_v43 = vshll.u32 %v8369_v36, 16  ;;  %v7328_v63 = vld [vmem:[%s9505_s4 + $0x218] sm:$0xff]  }
 0x15d   : > { %6921 = vmatprep.subr.bf16.mxu0 %v7317_v49  ;;  %v2773_v16 = vld [vmem:[#allocation2 + $0x1c] sm:$0xf] }
 0x15e   : > { %6902 = vmatpush3.bf16.msra.mxu1 %v7316_v1  ;;  %v2830_v1 = vshll.u32 %v6121_v28, 16  ;;  %v2472_v30 = vsel %vm1261_vm6, %v2462_v58, %v2471_v56  ;;  %v2480_v7 = vor.u32 %v2479_v59, %v2476_v42  ;;  %v2782_v14 = vmul.bf16 %v2773_v16, %v8037_v48  ;;  %v7337_v16 = vld [vmem:[%s9508_s7 + $0x60] sm:$0xff]  }
 0x15f   : > { %6903 = vmatprep.subr.bf16.mxu1 %v7318_v39 }
 0x160   : > { %6922 = vmatpush3.bf16.msra.mxu0 %v7317_v49  ;;  %v7323_v49 = vld [vmem:[%s9505_s4 + $0x1c0] sm:$0xff]   ;;  %v2832_v8 = vrot.slane %v2830_v1, 1  ;;  %v2481_v11 = vsel %vm1261_vm6, %v2471_v56, %v2480_v7  ;;  %v6123_v28 = vcombine.low %v2782_v14, %v2783_v35  ;;  %v2839_v1 = vshrl.u32 %v8369_v36, 16 }
 0x161   : > { %6923 = vmatprep.subr.bf16.mxu0 %v7319_v46  ;;  %v7332_v56 = vld [vmem:[%s9505_s4 + $0x200] sm:$0xff]  }
 0x162   : > { %6904 = vmatpush3.bf16.msra.mxu1 %v7318_v39  ;;  %v2837_v39 = vrot.slane %v2835_v43, 1  ;;  %v2833_v31 = vor.u32 %v2832_v8, %v2828_v53 }
 0x163   : > { %6937 = vmatprep.subr.bf16.mxu1 %v7320_v21 }
 0x164   : > { %6924 = vmatpush3.bf16.msra.mxu0 %v7319_v46  ;;  %v2838_v47 = vsel %vm1624_vm7, %v2833_v31, %v2837_v39  ;;  %v6095_v46 = vcombine.low %v8254_v13, %v8273_v9  ;;  %v2775_v13 = vld [vmem:[#allocation2 + $0x24] sm:$0xf]  ;;  %v2776_v9 = vld [vmem:[#allocation2 + $0x28] sm:$0xf]  ;;  %v2841_v59 = vor.u32 %v2839_v1, %v2837_v39  ;;  %v7333_v39 = vld [vmem:[%s9508_s7 + $0x78] sm:$0xff]  }
 0x165   : > { %6906 = vmatmul.mubr.bf16.vlgmr.msra.gmra.mxu1 %v2463_v62  ;;  %6925 = vmatprep.subr.bf16.mxu0 %v7321_v44  ;;  %v2784_v58 = vmul.bf16 %v2775_v13, %v8116_v40  ;;  %v2785_v6 = vmul.bf16 %v2776_v9, %v8122_v20  ;;  %v7346_v1 = vld [vmem:[%s9508_s7 + $0x10] sm:$0xff]  }
 0x166   : > { %6909 = vmatprep.mubr.bf16.mxu1 %v2472_v30  ;;  %6938 = vmatpush3.bf16.msra.mxu1 %v7320_v21  ;;  %v6096_v21 = vcombine.low %v8275_v37, %v8340_v57  ;;  %v2843_v37 = vshll.u32 %v6123_v28, 16 }
 0x167   : > { %6939 = vmatprep.subr.bf16.mxu1 %v7322_v60  ;;  %v6124_v57 = vcombine.low %v2784_v58, %v2785_v6  ;;  %v7342_v58 = vld [vmem:[%s9508_s7 + $0x20] sm:$0xff]   ;;  %v7343_v6 = vld [vmem:[%s9508_s7 + $0x48] sm:$0xff]  }
 0x168   : > { %6926 = vmatpush3.bf16.msra.mxu0 %v7321_v44  ;;  %v2786_v44 = vmul.bf16 %v2777_v4, %v8151_v27  ;;  %v2845_v62 = vrot.slane %v2843_v37, 1  ;;  %v7344_v37 = vld [vmem:[%s9508_s7 + $0x18] sm:$0xff]  }
 0x169   : > { %6927 = vmatprep.subr.bf16.mxu0 %v7323_v49  ;;  %v2851_v42 = vshll.u32 %v6124_v57, 16  ;;  %v2855_v8 = vshrl.u32 %v6124_v57, 16  ;;  %v7345_v57 = vld [vmem:[%s9508_s7 + $0x40] sm:$0xff]  }
 0x16a   : > { %6940 = vmatpush3.bf16.msra.mxu1 %v7322_v60  ;;  %v2847_v60 = vshrl.u32 %v6123_v28, 16  ;;  %v6125_v30 = vcombine.low %v2786_v44, %v2786_v44  ;;  %v7341_v28 = vld [vmem:[%s9508_s7 + $0x50] sm:$0xff]  }
 0x16b   : > { %6941 = vmatprep.subr.bf16.mxu1 %v7324_v24  ;;  %v2853_v43 = vrot.slane %v2851_v42, 1 }
 0x16c   : > { %6928 = vmatpush3.bf16.msra.mxu0 %v7323_v49  ;;  %v2849_v49 = vor.u32 %v2847_v60, %v2845_v62  ;;  %v2859_v7 = vshll.u32 %v6125_v30, 16  ;;  %v7350_v30 = vld [vmem:[%s9508_s7 + $0x8] sm:$0xff]  }
 0x16d   : > { %6910 = vmatmul.mubr.bf16.gmra.mxu1 %v2481_v11  ;;  %v2857_v31 = vor.u32 %v2855_v8, %v2853_v43  ;;  %v7334_v11 = vld [vmem:[%s9508_s7 + $0x70] sm:$0xff]   ;;  %6961 = vmatprep.subr.bf16.mxu0 %v7333_v39 }
 0x16e   : > { %6942 = vmatpush3.bf16.msra.mxu1 %v7324_v24  ;;  %6953 = vmatprep.mubr.bf16.mxu1 %v2838_v47  ;;  %v2846_v24 = vsel %vm1624_vm7, %v2841_v59, %v2845_v62  ;;  %v2854_v53 = vsel %vm1624_vm7, %v2849_v49, %v2853_v43  ;;  %v8483_v62 = vld [vmem:[%s9508_s7 + $0xb8] sm:$0xff]  }
 0x16f   : > { %6930 = vmatmul.mubr.bf16.vlgmr.msra.gmra.mxu0 %v6094_v50  ;;  %6943 = vmatprep.subr.bf16.mxu1 %v7327_v45  ;;  %v7335_v50 = vld [vmem:[%s9508_s7 + $0x68] sm:$0xff]   ;;  %9605 = vst [vmem:[#allocation29_spill] sm:$0xff] %v8483_v62 }
 0x170   : > { %6933 = vmatprep.mubr.bf16.mxu0 %v6095_v46  ;;  %6962 = vmatpush3.bf16.msra.mxu0 %v7333_v39 }
 0x171   : > { %6963 = vmatprep.subr.bf16.mxu0 %v7334_v11 }
 0x172   : > { %6944 = vmatpush3.bf16.msra.mxu1 %v7327_v45  ;;  %v2861_v45 = vrot.slane %v2859_v7, 1 }
 0x173   : > { %6945 = vmatprep.subr.bf16.mxu1 %v7328_v63 }
 0x174   : > { %v2862_v36 = vsel %vm1624_vm7, %v2857_v31, %v2861_v45  ;;  %6964 = vmatpush3.bf16.msra.mxu0 %v7334_v11 }
 0x175   : > { %6965 = vmatprep.subr.bf16.mxu0 %v7335_v50 }
 0x176   : > { %6946 = vmatpush3.bf16.msra.mxu1 %v7328_v63  ;;  %v7336_v63 = vld [vmem:[%s9508_s7 + $0x38] sm:$0xff]  }
 0x177   : > { %6934 = vmatmul.mubr.bf16.gmra.mxu0 %v6096_v21  ;;  %6947 = vmatprep.subr.bf16.mxu1 %v7330_v41 }
 0x178   : > { %6966 = vmatpush3.bf16.msra.mxu0 %v7335_v50 }
 0x179   : > { %6967 = vmatprep.subr.bf16.mxu0 %v7337_v16 }
 0x17a   : > { %6948 = vmatpush3.bf16.msra.mxu1 %v7330_v41  ;;  %v7339_v41 = vld [vmem:[%s9508_s7 + $0x58] sm:$0xff]  }
 0x17b   : > { %6949 = vmatprep.subr.bf16.mxu1 %v7331_v32 }
 0x17c   : > { %6968 = vmatpush3.bf16.msra.mxu0 %v7337_v16 }
 0x17d   : > { %6969 = vmatprep.subr.bf16.mxu0 %v7339_v41 }
 0x17e   : > { %6950 = vmatpush3.bf16.msra.mxu1 %v7331_v32  ;;  %v7340_v32 = vld [vmem:[%s9508_s7 + $0x28] sm:$0xff]  }
 0x17f   : > { %6951 = vmatprep.subr.bf16.mxu1 %v7332_v56 }
 0x180   : > { %6970 = vmatpush3.bf16.msra.mxu0 %v7339_v41 }
 0x181   : > { %6971 = vmatprep.subr.bf16.mxu0 %v7341_v28 }
 0x182   : > { %6952 = vmatpush3.bf16.msra.mxu1 %v7332_v56 }
 0x183   : > { %6985 = vmatprep.subr.bf16.mxu1 %v7336_v63 }
 0x184   : > { %6972 = vmatpush3.bf16.msra.mxu0 %v7341_v28 }
 0x185   : > { %6954 = vmatmul.mubr.bf16.vlgmr.msra.gmra.mxu1 %v2846_v24  ;;  %6973 = vmatprep.subr.bf16.mxu0 %v7343_v6  ;;  %v7352_v24 = vld [vmem:[%s9508_s7] sm:$0xff]  }
 0x186   : > { %6957 = vmatprep.mubr.bf16.mxu1 %v2854_v53  ;;  %6986 = vmatpush3.bf16.msra.mxu1 %v7336_v63  ;;  %v8503_v53 = vld [vmem:[%s9508_s7 + $0xf8] sm:$0xff]  }
 0x187   : > { %6987 = vmatprep.subr.bf16.mxu1 %v7338_v3  ;;  %9606 = vst [vmem:[#allocation30_spill] sm:$0xff] %v8503_v53 }
 0x188   : > { %6974 = vmatpush3.bf16.msra.mxu0 %v7343_v6 }
 0x189   : > { %6975 = vmatprep.subr.bf16.mxu0 %v7345_v57 }
 0x18a   : > { %6988 = vmatpush3.bf16.msra.mxu1 %v7338_v3 }
 0x18b   : > { %6989 = vmatprep.subr.bf16.mxu1 %v7340_v32 }
 0x18c   : > { %6976 = vmatpush3.bf16.msra.mxu0 %v7345_v57 }
 0x18d   : > { %6958 = vmatmul.mubr.bf16.gmra.mxu1 %v2862_v36  ;;  %7009 = vmatprep.subr.bf16.mxu0 %v8483_v62 }
 0x18e   : > { %6990 = vmatpush3.bf16.msra.mxu1 %v7340_v32 }
 0x18f   : > { %6991 = vmatprep.subr.bf16.mxu1 %v7342_v58 }
 0x192   : > { %6992 = vmatpush3.bf16.msra.mxu1 %v7342_v58 }
 0x193   : > { %6993 = vmatprep.subr.bf16.mxu1 %v7344_v37 }
 0x196   : > { %6994 = vmatpush3.bf16.msra.mxu1 %v7344_v37 }
 0x197   : > { %6995 = vmatprep.subr.bf16.mxu1 %v7346_v1 }
 0x19a   : > { %6996 = vmatpush3.bf16.msra.mxu1 %v7346_v1 }
 0x19b   : > { %6997 = vmatprep.subr.bf16.mxu1 %v7350_v30 }
 0x19e   : > { %6998 = vmatpush3.bf16.msra.mxu1 %v7350_v30 }
 0x19f   : > { %6999 = vmatprep.subr.bf16.mxu1 %v7352_v24 }
 0x1a2   : > { %7000 = vmatpush3.bf16.msra.mxu1 %v7352_v24 }
 0x1a3   : > { %7033 = vmatprep.subr.bf16.mxu1 %v8503_v53 }
 0x1c4   : > { %v8425_v47 = vpop.f32.mrf.mxu1 }
 0x1c6   : > { %v8427_v46 = vpop.f32.mrf.mxu1 }
 0x1c8   : > { %v8441_v14 = vpop.f32.mrf.mxu1 }
 0x1ca   : > { %v8445_v13 = vpop.f32.mrf.mxu1 }
 0x1cc   : > { %v8449_v21 = vpop.f32.mrf.mxu1 }
 0x1ce   : > { %v8465_v56 = vpop.f32.mrf.mxu1 }
 0x1cf   : > { %v8443_v35 = vpop.f32.mrf.mxu0 }
 0x1d0   : > { %v8475_v60 = vpop.f32.mrf.mxu1  ;;  %v1401_v34 = vadd.f32 %v8443_v35, %v8425_v47 }
 0x1d1   : > { %v8447_v9 = vpop.f32.mrf.mxu0 }
 0x1d2   : > { %v8487_v59 = vpop.f32.mrf.mxu1  ;;  %v1393_v23 = vadd.f32 %v8447_v9, %v8427_v46 }
 0x1d3   : > { %v8463_v4 = vpop.f32.mrf.mxu0 }
 0x1d4   : > { %v1404_v38 = vadd.f32 %v8463_v4, %v8441_v14 }
 0x1d5   : > { %v8473_v44 = vpop.f32.mrf.mxu0 }
 0x1d7   : > { %v8485_v42 = vpop.f32.mrf.mxu0 }
 0x1d8   : > { %v1417_v47 = vadd.f32 %v8485_v42, %v8449_v21 }
 0x1d9   : > { %v8493_v43 = vpop.f32.mrf.mxu0 }
 0x1db   : > { %v8498_v7 = vpop.f32.mrf.mxu0 }
 0x1dd   : > { %v8505_v45 = vpop.f32.mrf.mxu0 }
 0x1e4   : > { %v6811_v49 = vpop.f32.mrf.mxu1 }
 0x1e5   : > { %v1780_v26 = vadd.f32 %v6811_v49, %v1401_v34 }
 0x1e6   : > { %v1747_v8 = vpop.f32.mrf.mxu1 }
 0x1e7   : > { %v1778_v33 = vadd.f32 %v1747_v8, %v1393_v23  ;;  %v1409_v23 = vadd.f32 %v8493_v43, %v8465_v56 }
 0x1e8   : > { %v6812_v31 = vpop.f32.mrf.mxu1 }
 0x1ea   : > { %v1750_v39 = vpop.f32.mrf.mxu1 }
 0x1ec   : > { %v6815_v50 = vpop.f32.mrf.mxu1 }
 0x1ee   : > { %v1763_v16 = vpop.f32.mrf.mxu1 }
 0x1ef   : > { %v6835_v36 = vpop.f32.mrf.mxu0 }
 0x1f0   : > { %v8508_v41 = vpop.f32.mrf.mxu1  ;;  %v2000_v17 = vadd.f32 %v6835_v36, %v1780_v26  ;;  %v1784_v26 = vadd.f32 %v6815_v50, %v1417_v47 }
 0x1f1   : > { %v1967_v11 = vpop.f32.mrf.mxu0 }
 0x1f2   : > { %v8510_v28 = vpop.f32.mrf.mxu1  ;;  %v1998_v61 = vadd.f32 %v1967_v11, %v1778_v33 }
 0x1f3   : > { %v6836_v63 = vpop.f32.mrf.mxu0 }
 0x1f5   : > { %v1970_v3 = vpop.f32.mrf.mxu0 }
 0x1f7   : > { %v6839_v32 = vpop.f32.mrf.mxu0 }
 0x1f9   : > { %v1983_v6 = vpop.f32.mrf.mxu0 }
 0x1fb   : > { %v8512_v57 = vpop.f32.mrf.mxu0 }
 0x1fd   : > { %v8514_v30 = vpop.f32.mrf.mxu0 }
 0x205   : > { %v6859_v58 = vpop.f32.mrf.mxu1 }
 0x207   : > { %v2129_v37 = vpop.f32.mrf.mxu1 }
 0x208   : > { %v2160_v9 = vadd.f32 %v2129_v37, %v1998_v61  ;;  %v1420_v61 = vadd.f32 %v8498_v7, %v8475_v60 }
 0x209   : > { %v6860_v1 = vpop.f32.mrf.mxu1 }
 0x20b   : > { %v2132_v55 = vpop.f32.mrf.mxu1 }
 0x20d   : > { %v6863_v2 = vpop.f32.mrf.mxu1 }
 0x20f   : > { %v6883_v24 = vpop.f32.mrf.mxu0  ;;  %v2145_v25 = vpop.f32.mrf.mxu1 }
 0x211   : > { %v2348_v15 = vpop.f32.mrf.mxu0  ;;  %v8516_v22 = vpop.f32.mrf.mxu1 }
 0x212   : > { %9607 = vst [vmem:[#allocation31_spill] sm:$0xff] %v8516_v22 }
 0x213   : > { %v6884_v0 = vpop.f32.mrf.mxu0  ;;  %v8518_v27 = vpop.f32.mrf.mxu1 }
 0x214   : > { %9608 = vst [vmem:[#allocation32_spill] sm:$0xff] %v8518_v27  ;;  %v2162_v27 = vadd.f32 %v6859_v58, %v2000_v17  ;;  %v1782_v17 = vadd.f32 %v1763_v16, %v1409_v23 }
 0x215   : > { %v2351_v10 = vpop.f32.mrf.mxu0 }
 0x216   : > { %v2381_v49 = vadd.f32 %v6883_v24, %v2162_v27 }
 0x217   : > { %v6887_v52 = vpop.f32.mrf.mxu0 }
 0x219   : > { %v8520_v40 = vpop.f32.mrf.mxu0 }
 0x21b   : > { %v8522_v51 = vpop.f32.mrf.mxu0 }
 0x21c   : > { %9609 = vst [vmem:[#allocation33_spill] sm:$0xff] %v8522_v51  ;;  %v1781_v51 = vadd.f32 %v6812_v31, %v1404_v38 }
 0x21d   : > { %v8524_v29 = vpop.f32.mrf.mxu0 }
 0x21e   : > { %9610 = vst [vmem:[#allocation34_spill] sm:$0xff] %v8524_v29  ;;  %v1396_v29 = vadd.f32 %v8473_v44, %v8445_v13  ;;  %v2001_v35 = vadd.f32 %v6836_v63, %v1781_v51  ;;  %v2379_v13 = vadd.f32 %v2348_v15, %v2160_v9  ;;  %v2004_v44 = vadd.f32 %v6839_v32, %v1784_v26  ;;  %v8549_v15 = vld [vmem:[%s9506_s5] ss:$0 sm:$0xff]  ;;  %v3066_v63 = vld [vmem:[#allocation2] sm:$0x8] }
 0x21f   : > { %v2002_v51 = vadd.f32 %v1983_v6, %v1782_v17  ;;  %v8561_v32 = vld [vmem:[#allocation2 + $0x4] sm:$0xf]  ;;  %v9612_v6 = vld [vmem:[#allocation32_spill] sm:$0xff] }
 0x220   : > { %v1779_v34 = vadd.f32 %v1750_v39, %v1396_v29  ;;  %v2163_v4 = vadd.f32 %v6860_v1, %v2001_v35  ;;  %v1412_v29 = vadd.f32 %v8505_v45, %v8487_v59  ;;  %v2166_v27 = vadd.f32 %v6863_v2, %v2004_v44  ;;  %v9613_v1 = vld [vmem:[#allocation3_spill] sm:$0xff] }
 0x221   : > { %v2164_v7 = vadd.f32 %v2145_v25, %v2002_v51 }
 0x222   : > { %v1999_v14 = vadd.f32 %v1970_v3, %v1779_v34  ;;  %v2382_v21 = vadd.f32 %v6884_v0, %v2163_v4  ;;  %v1783_v60 = vadd.f32 %v8510_v28, %v1412_v29  ;;  %v2385_v39 = vadd.f32 %v6887_v52, %v2166_v27  ;;  %v9611_v28 = vld [vmem:[#allocation31_spill] sm:$0xff] }
 0x223   : > { %v9614_v34 = vld [vmem:[#allocation33_spill] sm:$0xff] }
 0x224   : > { %v2161_v31 = vadd.f32 %v2132_v55, %v1999_v14  ;;  %v9616_v14 = vld [vmem:[#allocation4_spill] sm:$0xff] }
 0x225   : > { %v6907_v20 = vpop.f32.mrf.mxu1  ;;  %v9615_v9 = vld [vmem:[#allocation34_spill] sm:$0xff]  ;;  %v3076_v4 = vmul.bf16 %v8561_v32, %v9616_v14 }
 0x226   : > { %v2601_v38 = vadd.f32 %v6907_v20, %v2381_v49  ;;  %v2380_v56 = vadd.f32 %v2351_v10, %v2161_v31  ;;  %v2003_v10 = vadd.f32 %v8514_v30, %v1783_v60  ;;  %v3075_v30 = vmul.bf16 %v3066_v63, %v9613_v1 }
 0x227   : > { %v2568_v48 = vpop.f32.mrf.mxu1 }
 0x228   : > { %v2599_v42 = vadd.f32 %v2568_v48, %v2379_v13  ;;  %v2165_v37 = vadd.f32 %v9612_v6, %v2003_v10 }
 0x229   : > { %v6908_v53 = vpop.f32.mrf.mxu1 }
 0x22a   : > { %v2602_v43 = vadd.f32 %v6908_v53, %v2382_v21  ;;  %v6135_v53 = vld [vmem:[%s9507_s6] ss:$0 sm:$0xff]  ;;  %v2384_v49 = vadd.f32 %v9615_v9, %v2165_v37 }
 0x22b   : > { %v2571_v12 = vpop.f32.mrf.mxu1 }
 0x22c   : > { %v2600_v45 = vadd.f32 %v2571_v12, %v2380_v56 }
 0x22d   : > { %v6911_v19 = vpop.f32.mrf.mxu1 }
 0x22e   : > { %v2605_v25 = vadd.f32 %v6911_v19, %v2385_v39 }
 0x22f   : > { %v6931_v54 = vpop.f32.mrf.mxu0  ;;  %v8530_v18 = vpop.f32.mrf.mxu1 }
 0x230   : > { %v2763_v36 = vadd.f32 %v6931_v54, %v2601_v38  ;;  %v1785_v54 = vadd.f32 %v8508_v41, %v1420_v61 }
 0x231   : > { %v2730_v62 = vpop.f32.mrf.mxu0  ;;  %v8538_v46 = vpop.f32.mrf.mxu1 }
 0x232   : > { %v2761_v55 = vadd.f32 %v2730_v62, %v2599_v42  ;;  %v2005_v16 = vadd.f32 %v8512_v57, %v1785_v54  ;;  %v2383_v62 = vadd.f32 %v8520_v40, %v2164_v7 }
 0x233   : > { %v6932_v5 = vpop.f32.mrf.mxu0  ;;  %v2587_v8 = vpop.f32.mrf.mxu1 }
 0x234   : > { %v2764_v2 = vadd.f32 %v6932_v5, %v2602_v43  ;;  %v2167_v58 = vadd.f32 %v9611_v28, %v2005_v16  ;;  %v2603_v57 = vadd.f32 %v8530_v18, %v2383_v62  ;;  %v2604_v31 = vadd.f32 %v2587_v8, %v2384_v49 }
 0x235   : > { %v2733_v22 = vpop.f32.mrf.mxu0  ;;  %v6172_v43 = vcombine.low %v3075_v30, %v3076_v4  ;;  %v9622_v4 = vld [vmem:[#allocation5_spill] sm:$0xff] }
 0x236   : > { %v2762_v52 = vadd.f32 %v2733_v22, %v2600_v45  ;;  %v2386_v35 = vadd.f32 %v9614_v34, %v2167_v58 }
 0x237   : > { %v6935_v33 = vpop.f32.mrf.mxu0  ;;  %v3278_v45 = vshrl.u32 %v6172_v43, 16  ;;  %v3281_v16 = vshll.u32 %v6172_v43, 16  ;;  %v9625_v43 = vld [vmem:[#allocation29_spill] sm:$0xff] }
 0x238   : > { %v2767_v24 = vadd.f32 %v6935_v33, %v2605_v25  ;;  %v2606_v33 = vadd.f32 %v8538_v46, %v2386_v35  ;;  %v9620_v35 = vld [vmem:[#allocation17_spill] sm:$0xff] }
 0x239   : > { %v2746_v0 = vpop.f32.mrf.mxu0  ;;  %v8587_v30 = vrot.slane %v3281_v16, 4 }
 0x23a   : > { %v2765_v23 = vadd.f32 %v2746_v0, %v2603_v57  ;;  %v9617_v57 = vld [vmem:[#allocation7_spill] sm:$0xff] }
 0x23b   : > { %v6936_v41 = vpop.f32.mrf.mxu0 }
 0x23c   : > { %v2768_v51 = vadd.f32 %v6936_v41, %v2606_v33  ;;  %v3438_v41 = vld [vmem:[#allocation2 + $0x4] sm:$0xf] }
 0x23d   : > { %v2749_v13 = vpop.f32.mrf.mxu0 }
 0x23e   : > { %v2766_v27 = vadd.f32 %v2749_v13, %v2604_v31  ;;  %v9623_v31 = vld [vmem:[#allocation22_spill] sm:$0xff] }
 0x245   : > { %v6955_v20 = vpop.f32.mrf.mxu1 }
 0x246   : > { %v2982_v48 = vadd.f32 %v6955_v20, %v2763_v36 }
 0x247   : > { %v2949_v59 = vpop.f32.mrf.mxu1 }
 0x248   : > { %v2996_v11 = vmul.f32 %v8549_v15, %v2982_v48  ;;  %v2980_v50 = vadd.f32 %v2949_v59, %v2761_v55 }
 0x249   : > { %v6956_v3 = vpop.f32.mrf.mxu1 }
 0x24a   : > { %v2994_v12 = vmul.f32 %v8549_v15, %v2980_v50  ;;  %v2983_v5 = vadd.f32 %v6956_v3, %v2764_v2  ;;  %v3010_v47 = vadd.f32 %v6135_v53, %v2996_v11  ;;  %v8578_v3 = vrot.slane %v3278_v45, 3 }
 0x24b   : > { %v2952_v40 = vpop.f32.mrf.mxu1 }
 0x24c   : > { %v2997_v19 = vmul.f32 %v8549_v15, %v2983_v5  ;;  %v2981_v22 = vadd.f32 %v2952_v40, %v2762_v52  ;;  %v3008_v38 = vadd.f32 %v6135_v53, %v2994_v12  ;;  %v3018_v42 = vmax.f32 %v3010_v47, 0.0  ;;  %v3657_v12 = vld [vmem:[#allocation2 + $0x4] sm:$0x8]  ;;  %v9618_v40 = vld [vmem:[#allocation8_spill] sm:$0xff] }
 0x24d   : > { %v6959_v26 = vpop.f32.mrf.mxu1  ;;  %v3659_v49 = vmul.bf16 %v3657_v12, %v9613_v1 }
 0x24e   : > { %v3011_v18 = vadd.f32 %v6135_v53, %v2997_v19  ;;  %v2995_v17 = vmul.f32 %v8549_v15, %v2981_v22  ;;  %v2986_v44 = vadd.f32 %v6959_v26, %v2767_v24  ;;  %v3016_v55 = vmax.f32 %v3008_v38, 0.0  ;;  %v9619_v22 = vld [vmem:[#allocation12_spill] sm:$0xff] }
 0x24f   : > { %v2965_v21 = vpop.f32.mrf.mxu1  ;;  %v3447_v34 = vmul.bf16 %v3438_v41, %v9619_v22  ;;  %v9627_v41 = vld [vmem:[#allocation9_spill] sm:$0xff] }
 0x250   : > { %v3019_v36 = vmax.f32 %v3011_v18, 0.0  ;;  %v3009_v61 = vadd.f32 %v6135_v53, %v2995_v17  ;;  %v2984_v29 = vadd.f32 %v2965_v21, %v2765_v23  ;;  %v3000_v20 = vmul.f32 %v8549_v15, %v2986_v44  ;;  %v9621_v23 = vld [vmem:[#allocation6_spill] sm:$0xff]  ;;  %v7351_v44 = vld [vmem:[%s9508_s7 + $0xb0] sm:$0xff]  }
 0x251   : > { %v6960_v56 = vpop.f32.mrf.mxu1 }
 0x252   : > { %v6452_v0 = vpack.c.bf16 %v3019_v36, %v3018_v42  ;;  %v3017_v48 = vmax.f32 %v3009_v61, 0.0  ;;  %v2998_v54 = vmul.f32 %v8549_v15, %v2984_v29  ;;  %v2987_v60 = vadd.f32 %v6960_v56, %v2768_v51  ;;  %v9624_v42 = vld [vmem:[#allocation23_spill] sm:$0xff] }
 0x253   : > { %v2968_v7 = vpop.f32.mrf.mxu1  ;;  %v3014_v39 = vadd.f32 %v6135_v53, %v3000_v20 }
 0x254   : > { %6469 = vst [vmem:[#allocation2 + $0x10] sm:$0xff] %v6452_v0   ;;  %v6447_v46 = vpack.c.bf16 %v3017_v48, %v3016_v55  ;;  %v2985_v8 = vadd.f32 %v2968_v7, %v2766_v27  ;;  %v3001_v59 = vmul.f32 %v8549_v15, %v2987_v60  ;;  %v3012_v2 = vadd.f32 %v6135_v53, %v2998_v54 }
 0x255   : > { %v3022_v10 = vmax.f32 %v3014_v39, 0.0  ;;  %v3284_v55 = vor.u32 %v8587_v30, %v8578_v3 }
 0x256   : > { %6468 = vst [vmem:[#allocation2 + $0x8] sm:$0xff] %v6447_v46   ;;  %v2999_v11 = vmul.f32 %v8549_v15, %v2985_v8  ;;  %v3015_v50 = vadd.f32 %v6135_v53, %v3001_v59  ;;  %v3020_v25 = vmax.f32 %v3012_v2, 0.0  ;;  %v7354_v46 = vld [vmem:[%s9508_s7 + $0xa8] sm:$0xff]  }
 0x258   : > { %v3013_v63 = vadd.f32 %v6135_v53, %v2999_v11  ;;  %v3023_v62 = vmax.f32 %v3015_v50, 0.0 }
 0x25a   : > { %v3021_v52 = vmax.f32 %v3013_v63, 0.0  ;;  %v6462_v5 = vpack.c.bf16 %v3023_v62, %v3022_v10  ;;  %v9626_v10 = vld [vmem:[#allocation16_spill] sm:$0xff] }
 0x25b   : > { %v3070_v28 = vld [vmem:[#allocation2 + $0x10] sm:$0xf]  ;;  %v8580_v58 = vld [vmem:[#allocation2 + $0x14] sm:$0xf] }
 0x25c   : > { %v8582_v6 = vld [vmem:[#allocation2 + $0x10] sm:$0xf]  ;;  %v6457_v37 = vpack.c.bf16 %v3021_v52, %v3020_v25  ;;  %v3079_v15 = vmul.bf16 %v3070_v28, %v9617_v57  ;;  %v3080_v53 = vmul.bf16 %v8580_v58, %v9618_v40  ;;  %6471 = vst [vmem:[#allocation2 + $0x20] sm:$0xff] %v6462_v5  }
 0x25d   : > { %v3068_v24 = vld [vmem:[#allocation2 + $0x8] sm:$0xf]  ;;  %v3069_v47 = vld [vmem:[#allocation2 + $0xc] sm:$0xf]  ;;  %v3450_v9 = vmul.bf16 %v8582_v6, %v9620_v35  ;;  %v3662_v54 = vmul.bf16 %v8582_v6, %v9622_v4 }
 0x25e   : > { %v8589_v19 = vld [vmem:[#allocation2 + $0x8] sm:$0xf]  ;;  %6470 = vst [vmem:[#allocation2 + $0x18] sm:$0xff] %v6457_v37   ;;  %v3077_v26 = vmul.bf16 %v3068_v24, %v9621_v23  ;;  %v3078_v13 = vmul.bf16 %v3069_v47, %v9622_v4  ;;  %v6160_v38 = vcombine.low %v8561_v32, %v3068_v24  ;;  %v6161_v18 = vcombine.low %v3069_v47, %v3070_v28  ;;  %v8598_v17 = vld [vmem:[#allocation2 + $0xc] sm:$0xf]  ;;  %v9628_v28 = vld [vmem:[#allocation21_spill] sm:$0xff] }
 0x25f   : > { %v6174_v33 = vcombine.low %v3079_v15, %v3080_v53  ;;  %v3448_v21 = vmul.bf16 %v8589_v19, %v9623_v31  ;;  %v3449_v36 = vmul.bf16 %v8598_v17, %v9624_v42  ;;  %v3660_v61 = vmul.bf16 %v8589_v19, %v9616_v14 }
 0x260   : > { %6977 = vmatprep.mubr.bf16.mxu0 %v6160_v38  ;;  %v6173_v29 = vcombine.low %v3077_v26, %v3078_v13  ;;  %v3661_v32 = vmul.bf16 %v8598_v17, %v9621_v23 }
 0x261   : > { %6978 = vmatmul.mubr.bf16.vlgmr.msra.gmra.mxu0 %v6161_v18  ;;  %v3295_v51 = vshrl.u32 %v6174_v33, 16  ;;  %v3298_v27 = vshll.u32 %v6174_v33, 16  ;;  %v6201_v20 = vcombine.low %v3447_v34, %v3448_v21  ;;  %v8611_v56 = vcombine.low %v3449_v36, %v3450_v9  ;;  %v7358_v33 = vld [vmem:[%s9508_s7 + $0xf0] sm:$0xff]  }
 0x262   : > { %7010 = vmatpush3.bf16.msra.mxu0 %v9625_v43  ;;  %v3286_v0 = vshrl.u32 %v6173_v29, 16  ;;  %v3289_v48 = vshll.u32 %v6173_v29, 16  ;;  %v6230_v39 = vcombine.low %v3659_v49, %v3660_v61  ;;  %v6231_v50 = vcombine.low %v3661_v32, %v3662_v54  ;;  %v7357_v49 = vld [vmem:[%s9508_s7 + $0xa0] sm:$0xff]   ;;  %v7359_v32 = vld [vmem:[%s9508_s7 + $0x98] sm:$0xff]  }
 0x263   : > { %7011 = vmatprep.subr.bf16.mxu0 %v7351_v44  ;;  %v3297_v60 = vrot.slane %v3295_v51, 3  ;;  %v3300_v7 = vrot.slane %v3298_v27, 4  ;;  %v3499_v8 = vshll.u32 %v6201_v20, 16  ;;  %v3074_v59 = vld [vmem:[#allocation2 + $0x20] sm:$0xf]  ;;  %v3504_v11 = vshll.u32 %v8611_v56, 16 }
 0x264   : > { %v3288_v45 = vrot.slane %v3286_v0, 3  ;;  %v3291_v2 = vrot.slane %v3289_v48, 4  ;;  %v3083_v62 = vmul.bf16 %v3074_v59, %v9626_v10  ;;  %v3497_v25 = vshrl.u32 %v6201_v20, 16 }
 0x265   : > { %v3072_v63 = vld [vmem:[#allocation2 + $0x18] sm:$0xf]  ;;  %v3073_v16 = vld [vmem:[#allocation2 + $0x1c] sm:$0xf]  ;;  %v3301_v3 = vor.u32 %v3300_v7, %v3297_v60  ;;  %v3501_v52 = vrot.slane %v3499_v8, 1  ;;  %v3709_v47 = vshrl.u32 %v6230_v39, 16 }
 0x266   : > { %7012 = vmatpush3.bf16.msra.mxu0 %v7351_v44  ;;  %v3081_v12 = vmul.bf16 %v3072_v63, %v9627_v41  ;;  %v6162_v5 = vcombine.low %v8580_v58, %v3072_v63  ;;  %v3082_v37 = vmul.bf16 %v3073_v16, %v9628_v28  ;;  %v6163_v15 = vcombine.low %v3073_v16, %v3074_v59  ;;  %v8638_v29 = vld [vmem:[#allocation2 + $0x18] sm:$0xf]  ;;  %v8644_v7 = vld [vmem:[#allocation2 + $0x14] sm:$0xf]  ;;  %v9630_v8 = vld [vmem:[#allocation25_spill] sm:$0xff] }
 0x267   : > { %7013 = vmatprep.subr.bf16.mxu0 %v7354_v46  ;;  %v6176_v53 = vcombine.low %v3083_v62, %v3083_v62  ;;  %v3292_v30 = vor.u32 %v3291_v2, %v3288_v45  ;;  %v3502_v24 = vor.u32 %v3501_v52, %v3497_v25  ;;  %v8626_v9 = vrot.slane %v3504_v11, 1  ;;  %v9631_v63 = vld [vmem:[#allocation24_spill] sm:$0xff] }
 0x268   : > { %6981 = vmatprep.mubr.bf16.mxu0 %v6162_v5  ;;  %v6175_v34 = vcombine.low %v3081_v12, %v3082_v37  ;;  %v3712_v26 = vshll.u32 %v6230_v39, 16  ;;  %v3717_v13 = vshrl.u32 %v6231_v50, 16  ;;  %v3711_v20 = vrot.slane %v3709_v47, 3  ;;  %v8660_v12 = vld [vmem:[#allocation2 + $0x1c] sm:$0xf]  ;;  %v7362_v5 = vld [vmem:[%s9508_s7 + $0xe0] sm:$0xff]  }
 0x269   : > { %6982 = vmatmul.mubr.bf16.gmra.mxu0 %v6163_v15  ;;  %v3313_v58 = vshrl.u32 %v6176_v53, 16  ;;  %v3316_v38 = vshll.u32 %v6176_v53, 16  ;;  %v3293_v18 = vsel %vm1261_vm6, %v3284_v55, %v3292_v30  ;;  %v3302_v44 = vsel %vm1261_vm6, %v3292_v30, %v3301_v3  ;;  %v9629_v55 = vld [vmem:[#allocation30_spill] sm:$0xff]  ;;  %v8665_v15 = vld [vmem:[#allocation2 + $0x20] sm:$0xf]  ;;  %v7364_v47 = vld [vmem:[%s9508_s7 + $0xd8] sm:$0xff]  }
 0x26a   : > { %7001 = vmatprep.mubr.bf16.mxu1 %v3293_v18  ;;  %7014 = vmatpush3.bf16.msra.mxu0 %v7354_v46  ;;  %v3507_v21 = vsel %vm1624_vm7, %v3502_v24, %v8626_v9  ;;  %v3304_v36 = vshrl.u32 %v6175_v34, 16  ;;  %v3307_v61 = vshll.u32 %v6175_v34, 16  ;;  %v3714_v43 = vrot.slane %v3712_v26, 4  ;;  %v7360_v46 = vld [vmem:[%s9508_s7 + $0xe8] sm:$0xff]   ;;  %v3446_v18 = vld [vmem:[#allocation2 + $0x24] sm:$0x1] }
 0x26b   : > { %7002 = vmatmul.mubr.bf16.vlgmr.msra.gmra.mxu1 %v3302_v44  ;;  %7025 = vmatprep.mubr.bf16.mxu0 %v3507_v21  ;;  %v3315_v51 = vrot.slane %v3313_v58, 3  ;;  %v3318_v27 = vrot.slane %v3316_v38, 4  ;;  %v3719_v54 = vrot.slane %v3717_v13, 3  ;;  %v3720_v60 = vshll.u32 %v6231_v50, 16  ;;  %v7361_v50 = vld [vmem:[%s9508_s7 + $0x90] sm:$0xff]   ;;  %v7363_v53 = vld [vmem:[%s9508_s7 + $0x88] sm:$0xff]  }
 0x26c   : > { %7034 = vmatpush3.bf16.msra.mxu1 %v9629_v55  ;;  %7015 = vmatprep.subr.bf16.mxu0 %v7357_v49  ;;  %v3306_v0 = vrot.slane %v3304_v36, 3  ;;  %v3309_v48 = vrot.slane %v3307_v61, 4  ;;  %v3452_v39 = vmul.bf16 %v8638_v29, %v9630_v8  ;;  %v3715_v11 = vor.u32 %v3714_v43, %v3711_v20  ;;  %v9632_v30 = vld [vmem:[#allocation26_spill] sm:$0xff]  ;;  %v7365_v58 = vld [vmem:[%s9508_s7 + $0x80] sm:$0xff]   ;;  %v7366_v21 = vld [vmem:[%s9508_s7 + $0xd0] sm:$0xff]  }
 0x26d   : > { %7035 = vmatprep.subr.bf16.mxu1 %v7358_v33  ;;  %v3319_v45 = vor.u32 %v3318_v27, %v3315_v51  ;;  %v3722_v2 = vrot.slane %v3720_v60, 4  ;;  %v3451_v16 = vmul.bf16 %v8644_v7, %v9631_v63  ;;  %v3453_v24 = vmul.bf16 %v8660_v12, %v9632_v30  ;;  %v4039_v20 = vld [vmem:[#allocation2 + $0x8] sm:$0xf]  ;;  %v7367_v43 = vld [vmem:[%s9508_s7 + $0x138] sm:$0xff]   ;;  %v8698_v60 = vld [vmem:[#allocation2 + $0xc] sm:$0xf] }
 0x26e   : > { %7016 = vmatpush3.bf16.msra.mxu0 %v7357_v49  ;;  %v3310_v59 = vor.u32 %v3309_v48, %v3306_v0  ;;  %v9633_v49 = vld [vmem:[#allocation27_spill] sm:$0xff]  ;;  %v3664_v13 = vmul.bf16 %v8638_v29, %v9618_v40  ;;  %v3665_v44 = vmul.bf16 %v8660_v12, %v9627_v41  ;;  %v3666_v61 = vmul.bf16 %v8665_v15, %v9628_v28 }
 0x26f   : > { %7017 = vmatprep.subr.bf16.mxu0 %v7359_v32  ;;  %v8658_v52 = vor.u32 %v3722_v2, %v3719_v54  ;;  %v6203_v37 = vcombine.low %v3451_v16, %v3452_v39  ;;  %v3454_v26 = vmul.bf16 %v8665_v15, %v9633_v49  ;;  %v3508_v54 = vshrl.u32 %v8611_v56, 16  ;;  %v7368_v39 = vld [vmem:[%s9508_s7 + $0xc8] sm:$0xff]  }
 0x270   : > { %7036 = vmatpush3.bf16.msra.mxu1 %v7358_v33  ;;  %v3311_v62 = vsel %vm1261_vm6, %v3301_v3, %v3310_v59  ;;  %v3320_v25 = vsel %vm1261_vm6, %v3310_v59, %v3319_v45  ;;  %v3663_v33 = vmul.bf16 %v8644_v7, %v9617_v57  ;;  %v6233_v48 = vcombine.low %v3665_v44, %v3666_v61  ;;  %v8703_v59 = vld [vmem:[#allocation2 + $0x24] sm:$0xf]  ;;  %v7371_v44 = vld [vmem:[%s9508_s7 + $0x128] sm:$0xff]  }
 0x271   : > { %7005 = vmatprep.mubr.bf16.mxu1 %v3311_v62  ;;  %7037 = vmatprep.subr.bf16.mxu1 %v7360_v46  ;;  %v3724_v3 = vsel %vm1261_vm6, %v3715_v11, %v8658_v52  ;;  %v3512_v34 = vshll.u32 %v6203_v37, 16  ;;  %v6204_v38 = vcombine.low %v3453_v24, %v3454_v26  ;;  %v3516_v55 = vshrl.u32 %v6203_v37, 16  ;;  %v7369_v62 = vld [vmem:[%s9508_s7 + $0x130] sm:$0xff]   ;;  %v7370_v24 = vld [vmem:[%s9508_s7 + $0xc0] sm:$0xff]  }
 0x272   : > { %7018 = vmatpush3.bf16.msra.mxu0 %v7359_v32  ;;  %v9634_v32 = vld [vmem:[#allocation28_spill] sm:$0xff]  ;;  %v6232_v27 = vcombine.low %v3663_v33, %v3664_v13  ;;  %v4048_v45 = vmul.bf16 %v4039_v20, %v9619_v22  ;;  %v3510_v2 = vor.u32 %v3508_v54, %v8626_v9  ;;  %v4049_v37 = vmul.bf16 %v8698_v60, %v9623_v31 }
 0x273   : > { %7006 = vmatmul.mubr.bf16.gmra.mxu1 %v3320_v25  ;;  %7019 = vmatprep.subr.bf16.mxu0 %v7361_v50  ;;  %v3514_v36 = vrot.slane %v3512_v34, 1  ;;  %v3455_v51 = vmul.bf16 %v3446_v18, %v9634_v32  ;;  %v3520_v0 = vshll.u32 %v6204_v38, 16  ;;  %v3735_v25 = vshrl.u32 %v6233_v48, 16  ;;  %v8721_v18 = vld [vmem:[#allocation2 + $0x14] sm:$0xf] }
 0x274   : > { %7038 = vmatpush3.bf16.msra.mxu1 %v7360_v46  ;;  %7049 = vmatprep.mubr.bf16.mxu1 %v3724_v3  ;;  %v3729_v16 = vshll.u32 %v6232_v27, 16  ;;  %v3667_v9 = vmul.bf16 %v8703_v59, %v9626_v10  ;;  %v3524_v34 = vshrl.u32 %v6204_v38, 16  ;;  %v7373_v38 = vld [vmem:[%s9508_s7 + $0x178] sm:$0xff]   ;;  %v4051_v20 = vmul.bf16 %v8721_v18, %v9620_v35 }
 0x275   : > { %7039 = vmatprep.subr.bf16.mxu1 %v7362_v5  ;;  %v3518_v46 = vor.u32 %v3516_v55, %v3514_v36  ;;  %v6205_v11 = vcombine.low %v3455_v51, %v3455_v51  ;;  %v3522_v56 = vrot.slane %v3520_v0, 1  ;;  %v3515_v3 = vsel %vm1624_vm7, %v3510_v2, %v3514_v36 }
 0x276   : > { %7020 = vmatpush3.bf16.msra.mxu0 %v7361_v50  ;;  %v3726_v50 = vshrl.u32 %v6232_v27, 16  ;;  %v3737_v33 = vrot.slane %v3735_v25, 3  ;;  %v6287_v36 = vcombine.low %v4048_v45, %v4049_v37  ;;  %v6234_v51 = vcombine.low %v3667_v9, %v3667_v9  ;;  %v7378_v9 = vld [vmem:[%s9508_s7 + $0x110] sm:$0xff]  }
 0x277   : > { %7021 = vmatprep.subr.bf16.mxu0 %v7363_v53  ;;  %v3528_v26 = vshll.u32 %v6205_v11, 16  ;;  %v3526_v61 = vor.u32 %v3524_v34, %v3522_v56  ;;  %v7375_v11 = vld [vmem:[%s9508_s7 + $0x170] sm:$0xff]   ;;  %v7379_v34 = vld [vmem:[%s9508_s7 + $0x160] sm:$0xff]  }
 0x278   : > { %7040 = vmatpush3.bf16.msra.mxu1 %v7362_v5  ;;  %v3738_v5 = vshll.u32 %v6233_v48, 16  ;;  %v3728_v13 = vrot.slane %v3726_v50, 3  ;;  %v7374_v48 = vld [vmem:[%s9508_s7 + $0x120] sm:$0xff]   ;;  %v4100_v54 = vshll.u32 %v6287_v36, 16  ;;  %v3744_v45 = vshrl.u32 %v6234_v51, 16 }
 0x279   : > { %7041 = vmatprep.subr.bf16.mxu1 %v7364_v47  ;;  %v3747_v2 = vshll.u32 %v6234_v51, 16  ;;  %v4261_v51 = vmul.bf16 %v8698_v60, %v9616_v14  ;;  %v7383_v14 = vld [vmem:[%s9508_s7 + $0x150] sm:$0xff]  }
 0x27a   : > { %7022 = vmatpush3.bf16.msra.mxu0 %v7363_v53  ;;  %v3523_v53 = vsel %vm1624_vm7, %v3518_v46, %v3522_v56 }
 0x27b   : > { %7023 = vmatprep.subr.bf16.mxu0 %v7365_v58  ;;  %v3749_v25 = vrot.slane %v3747_v2, 4 }
 0x27c   : > { %7042 = vmatpush3.bf16.msra.mxu1 %v7364_v47  ;;  %v8719_v47 = vld [vmem:[#allocation2 + $0x10] sm:$0xf] }
 0x27d   : > { %7043 = vmatprep.subr.bf16.mxu1 %v7366_v21  ;;  %v4050_v27 = vmul.bf16 %v8719_v47, %v9624_v42 }
 0x27e   : > { %7024 = vmatpush3.bf16.msra.mxu0 %v7365_v58  ;;  %v3731_v58 = vrot.slane %v3729_v16, 4 }
 0x27f   : > { %7057 = vmatprep.subr.bf16.mxu0 %v7367_v43  ;;  %v8742_v50 = vcombine.low %v4050_v27, %v4051_v20 }
 0x280   : > { %7044 = vmatpush3.bf16.msra.mxu1 %v7366_v21  ;;  %v3740_v21 = vrot.slane %v3738_v5, 4  ;;  %v3732_v55 = vor.u32 %v3731_v58, %v3728_v13  ;;  %v4098_v5 = vshrl.u32 %v6287_v36, 16  ;;  %v4258_v13 = vld [vmem:[#allocation2 + $0x8] sm:$0x8]  ;;  %v7381_v36 = vld [vmem:[%s9508_s7 + $0x158] sm:$0xff]  }
 0x281   : > { %7026 = vmatmul.mubr.bf16.vlgmr.msra.gmra.mxu0 %v3515_v3  ;;  %7045 = vmatprep.subr.bf16.mxu1 %v7368_v39  ;;  %v4105_v37 = vshll.u32 %v8742_v50, 16 }
 0x282   : > { %7029 = vmatprep.mubr.bf16.mxu0 %v3523_v53  ;;  %7058 = vmatpush3.bf16.msra.mxu0 %v7367_v43  ;;  %v3530_v43 = vrot.slane %v3528_v26, 1  ;;  %v3741_v0 = vor.u32 %v3740_v21, %v3737_v33  ;;  %v3733_v16 = vsel %vm1261_vm6, %v8658_v52, %v3732_v55  ;;  %v7377_v52 = vld [vmem:[%s9508_s7 + $0x168] sm:$0xff]   ;;  %v8768_v33 = vld [vmem:[#allocation2 + $0x18] sm:$0xf]  ;;  %v8770_v21 = vld [vmem:[#allocation2 + $0x1c] sm:$0xf] }
 0x283   : > { %7059 = vmatprep.subr.bf16.mxu0 %v7369_v62  ;;  %v4052_v27 = vmul.bf16 %v8768_v33, %v9631_v63  ;;  %v4053_v20 = vmul.bf16 %v8770_v21, %v9630_v8 }
 0x284   : > { %7046 = vmatpush3.bf16.msra.mxu1 %v7368_v39  ;;  %v3531_v46 = vsel %vm1624_vm7, %v3526_v61, %v3530_v43  ;;  %v6259_v39 = vcombine.low %v8589_v19, %v8598_v17  ;;  %v3742_v56 = vsel %vm1261_vm6, %v3732_v55, %v3741_v0  ;;  %v7376_v19 = vld [vmem:[%s9508_s7 + $0x118] sm:$0xff]   ;;  %v4102_v17 = vrot.slane %v4100_v54, 1 }
 0x285   : > { %7047 = vmatprep.subr.bf16.mxu1 %v7370_v24  ;;  %v4260_v61 = vmul.bf16 %v4258_v13, %v9613_v1  ;;  %v4262_v43 = vmul.bf16 %v8719_v47, %v9621_v23  ;;  %v4263_v1 = vmul.bf16 %v8721_v18, %v9622_v4  ;;  %v7385_v23 = vld [vmem:[%s9508_s7 + $0x1b8] sm:$0xff]   ;;  %v6289_v54 = vcombine.low %v4052_v27, %v4053_v20  ;;  %v7387_v4 = vld [vmem:[%s9508_s7 + $0x148] sm:$0xff]   ;;  %v7393_v27 = vld [vmem:[%s9508_s7 + $0x1a0] sm:$0xff]  }
 0x286   : > { %7060 = vmatpush3.bf16.msra.mxu0 %v7369_v62  ;;  %v3746_v62 = vrot.slane %v3744_v45, 3  ;;  %v4103_v3 = vor.u32 %v4102_v17, %v4098_v5  ;;  %v7389_v5 = vld [vmem:[%s9508_s7 + $0x140] sm:$0xff]  }
 0x287   : > { %7061 = vmatprep.subr.bf16.mxu0 %v7371_v44  ;;  %v6316_v55 = vcombine.low %v4260_v61, %v4261_v51  ;;  %v4117_v13 = vshrl.u32 %v6289_v54, 16  ;;  %v6262_v61 = vcombine.low %v8665_v15, %v8703_v59  ;;  %v7394_v15 = vld [vmem:[%s9508_s7 + $0x1f0] sm:$0xff]  }
 0x288   : > { %7048 = vmatpush3.bf16.msra.mxu1 %v7370_v24  ;;  %v3750_v53 = vor.u32 %v3749_v25, %v3746_v62  ;;  %v8757_v24 = vrot.slane %v4105_v37, 1  ;;  %v4047_v25 = vld [vmem:[#allocation2 + $0x28] sm:$0x1] }
 0x289   : > { %7030 = vmatmul.mubr.bf16.gmra.mxu0 %v3531_v46  ;;  %7081 = vmatprep.subr.bf16.mxu1 %v7373_v38  ;;  %v6317_v46 = vcombine.low %v4262_v43, %v4263_v1  ;;  %v4313_v45 = vshll.u32 %v6316_v55, 16 }
 0x28a   : > { %7062 = vmatpush3.bf16.msra.mxu0 %v7371_v44  ;;  %7073 = vmatprep.mubr.bf16.mxu0 %v6259_v39  ;;  %v3751_v26 = vsel %vm1261_vm6, %v3741_v0, %v3750_v53  ;;  %v4108_v58 = vsel %vm1624_vm7, %v4103_v3, %v8757_v24  ;;  %v7380_v44 = vld [vmem:[%s9508_s7 + $0x108] sm:$0xff]   ;;  %v8792_v0 = vld [vmem:[#allocation2 + $0x20] sm:$0xf]  ;;  %v4310_v39 = vshrl.u32 %v6316_v55, 16  ;;  %v4056_v3 = vmul.bf16 %v4047_v25, %v9634_v32 }
 0x28b   : > { %7050 = vmatmul.mubr.bf16.vlgmr.msra.gmra.mxu1 %v3733_v16  ;;  %7063 = vmatprep.subr.bf16.mxu0 %v7374_v48  ;;  %v4054_v2 = vmul.bf16 %v8792_v0, %v9632_v30  ;;  %v6260_v16 = vcombine.low %v8582_v6, %v8644_v7  ;;  %v4318_v17 = vshrl.u32 %v6317_v46, 16  ;;  %v4321_v62 = vshll.u32 %v6317_v46, 16  ;;  %v7396_v46 = vld [vmem:[%s9508_s7 + $0x1e8] sm:$0xff]  }
 0x28c   : > { %7053 = vmatprep.mubr.bf16.mxu1 %v3742_v56  ;;  %7082 = vmatpush3.bf16.msra.mxu1 %v7373_v38  ;;  %v7382_v38 = vld [vmem:[%s9508_s7 + $0x100] sm:$0xff]   ;;  %v7388_v56 = vld [vmem:[%s9508_s7 + $0x1b0] sm:$0xff]   ;;  %v4312_v6 = vrot.slane %v4310_v39, 3  ;;  %v4315_v7 = vrot.slane %v4313_v45, 4 }
 0x28d   : > { %7083 = vmatprep.subr.bf16.mxu1 %v7375_v11  ;;  %v7398_v45 = vld [vmem:[%s9508_s7 + $0x190] sm:$0xff]  }
 0x28e   : > { %7064 = vmatpush3.bf16.msra.mxu0 %v7374_v48  ;;  %v8794_v48 = vld [vmem:[#allocation2 + $0x24] sm:$0xf] }
 0x28f   : > { %7065 = vmatprep.subr.bf16.mxu0 %v7376_v19 }
 0x290   : > { %7084 = vmatpush3.bf16.msra.mxu1 %v7375_v11  ;;  %v4055_v11 = vmul.bf16 %v8794_v48, %v9633_v49 }
 0x291   : > { %7085 = vmatprep.subr.bf16.mxu1 %v7377_v52 }
 0x292   : > { %7066 = vmatpush3.bf16.msra.mxu0 %v7376_v19  ;;  %v4113_v19 = vshll.u32 %v6289_v54, 16  ;;  %v6290_v37 = vcombine.low %v4054_v2, %v4055_v11  ;;  %v4265_v54 = vmul.bf16 %v8770_v21, %v9618_v40  ;;  %v4266_v2 = vmul.bf16 %v8792_v0, %v9627_v41  ;;  %v7399_v11 = vld [vmem:[%s9508_s7 + $0x1e0] sm:$0xff]   ;;  %v7400_v41 = vld [vmem:[%s9508_s7 + $0x188] sm:$0xff]  }
 0x293   : > { %7054 = vmatmul.mubr.bf16.gmra.mxu1 %v3751_v26  ;;  %7067 = vmatprep.subr.bf16.mxu0 %v7378_v9  ;;  %v7392_v26 = vld [vmem:[%s9508_s7 + $0x1f8] sm:$0xff]  }
 0x294   : > { %7086 = vmatpush3.bf16.msra.mxu1 %v7377_v52  ;;  %7097 = vmatprep.mubr.bf16.mxu1 %v4108_v58  ;;  %v6261_v52 = vcombine.low %v8638_v29, %v8660_v12  ;;  %v4115_v53 = vrot.slane %v4113_v19, 1  ;;  %v4320_v29 = vrot.slane %v4318_v17, 3  ;;  %v4323_v12 = vrot.slane %v4321_v62, 4 }
 0x295   : > { %7087 = vmatprep.subr.bf16.mxu1 %v7379_v34  ;;  %v4121_v58 = vshll.u32 %v6290_v37, 16  ;;  %v4125_v55 = vshrl.u32 %v6290_v37, 16  ;;  %v6345_v19 = vcombine.low %v8698_v60, %v8719_v47  ;;  %v7401_v60 = vld [vmem:[%s9508_s7 + $0x1d8] sm:$0xff]   ;;  %v4641_v47 = vld [vmem:[#allocation2 + $0x10] sm:$0xf] }
 0x296   : > { %7068 = vmatpush3.bf16.msra.mxu0 %v7378_v9  ;;  %v7391_v9 = vld [vmem:[%s9508_s7 + $0x1a8] sm:$0xff]   ;;  %v8826_v51 = vor.u32 %v4323_v12, %v4320_v29  ;;  %v4642_v29 = vld [vmem:[#allocation2 + $0x14] sm:$0xf] }
 0x297   : > { %7069 = vmatprep.subr.bf16.mxu0 %v7380_v44  ;;  %v4123_v43 = vrot.slane %v4121_v58, 1  ;;  %v7403_v12 = vld [vmem:[%s9508_s7 + $0x1d0] sm:$0xff]  }
 0x298   : > { %7088 = vmatpush3.bf16.msra.mxu1 %v7379_v34  ;;  %v4316_v34 = vor.u32 %v4315_v7, %v4312_v6  ;;  %v7402_v6 = vld [vmem:[%s9508_s7 + $0x180] sm:$0xff]  }
 0x299   : > { %7089 = vmatprep.subr.bf16.mxu1 %v7381_v36 }
 0x29a   : > { %7070 = vmatpush3.bf16.msra.mxu0 %v7380_v44  ;;  %v4109_v44 = vshrl.u32 %v8742_v50, 16  ;;  %v4325_v50 = vsel %vm1261_vm6, %v4316_v34, %v8826_v51  ;;  %v4650_v34 = vmul.bf16 %v4641_v47, %v9623_v31 }
 0x29b   : > { %7071 = vmatprep.subr.bf16.mxu0 %v7382_v38 }
 0x29c   : > { %7090 = vmatpush3.bf16.msra.mxu1 %v7381_v36  ;;  %v6291_v36 = vcombine.low %v4056_v3, %v4056_v3  ;;  %v4111_v20 = vor.u32 %v4109_v44, %v8757_v24  ;;  %v7395_v24 = vld [vmem:[%s9508_s7 + $0x198] sm:$0xff]   ;;  %v4651_v44 = vmul.bf16 %v4642_v29, %v9624_v42 }
 0x29d   : > { %7091 = vmatprep.subr.bf16.mxu1 %v7383_v14 }
 0x29e   : > { %7072 = vmatpush3.bf16.msra.mxu0 %v7382_v38  ;;  %v4119_v38 = vor.u32 %v4117_v13, %v4115_v53  ;;  %v4116_v59 = vsel %vm1624_vm7, %v4111_v20, %v4115_v53  ;;  %v4129_v1 = vshll.u32 %v6291_v36, 16 }
 0x29f   : > { %7105 = vmatprep.subr.bf16.mxu0 %v7385_v23 }
 0x2a0   : > { %7092 = vmatpush3.bf16.msra.mxu1 %v7383_v14  ;;  %v4124_v14 = vsel %vm1624_vm7, %v4119_v38, %v4123_v43  ;;  %v4131_v39 = vrot.slane %v4129_v1, 1 }
 0x2a1   : > { %7074 = vmatmul.mubr.bf16.vlgmr.msra.gmra.mxu0 %v6260_v16  ;;  %7093 = vmatprep.subr.bf16.mxu1 %v7387_v4  ;;  %v8859_v16 = vld [vmem:[#allocation2 + $0x28] sm:$0xf] }
 0x2a2   : > { %7077 = vmatprep.mubr.bf16.mxu0 %v6261_v52  ;;  %7106 = vmatpush3.bf16.msra.mxu0 %v7385_v23  ;;  %v4264_v23 = vmul.bf16 %v8768_v33, %v9617_v57  ;;  %v4267_v57 = vmul.bf16 %v8794_v48, %v9628_v28  ;;  %v4268_v25 = vmul.bf16 %v8859_v16, %v9626_v10  ;;  %v4640_v52 = vld [vmem:[#allocation2 + $0xc] sm:$0xf] }
 0x2a3   : > { %7107 = vmatprep.subr.bf16.mxu0 %v7388_v56  ;;  %v4649_v3 = vmul.bf16 %v4640_v52, %v9619_v22  ;;  %v7404_v22 = vld [vmem:[%s9508_s7 + $0x238] sm:$0xff]  }
 0x2a4   : > { %7094 = vmatpush3.bf16.msra.mxu1 %v7387_v4  ;;  %v4127_v4 = vor.u32 %v4125_v55, %v4123_v43  ;;  %v6318_v40 = vcombine.low %v4264_v23, %v4265_v54  ;;  %v6319_v28 = vcombine.low %v4266_v2, %v4267_v57  ;;  %v6320_v53 = vcombine.low %v4268_v25, %v4268_v25  ;;  %v7408_v55 = vld [vmem:[%s9508_s7 + $0x228] sm:$0xff]  }
 0x2a5   : > { %7095 = vmatprep.subr.bf16.mxu1 %v7389_v5  ;;  %v6373_v36 = vcombine.low %v4649_v3, %v4650_v34  ;;  %v6346_v2 = vcombine.low %v8721_v18, %v8768_v33  ;;  %v7414_v18 = vld [vmem:[%s9508_s7 + $0x210] sm:$0xff]  }
 0x2a6   : > { %7108 = vmatpush3.bf16.msra.mxu0 %v7388_v56  ;;  %v4132_v56 = vsel %vm1624_vm7, %v4127_v4, %v4131_v39  ;;  %v4327_v17 = vshrl.u32 %v6318_v40, 16  ;;  %v4330_v62 = vshll.u32 %v6318_v40, 16  ;;  %v4336_v7 = vshrl.u32 %v6319_v28, 16  ;;  %v7411_v39 = vld [vmem:[%s9508_s7 + $0x220] sm:$0xff]  }
 0x2a7   : > { %7109 = vmatprep.subr.bf16.mxu0 %v7391_v9  ;;  %v4339_v37 = vshll.u32 %v6319_v28, 16  ;;  %v4345_v38 = vshrl.u32 %v6320_v53, 16  ;;  %v4701_v42 = vshll.u32 %v6373_v36, 16  ;;  %v4699_v54 = vshrl.u32 %v6373_v36, 16  ;;  %v7420_v36 = vld [vmem:[%s9511_s10 + $0x20] sm:$0xff]  }
 0x2a8   : > { %7096 = vmatpush3.bf16.msra.mxu1 %v7389_v5  ;;  %v4643_v5 = vld [vmem:[#allocation2 + $0x18] sm:$0xf]  ;;  %v4329_v10 = vrot.slane %v4327_v17, 3  ;;  %v4338_v13 = vrot.slane %v4336_v7, 3  ;;  %v6347_v40 = vcombine.low %v8770_v21, %v8792_v0  ;;  %v4646_v21 = vld [vmem:[#allocation2 + $0x24] sm:$0xf]  ;;  %v6348_v28 = vcombine.low %v8794_v48, %v8859_v16 }
 0x2a9   : > { %7078 = vmatmul.mubr.bf16.gmra.mxu0 %v6262_v61  ;;  %7129 = vmatprep.subr.bf16.mxu1 %v7392_v26  ;;  %v4341_v58 = vrot.slane %v4339_v37, 4  ;;  %v4647_v0 = vld [vmem:[#allocation2 + $0x28] sm:$0xf] }
 0x2aa   : > { %7110 = vmatpush3.bf16.msra.mxu0 %v7391_v9  ;;  %7121 = vmatprep.mubr.bf16.mxu0 %v4325_v50  ;;  %v4332_v9 = vrot.slane %v4330_v62, 4  ;;  %v7406_v50 = vld [vmem:[%s9508_s7 + $0x230] sm:$0xff]   ;;  %v4655_v62 = vmul.bf16 %v4646_v21, %v9632_v30  ;;  %v4656_v25 = vmul.bf16 %v4647_v0, %v9633_v49 }
 0x2ab   : > { %7098 = vmatmul.mubr.bf16.vlgmr.msra.gmra.mxu1 %v4116_v59  ;;  %7111 = vmatprep.subr.bf16.mxu0 %v7393_v27  ;;  %v4342_v20 = vor.u32 %v4341_v58, %v4338_v13  ;;  %v7418_v13 = vld [vmem:[%s9511_s10 + $0x30] sm:$0xff]   ;;  %v7419_v58 = vld [vmem:[%s9511_s10 + $0x28] sm:$0xff]  }
 0x2ac   : > { %7101 = vmatprep.mubr.bf16.mxu1 %v4124_v14  ;;  %7130 = vmatpush3.bf16.msra.mxu1 %v7392_v26  ;;  %v4652_v26 = vmul.bf16 %v4643_v5, %v9620_v35  ;;  %v4333_v61 = vor.u32 %v4332_v9, %v4329_v10  ;;  %v7405_v35 = vld [vmem:[%s9508_s7 + $0x1c8] sm:$0xff]   ;;  %v7407_v14 = vld [vmem:[%s9508_s7 + $0x1c0] sm:$0xff]   ;;  %v6376_v48 = vcombine.low %v4655_v62, %v4656_v25  ;;  %v9635_v10 = vmov 0.0  }
 0x2ad   : > { %7131 = vmatprep.subr.bf16.mxu1 %v7394_v15 }
 0x2ae   : > { %7112 = vmatpush3.bf16.msra.mxu0 %v7393_v27  ;;  %v4348_v27 = vshll.u32 %v6320_v53, 16  ;;  %v8888_v31 = vcombine.low %v4651_v44, %v4652_v26  ;;  %v4334_v43 = vsel %vm1261_vm6, %v8826_v51, %v4333_v61  ;;  %v4343_v1 = vsel %vm1261_vm6, %v4333_v61, %v4342_v20 }
 0x2af   : > { %7113 = vmatprep.subr.bf16.mxu0 %v7395_v24  ;;  %v4703_v51 = vrot.slane %v4701_v42, 1  ;;  %v4722_v30 = vshll.u32 %v6376_v48, 16  ;;  %v4726_v29 = vshrl.u32 %v6376_v48, 16 }
 0x2b0   : > { %7132 = vmatpush3.bf16.msra.mxu1 %v7394_v15  ;;  %v4347_v15 = vrot.slane %v4345_v38, 3  ;;  %v4350_v59 = vrot.slane %v4348_v27, 4  ;;  %v4710_v5 = vshrl.u32 %v8888_v31, 16  ;;  %v7421_v38 = vld [vmem:[%s9511_s10 + $0x18] sm:$0xff]   ;;  %v7422_v27 = vld [vmem:[%s9511_s10 + $0x10] sm:$0xff]  }
 0x2b1   : > { %7133 = vmatprep.subr.bf16.mxu1 %v7396_v46  ;;  %v4704_v4 = vor.u32 %v4703_v51, %v4699_v54  ;;  %v4724_v3 = vrot.slane %v4722_v30, 1 }
 0x2b2   : > { %7114 = vmatpush3.bf16.msra.mxu0 %v7395_v24  ;;  %v4706_v24 = vshll.u32 %v8888_v31, 16  ;;  %v4351_v23 = vor.u32 %v4350_v59, %v4347_v15  ;;  %v7424_v59 = vld [vmem:[%s9511_s10] sm:$0xff]  }
 0x2b3   : > { %7102 = vmatmul.mubr.bf16.gmra.mxu1 %v4132_v56  ;;  %7115 = vmatprep.subr.bf16.mxu0 %v7398_v45  ;;  %v7412_v56 = vld [vmem:[%s9508_s7 + $0x218] sm:$0xff]  }
 0x2b4   : > { %7134 = vmatpush3.bf16.msra.mxu1 %v7396_v46  ;;  %7145 = vmatprep.mubr.bf16.mxu1 %v6345_v19  ;;  %v4708_v46 = vrot.slane %v4706_v24, 1  ;;  %v4645_v19 = vld [vmem:[#allocation2 + $0x20] sm:$0xf] }
 0x2b5   : > { %7135 = vmatprep.subr.bf16.mxu1 %v7399_v11  ;;  %v4654_v33 = vmul.bf16 %v4645_v19, %v9630_v8  ;;  %v7416_v8 = vld [vmem:[%s9508_s7 + $0x200] sm:$0xff]  }
 0x2b6   : > { %7116 = vmatpush3.bf16.msra.mxu0 %v7398_v45  ;;  %v4352_v45 = vsel %vm1261_vm6, %v4342_v20, %v4351_v23  ;;  %v4709_v57 = vsel %vm1624_vm7, %v4704_v4, %v4708_v46  ;;  %v4712_v7 = vor.u32 %v4710_v5, %v4708_v46  ;;  %v7423_v20 = vld [vmem:[%s9511_s10 + $0x8] sm:$0xff]  }
 0x2b7   : > { %7117 = vmatprep.subr.bf16.mxu0 %v7400_v41 }
 0x2b8   : > { %7136 = vmatpush3.bf16.msra.mxu1 %v7399_v11  ;;  %v4644_v11 = vld [vmem:[#allocation2 + $0x1c] sm:$0xf] }
 0x2b9   : > { %7137 = vmatprep.subr.bf16.mxu1 %v7401_v60 }
 0x2ba   : > { %7118 = vmatpush3.bf16.msra.mxu0 %v7400_v41  ;;  %v4653_v41 = vmul.bf16 %v4644_v11, %v9631_v63  ;;  %v7415_v63 = vld [vmem:[%s9508_s7 + $0x208] sm:$0xff]  }
 0x2bb   : > { %7119 = vmatprep.subr.bf16.mxu0 %v7402_v6 }
 0x2bc   : > { %7138 = vmatpush3.bf16.msra.mxu1 %v7401_v60  ;;  %v6375_v17 = vcombine.low %v4653_v41, %v4654_v33  ;;  %v4648_v60 = vld [vmem:[#allocation2 + $0x2c] sm:$0x1] }
 0x2bd   : > { %7139 = vmatprep.subr.bf16.mxu1 %v7403_v12  ;;  %v4657_v16 = vmul.bf16 %v4648_v60, %v9634_v32  ;;  %v7431_v33 = vld [vmem:[%s9513_s12 + $0x8] sm:$0xff]  }
 0x2be   : > { %7120 = vmatpush3.bf16.msra.mxu0 %v7402_v6  ;;  %v4714_v52 = vshll.u32 %v6375_v17, 16  ;;  %v4718_v6 = vshrl.u32 %v6375_v17, 16 }
 0x2bf   : > { %7153 = vmatprep.subr.bf16.mxu0 %v7404_v22  ;;  %v6377_v49 = vcombine.low %v4657_v16, %v4657_v16 }
 0x2c0   : > { %7140 = vmatpush3.bf16.msra.mxu1 %v7403_v12  ;;  %v4716_v47 = vrot.slane %v4714_v52, 1  ;;  %v4728_v12 = vor.u32 %v4726_v29, %v4724_v3 }
 0x2c1   : > { %7122 = vmatmul.mubr.bf16.vlgmr.msra.gmra.mxu0 %v4334_v43  ;;  %7141 = vmatprep.subr.bf16.mxu1 %v7405_v35  ;;  %v4730_v53 = vshll.u32 %v6377_v49, 16  ;;  %v7426_v43 = vld [vmem:[%s9513_s12 + $0x30] sm:$0xff]  }
 0x2c2   : > { %7125 = vmatprep.mubr.bf16.mxu0 %v4343_v1  ;;  %7154 = vmatpush3.bf16.msra.mxu0 %v7404_v22  ;;  %v4720_v37 = vor.u32 %v4718_v6, %v4716_v47  ;;  %v4717_v9 = vsel %vm1624_vm7, %v4712_v7, %v4716_v47  ;;  %v7417_v22 = vld [vmem:[%s9511_s10 + $0x38] sm:$0xff]  }
 0x2c3   : > { %7155 = vmatprep.subr.bf16.mxu0 %v7406_v50  ;;  %v4732_v34 = vrot.slane %v4730_v53, 1 }
 0x2c4   : > { %7142 = vmatpush3.bf16.msra.mxu1 %v7405_v35  ;;  %v4725_v32 = vsel %vm1624_vm7, %v4720_v37, %v4724_v3 }
 0x2c5   : > { %7143 = vmatprep.subr.bf16.mxu1 %v7407_v14  ;;  %v4733_v26 = vsel %vm1624_vm7, %v4728_v12, %v4732_v34 }
 0x2c6   : > { %7156 = vmatpush3.bf16.msra.mxu0 %v7406_v50  ;;  %v7425_v50 = vld [vmem:[%s9513_s12 + $0x38] sm:$0xff]  }
 0x2c7   : > { %7157 = vmatprep.subr.bf16.mxu0 %v7408_v55 }
 0x2c8   : > { %7144 = vmatpush3.bf16.msra.mxu1 %v7407_v14  ;;  %v7427_v14 = vld [vmem:[%s9513_s12 + $0x28] sm:$0xff]  }
 0x2c9   : > { %7126 = vmatmul.mubr.bf16.gmra.mxu0 %v4352_v45  ;;  %7177 = vmatprep.subr.bf16.mxu1 %v7417_v22  ;;  %v7428_v45 = vld [vmem:[%s9513_s12 + $0x20] sm:$0xff]  }
 0x2ca   : > { %7158 = vmatpush3.bf16.msra.mxu0 %v7408_v55  ;;  %7169 = vmatprep.mubr.bf16.mxu0 %v4709_v57  ;;  %v7429_v57 = vld [vmem:[%s9513_s12 + $0x18] sm:$0xff]  }
 0x2cb   : > { %7146 = vmatmul.mubr.bf16.vlgmr.msra.gmra.mxu1 %v6346_v2  ;;  %7159 = vmatprep.subr.bf16.mxu0 %v7411_v39 }
 0x2cc   : > { %7149 = vmatprep.mubr.bf16.mxu1 %v6347_v40  ;;  %7178 = vmatpush3.bf16.msra.mxu1 %v7417_v22 }
 0x2cd   : > { %7179 = vmatprep.subr.bf16.mxu1 %v7418_v13 }
 0x2ce   : > { %7160 = vmatpush3.bf16.msra.mxu0 %v7411_v39 }
 0x2cf   : > { %7161 = vmatprep.subr.bf16.mxu0 %v7412_v56 }
 0x2d0   : > { %7180 = vmatpush3.bf16.msra.mxu1 %v7418_v13 }
 0x2d1   : > { %7181 = vmatprep.subr.bf16.mxu1 %v7419_v58 }
 0x2d2   : > { %7162 = vmatpush3.bf16.msra.mxu0 %v7412_v56  ;;  %v7430_v56 = vld [vmem:[%s9513_s12 + $0x10] sm:$0xff]  }
 0x2d3   : > { %7150 = vmatmul.mubr.bf16.gmra.mxu1 %v6348_v28  ;;  %7163 = vmatprep.subr.bf16.mxu0 %v7414_v18  ;;  %v7432_v28 = vld [vmem:[%s9513_s12] sm:$0xff]  }
 0x2d4   : > { %7182 = vmatpush3.bf16.msra.mxu1 %v7419_v58 }
 0x2d5   : > { %7183 = vmatprep.subr.bf16.mxu1 %v7420_v36 }
 0x2d6   : > { %7164 = vmatpush3.bf16.msra.mxu0 %v7414_v18 }
 0x2d7   : > { %7165 = vmatprep.subr.bf16.mxu0 %v7415_v63 }
 0x2d8   : > { %7184 = vmatpush3.bf16.msra.mxu1 %v7420_v36 }
 0x2d9   : > { %7185 = vmatprep.subr.bf16.mxu1 %v7421_v38 }
 0x2da   : > { %7166 = vmatpush3.bf16.msra.mxu0 %v7415_v63 }
 0x2db   : > { %7167 = vmatprep.subr.bf16.mxu0 %v7416_v8 }
 0x2dc   : > { %7186 = vmatpush3.bf16.msra.mxu1 %v7421_v38 }
 0x2dd   : > { %7187 = vmatprep.subr.bf16.mxu1 %v7422_v27 }
 0x2de   : > { %7168 = vmatpush3.bf16.msra.mxu0 %v7416_v8 }
 0x2df   : > { %7201 = vmatprep.subr.bf16.mxu0 %v9635_v10 }
 0x2e0   : > { %7188 = vmatpush3.bf16.msra.mxu1 %v7422_v27 }
 0x2e1   : > { %7170 = vmatmul.mubr.bf16.vlgmr.msra.gmra.mxu0 %v4717_v9  ;;  %7189 = vmatprep.subr.bf16.mxu1 %v7423_v20 }
 0x2e2   : > { %7173 = vmatprep.mubr.bf16.mxu0 %v4725_v32  ;;  %7202 = vmatpush3.bf16.msra.mxu0 %v7425_v50 }
 0x2e3   : > { %7203 = vmatprep.subr.bf16.mxu0 %v9635_v10 }
 0x2e4   : > { %7190 = vmatpush3.bf16.msra.mxu1 %v7423_v20 }
 0x2e5   : > { %7191 = vmatprep.subr.bf16.mxu1 %v7424_v59 }
 0x2e6   : > { %7204 = vmatpush3.bf16.msra.mxu0 %v7426_v43 }
 0x2e7   : > { %7205 = vmatprep.subr.bf16.mxu0 %v9635_v10 }
 0x2e8   : > { %7192 = vmatpush3.bf16.msra.mxu1 %v7424_v59 }
 0x2e9   : > { %7174 = vmatmul.mubr.bf16.gmra.mxu0 %v4733_v26 }
 0x2ea   : > { %7206 = vmatpush3.bf16.msra.mxu0 %v7427_v14  ;;  %7217 = vmatprep.mubr.msk.bf16.mxu0 %vm7589_vm8, %v9635_v10 }
 0x2eb   : > { %7207 = vmatprep.subr.bf16.mxu0 %v9635_v10 }
 0x2ee   : > { %7208 = vmatpush3.bf16.msra.mxu0 %v7428_v45 }
 0x2ef   : > { %7209 = vmatprep.subr.bf16.mxu0 %v9635_v10 }
 0x2f2   : > { %7210 = vmatpush3.bf16.msra.mxu0 %v7429_v57 }
 0x2f3   : > { %7211 = vmatprep.subr.bf16.mxu0 %v9635_v10 }
 0x2f6   : > { %7212 = vmatpush3.bf16.msra.mxu0 %v7430_v56 }
 0x2f7   : > { %7213 = vmatprep.subr.bf16.mxu0 %v9635_v10 }
 0x2fa   : > { %7214 = vmatpush3.bf16.msra.mxu0 %v7431_v33 }
 0x2fb   : > { %7215 = vmatprep.subr.bf16.mxu0 %v9635_v10 }
 0x2fe   : > { %7216 = vmatpush3.bf16.msra.mxu0 %v7432_v28 }
 0x321   : > { %v8945_v44 = vpop.f32.mrf.mxu0 }
 0x323   : > { %v8950_v61 = vpop.f32.mrf.mxu0 }
 0x325   : > { %v8958_v35 = vpop.f32.mrf.mxu0 }
 0x327   : > { %v8968_v42 = vpop.f32.mrf.mxu0 }
 0x329   : > { %v8979_v1 = vpop.f32.mrf.mxu0 }
 0x32b   : > { %v8960_v31 = vpop.f32.mrf.mxu1  ;;  %v8987_v55 = vpop.f32.mrf.mxu0 }
 0x32c   : > { %v3416_v50 = vadd.f32 %v8960_v31, %v8945_v44 }
 0x32d   : > { %v8974_v15 = vpop.f32.mrf.mxu1  ;;  %v8992_v23 = vpop.f32.mrf.mxu0 }
 0x32e   : > { %v3408_v43 = vadd.f32 %v8974_v15, %v8950_v61 }
 0x32f   : > { %v8985_v24 = vpop.f32.mrf.mxu1  ;;  %v8996_v46 = vpop.f32.mrf.mxu0 }
 0x330   : > { %v3419_v57 = vadd.f32 %v8985_v24, %v8958_v35 }
 0x331   : > { %v8990_v51 = vpop.f32.mrf.mxu1 }
 0x332   : > { %v3411_v28 = vadd.f32 %v8990_v51, %v8968_v42 }
 0x333   : > { %v8994_v54 = vpop.f32.mrf.mxu1 }
 0x334   : > { %v3432_v44 = vadd.f32 %v8994_v54, %v8979_v1 }
 0x335   : > { %v8998_v39 = vpop.f32.mrf.mxu1 }
 0x336   : > { %v3424_v35 = vadd.f32 %v8998_v39, %v8987_v55 }
 0x337   : > { %v9007_v40 = vpop.f32.mrf.mxu1 }
 0x339   : > { %v9013_v19 = vpop.f32.mrf.mxu1 }
 0x341   : > { %v7027_v4 = vpop.f32.mrf.mxu0 }
 0x342   : > { %v3651_v59 = vadd.f32 %v7027_v4, %v3416_v50 }
 0x343   : > { %v3618_v2 = vpop.f32.mrf.mxu0 }
 0x344   : > { %v3649_v56 = vadd.f32 %v3618_v2, %v3408_v43 }
 0x345   : > { %v7028_v11 = vpop.f32.mrf.mxu0 }
 0x347   : > { %v3621_v18 = vpop.f32.mrf.mxu0 }
 0x348   : > { %v3650_v61 = vadd.f32 %v3621_v18, %v3411_v28 }
 0x349   : > { %v7031_v0 = vpop.f32.mrf.mxu0 }
 0x34a   : > { %v3655_v24 = vadd.f32 %v7031_v0, %v3432_v44 }
 0x34b   : > { %v7051_v41 = vpop.f32.mrf.mxu1  ;;  %v3634_v63 = vpop.f32.mrf.mxu0 }
 0x34c   : > { %v3871_v33 = vadd.f32 %v7051_v41, %v3651_v59 }
 0x34d   : > { %v3838_v21 = vpop.f32.mrf.mxu1  ;;  %v9024_v25 = vpop.f32.mrf.mxu0 }
 0x34f   : > { %v7052_v17 = vpop.f32.mrf.mxu1  ;;  %v9026_v60 = vpop.f32.mrf.mxu0 }
 0x351   : > { %v3841_v62 = vpop.f32.mrf.mxu1 }
 0x352   : > { %v3870_v2 = vadd.f32 %v3841_v62, %v3650_v61 }
 0x353   : > { %v7055_v52 = vpop.f32.mrf.mxu1 }
 0x355   : > { %v3854_v48 = vpop.f32.mrf.mxu1 }
 0x357   : > { %v9028_v47 = vpop.f32.mrf.mxu1 }
 0x359   : > { %v9030_v6 = vpop.f32.mrf.mxu1 }
 0x361   : > { %v7075_v8 = vpop.f32.mrf.mxu0 }
 0x363   : > { %v4000_v16 = vpop.f32.mrf.mxu0 }
 0x365   : > { %v7076_v5 = vpop.f32.mrf.mxu0 }
 0x367   : > { %v4003_v7 = vpop.f32.mrf.mxu0 }
 0x368   : > { %v4032_v54 = vadd.f32 %v4003_v7, %v3870_v2 }
 0x369   : > { %v7079_v37 = vpop.f32.mrf.mxu0 }
 0x36b   : > { %v7099_v30 = vpop.f32.mrf.mxu1  ;;  %v4016_v10 = vpop.f32.mrf.mxu0 }
 0x36d   : > { %v4219_v49 = vpop.f32.mrf.mxu1  ;;  %v9032_v53 = vpop.f32.mrf.mxu0 }
 0x36f   : > { %v7100_v3 = vpop.f32.mrf.mxu1  ;;  %v9034_v29 = vpop.f32.mrf.mxu0 }
 0x370   : > { %9636 = vst [vmem:[#allocation31_spill] sm:$0xff] %v9034_v29  ;;  %v4033_v29 = vadd.f32 %v7075_v8, %v3871_v33  ;;  %v3875_v8 = vadd.f32 %v7055_v52, %v3655_v24 }
 0x371   : > { %v4222_v9 = vpop.f32.mrf.mxu1 }
 0x372   : > { %v4252_v50 = vadd.f32 %v7099_v30, %v4033_v29  ;;  %v3427_v30 = vadd.f32 %v9013_v19, %v8996_v46  ;;  %v4037_v0 = vadd.f32 %v7079_v37, %v3875_v8  ;;  %v6386_v46 = vld [vmem:[%s9509_s8] ss:$0 sm:$0xff] }
 0x373   : > { %v7103_v32 = vpop.f32.mrf.mxu1 }
 0x374   : > { %v4256_v7 = vadd.f32 %v7103_v32, %v4037_v0 }
 0x375   : > { %v9036_v34 = vpop.f32.mrf.mxu1 }
 0x376   : > { %9637 = vst [vmem:[#allocation32_spill] sm:$0xff] %v9036_v34 }
 0x377   : > { %v9038_v22 = vpop.f32.mrf.mxu1 }
 0x378   : > { %9638 = vst [vmem:[#allocation3_spill] sm:$0xff] %v9038_v22  ;;  %v3869_v22 = vadd.f32 %v3838_v21, %v3649_v56  ;;  %v3653_v21 = vadd.f32 %v3634_v63, %v3424_v35 }
 0x379   : > { %v9040_v58 = vpop.f32.mrf.mxu1 }
 0x37a   : > { %9639 = vst [vmem:[#allocation33_spill] sm:$0xff] %v9040_v58  ;;  %v3652_v58 = vadd.f32 %v7028_v11, %v3419_v57  ;;  %v4031_v4 = vadd.f32 %v4000_v16, %v3869_v22  ;;  %v3435_v11 = vadd.f32 %v9007_v40, %v8992_v23  ;;  %v3873_v39 = vadd.f32 %v3854_v48, %v3653_v21 }
 0x37b   : > { %v3654_v40 = vadd.f32 %v9026_v60, %v3427_v30 }
 0x37c   : > { %v3872_v15 = vadd.f32 %v7052_v17, %v3652_v58  ;;  %v4250_v43 = vadd.f32 %v4219_v49, %v4031_v4  ;;  %v3656_v55 = vadd.f32 %v9024_v25, %v3435_v11  ;;  %v4035_v52 = vadd.f32 %v4016_v10, %v3873_v39  ;;  %v9644_v11 = vld [vmem:[#allocation11_spill] sm:$0xff] }
 0x37e   : > { %v4034_v41 = vadd.f32 %v7076_v5, %v3872_v15  ;;  %v4251_v5 = vadd.f32 %v4222_v9, %v4032_v54  ;;  %v3876_v63 = vadd.f32 %v9028_v47, %v3656_v55 }
 0x37f   : > { %v9642_v57 = vld [vmem:[#allocation3_spill] sm:$0xff] }
 0x380   : > { %v4253_v18 = vadd.f32 %v7100_v3, %v4034_v41  ;;  %v3874_v3 = vadd.f32 %v9030_v6, %v3654_v40  ;;  %v4038_v9 = vadd.f32 %v9032_v53, %v3876_v63  ;;  %v6387_v6 = vld [vmem:[%s9510_s9] ss:$0 sm:$0xff] }
 0x381   : > { %v7123_v12 = vpop.f32.mrf.mxu0 }
 0x382   : > { %v4472_v42 = vadd.f32 %v7123_v12, %v4252_v50  ;;  %v4257_v56 = vadd.f32 %v9642_v57, %v4038_v9 }
 0x383   : > { %v4439_v26 = vpop.f32.mrf.mxu0 }
 0x384   : > { %v4470_v17 = vadd.f32 %v4439_v26, %v4250_v43  ;;  %v9640_v26 = vld [vmem:[#allocation32_spill] sm:$0xff] }
 0x385   : > { %v7124_v13 = vpop.f32.mrf.mxu0  ;;  %v4254_v22 = vadd.f32 %v9640_v26, %v4035_v52 }
 0x386   : > { %v4473_v49 = vadd.f32 %v7124_v13, %v4253_v18 }
 0x387   : > { %v4442_v38 = vpop.f32.mrf.mxu0 }
 0x388   : > { %v4471_v25 = vadd.f32 %v4442_v38, %v4251_v5  ;;  %v9647_v5 = vld [vmem:[#allocation14_spill] sm:$0xff] }
 0x389   : > { %v7127_v20 = vpop.f32.mrf.mxu0 }
 0x38a   : > { %v4476_v13 = vadd.f32 %v7127_v20, %v4256_v7  ;;  %v9643_v20 = vld [vmem:[#allocation33_spill] sm:$0xff] }
 0x38b   : > { %v7147_v36 = vpop.f32.mrf.mxu1  ;;  %v4455_v45 = vpop.f32.mrf.mxu0 }
 0x38c   : > { %v4634_v16 = vadd.f32 %v7147_v36, %v4472_v42  ;;  %v4474_v38 = vadd.f32 %v4455_v45, %v4254_v22 }
 0x38d   : > { %v4601_v27 = vpop.f32.mrf.mxu1  ;;  %v7128_v31 = vpop.f32.mrf.mxu0 }
 0x38e   : > { %v4632_v29 = vadd.f32 %v4601_v27, %v4470_v17  ;;  %v9641_v27 = vld [vmem:[#allocation31_spill] sm:$0xff]  ;;  %v9645_v17 = vld [vmem:[#allocation13_spill] sm:$0xff] }
 0x38f   : > { %v7148_v14 = vpop.f32.mrf.mxu1  ;;  %v4458_v1 = vpop.f32.mrf.mxu0  ;;  %v4036_v59 = vadd.f32 %v9641_v27, %v3874_v3  ;;  %v9648_v3 = vld [vmem:[#allocation18_spill] sm:$0xff] }
 0x390   : > { %v4635_v48 = vadd.f32 %v7148_v14, %v4473_v49 }
 0x391   : > { %v4604_v34 = vpop.f32.mrf.mxu1  ;;  %v4255_v44 = vadd.f32 %v9643_v20, %v4036_v59 }
 0x392   : > { %v4633_v58 = vadd.f32 %v4604_v34, %v4471_v25  ;;  %v4477_v34 = vadd.f32 %v7128_v31, %v4257_v56  ;;  %v9646_v31 = vld [vmem:[#allocation10_spill] sm:$0xff] }
 0x393   : > { %v7151_v51 = vpop.f32.mrf.mxu1  ;;  %v4475_v45 = vadd.f32 %v4458_v1, %v4255_v44 }
 0x394   : > { %v4638_v53 = vadd.f32 %v7151_v51, %v4476_v13  ;;  %v9649_v13 = vld [vmem:[#allocation19_spill] sm:$0xff] }
 0x395   : > { %v4617_v12 = vpop.f32.mrf.mxu1 }
 0x396   : > { %v4636_v61 = vadd.f32 %v4617_v12, %v4474_v38 }
 0x397   : > { %v7152_v47 = vpop.f32.mrf.mxu1 }
 0x398   : > { %v4639_v42 = vadd.f32 %v7152_v47, %v4477_v34  ;;  %v9650_v47 = vld [vmem:[#allocation20_spill] sm:$0xff] }
 0x399   : > { %v4620_v50 = vpop.f32.mrf.mxu1 }
 0x39a   : > { %v4637_v54 = vadd.f32 %v4620_v50, %v4475_v45 }
 0x3a1   : > { %v7171_v62 = vpop.f32.mrf.mxu0 }
 0x3a2   : > { %v4853_v23 = vadd.f32 %v7171_v62, %v4634_v16 }
 0x3a3   : > { %v4820_v19 = vpop.f32.mrf.mxu0 }
 0x3a4   : > { %v4851_v37 = vadd.f32 %v4820_v19, %v4632_v29  ;;  %v4867_v10 = vmul.f32 %v6386_v46, %v4853_v23 }
 0x3a5   : > { %v7172_v60 = vpop.f32.mrf.mxu0 }
 0x3a6   : > { %v4865_v32 = vmul.f32 %v6386_v46, %v4851_v37  ;;  %v4854_v36 = vadd.f32 %v7172_v60, %v4635_v48  ;;  %v4881_v35 = vadd.f32 %v6387_v6, %v4867_v10 }
 0x3a7   : > { %v4823_v14 = vpop.f32.mrf.mxu0 }
 0x3a8   : > { %v4868_v33 = vmul.f32 %v6386_v46, %v4854_v36  ;;  %v4852_v28 = vadd.f32 %v4823_v14, %v4633_v58  ;;  %v4879_v15 = vadd.f32 %v6387_v6, %v4865_v32  ;;  %v4889_v30 = vadd.f32 %v4881_v35, %v9646_v31  ;;  %v9651_v32 = vld [vmem:[#allocation15_spill] sm:$0xff] }
 0x3a9   : > { %v7175_v4 = vpop.f32.mrf.mxu0 }
 0x3aa   : > { %v4882_v24 = vadd.f32 %v6387_v6, %v4868_v33  ;;  %v4866_v2 = vmul.f32 %v6386_v46, %v4852_v28  ;;  %v4857_v41 = vadd.f32 %v7175_v4, %v4638_v53  ;;  %v4887_v16 = vadd.f32 %v4879_v15, %v9645_v17 }
 0x3ab   : > { %v4836_v43 = vpop.f32.mrf.mxu0  ;;  %v4897_v52 = vmax.f32 %v4889_v30, 0.0 }
 0x3ac   : > { %v4890_v21 = vadd.f32 %v4882_v24, %v9644_v11  ;;  %v4880_v8 = vadd.f32 %v6387_v6, %v4866_v2  ;;  %v4855_v51 = vadd.f32 %v4836_v43, %v4636_v61  ;;  %v4871_v55 = vmul.f32 %v6386_v46, %v4857_v41  ;;  %v9084_v24 = vld [vmem:[%s9512_s11] ss:$0 sm:$0xff] }
 0x3ad   : > { %v7176_v18 = vpop.f32.mrf.mxu0  ;;  %v4895_v40 = vmax.f32 %v4887_v16, 0.0 }
 0x3ae   : > { %v4869_v39 = vmul.f32 %v6386_v46, %v4855_v51  ;;  %v4858_v0 = vadd.f32 %v7176_v18, %v4639_v42  ;;  %v4888_v49 = vadd.f32 %v4880_v8, %v9647_v5  ;;  %v4898_v29 = vmax.f32 %v4890_v21, 0.0 }
 0x3af   : > { %v4839_v62 = vpop.f32.mrf.mxu0  ;;  %v4885_v7 = vadd.f32 %v6387_v6, %v4871_v55 }
 0x3b0   : > { %v4883_v1 = vadd.f32 %v6387_v6, %v4869_v39  ;;  %v4872_v12 = vmul.f32 %v6386_v46, %v4858_v0  ;;  %v4856_v23 = vadd.f32 %v4839_v62, %v4637_v54  ;;  %v4896_v63 = vmax.f32 %v4888_v49, 0.0 }
 0x3b1   : > { %v4904_v26 = vpack.c.bf16 %v4898_v29, %v4897_v52  ;;  %v4893_v36 = vadd.f32 %v4885_v7, %v9651_v32 }
 0x3b2   : > { %v4886_v19 = vadd.f32 %v6387_v6, %v4872_v12  ;;  %v4870_v25 = vmul.f32 %v6386_v46, %v4856_v23  ;;  %v4903_v48 = vpack.c.bf16 %v4896_v63, %v4895_v40  ;;  %v5043_v37 = vadd.f32 %v4896_v63, %v4895_v40 }
 0x3b3   : > { %v4891_v9 = vadd.f32 %v4883_v1, %v9648_v3  ;;  %v4901_v14 = vmax.f32 %v4893_v36, 0.0 }
 0x3b4   : > { %v4884_v22 = vadd.f32 %v6387_v6, %v4870_v25  ;;  %v4894_v60 = vadd.f32 %v4886_v19, %v9649_v13  ;;  %7193 = vmatprep.mubr.bf16.mxu1 %v4903_v48  ;;  %v5044_v58 = vadd.f32 %v5043_v37, %v4897_v52 }
 0x3b5   : > { %7194 = vmatmul.mubr.bf16.vlgmr.msra.gmra.mxu1 %v4904_v26  ;;  %v4899_v27 = vmax.f32 %v4891_v9, 0.0 }
 0x3b6   : > { %v4892_v10 = vadd.f32 %v4884_v22, %v9650_v47  ;;  %v5045_v59 = vadd.f32 %v5044_v58, %v4898_v29  ;;  %v4902_v56 = vmax.f32 %v4894_v60, 0.0 }
 0x3b8   : > { %v4900_v57 = vmax.f32 %v4892_v10, 0.0  ;;  %v5046_v46 = vadd.f32 %v5045_v59, %v4899_v27  ;;  %v4906_v33 = vpack.c.bf16 %v4902_v56, %v4901_v14 }
 0x3ba   : > { %v4905_v38 = vpack.c.bf16 %v4900_v57, %v4899_v27  ;;  %v5047_v53 = vadd.f32 %v5046_v46, %v4900_v57  ;;  %v5075_v46 = vld [vmem:[%s9514_s13] sm:$0x1] }
 0x3bc   : > { %7197 = vmatprep.mubr.bf16.mxu1 %v4905_v38  ;;  %v5048_v6 = vadd.f32 %v5047_v53, %v4901_v14 }
 0x3bd   : > { %7198 = vmatmul.mubr.bf16.gmra.mxu1 %v4906_v33 }
 0x3be   : > { %v5049_v28 = vadd.f32 %v5048_v6, %v4902_v56 }
 0x3c0   : > { %v5050_v20 = vrot.slane %v5049_v28, 4 }
 0x3c2   : > { %v5051_v44 = vadd.f32 %v5050_v20, %v5049_v28 }
 0x3c4   : > { %v5052_v34 = vrot.slane %v5051_v44, 2 }
 0x3c6   : > { %v5053_v61 = vadd.f32 %v5052_v34, %v5051_v44 }
 0x3c8   : > { %v5054_v15 = vrot.slane %v5053_v61, 1 }
 0x3ca   : > { %v5055_v4 = vadd.f32 %v5054_v15, %v5053_v61 }
 0x3cc   : > { %v5057_v50 = vmul.f32 0.015625, %v5055_v4 }
 0x3ce   : > { %v5058_v35 = vpack.c.bf16 %v5057_v50, %v5057_v50 }
 0x3d0   : > { %7218 = vmatmul.mubr.bf16.vlgmr.msra.gmra.mxu0 %v5058_v35 }
 0x475   : > { %v7195_v2 = vpop.f32.mrf.mxu1 }
 0x476   : > { %v9087_v41 = vadd.f32 %v7195_v2, %v9084_v24 }
 0x477   : > { %v5012_v45 = vpop.f32.mrf.mxu1 }
 0x478   : > { %v5294_v43 = vsel %vm5287_vm9, %v9087_v41, -inf  ;;  %v5171_v42 = vsel %vm5164_vm10, %v9087_v41, -inf  ;;  %v9094_v21 = vadd.f32 %v9084_v24, %v5012_v45  ;;  %v5453_v51 = vsel %vm5446_vm11, %v9087_v41, -inf }
 0x479   : > { %5295 = vmax.xlane.f32.xlu0 %v5294_v43  ;;  %5172 = vmax.xlane.f32.xlu1 %v5171_v42  ;;  %v7196_v11 = vpop.f32.mrf.mxu1  ;;  %v5612_v54 = vsel %vm5605_vm12, %v9087_v41, -inf }
 0x47a   : > { %v9097_v8 = vadd.f32 %v7196_v11, %v9084_v24  ;;  %v5165_v17 = vsel %vm5164_vm10, %v9094_v21, -inf  ;;  %v5288_v31 = vsel %vm5287_vm9, %v9094_v21, -inf  ;;  %v5447_v0 = vsel %vm5446_vm11, %v9094_v21, -inf }
 0x47b   : > { %v5015_v30 = vpop.f32.mrf.mxu1  ;;  %v5606_v5 = vsel %vm5605_vm12, %v9094_v21, -inf }
 0x47c   : > { %v5174_v18 = vsel %vm5164_vm10, %v9097_v8, -inf  ;;  %v5297_v16 = vsel %vm5287_vm9, %v9097_v8, -inf  ;;  %v9112_v55 = vadd.f32 %v9084_v24, %v5015_v30  ;;  %v5615_v39 = vsel %vm5605_vm12, %v9097_v8, -inf }
 0x47d   : > { %5454 = vmax.xlane.f32.xlu0 %v5453_v51  ;;  %5613 = vmax.xlane.f32.xlu1 %v5612_v54  ;;  %v7199_v49 = vpop.f32.mrf.mxu1  ;;  %v5456_v23 = vsel %vm5446_vm11, %v9097_v8, -inf }
 0x47e   : > { %v5291_v62 = vsel %vm5287_vm9, %v9112_v55, -inf  ;;  %v9123_v29 = vadd.f32 %v7199_v49, %v9084_v24  ;;  %v5450_v12 = vsel %vm5446_vm11, %v9112_v55, -inf  ;;  %v5168_v19 = vsel %vm5164_vm10, %v9112_v55, -inf }
 0x47f   : > { %v5028_v40 = vpop.f32.mrf.mxu1  ;;  %v5609_v9 = vsel %vm5605_vm12, %v9112_v55, -inf }
 0x480   : > { %v9130_v52 = vadd.f32 %v9084_v24, %v5028_v40  ;;  %v5624_v25 = vsel %vm5605_vm12, %v9123_v29, -inf  ;;  %v5183_v22 = vsel %vm5164_vm10, %v9123_v29, -inf  ;;  %v5306_v60 = vsel %vm5287_vm9, %v9123_v29, -inf }
 0x481   : > { %5175 = vmax.xlane.f32.xlu1 %v5174_v18  ;;  %5166 = vmax.xlane.f32.xlu0 %v5165_v17  ;;  %v7200_v48 = vpop.f32.mrf.mxu1  ;;  %v5465_v32 = vsel %vm5446_vm11, %v9123_v29, -inf }
 0x482   : > { %v9137_v3 = vadd.f32 %v7200_v48, %v9084_v24  ;;  %v5618_v26 = vsel %vm5605_vm12, %v9130_v52, -inf  ;;  %v5177_v59 = vsel %vm5164_vm10, %v9130_v52, -inf  ;;  %v5300_v56 = vsel %vm5287_vm9, %v9130_v52, -inf }
 0x483   : > { %v5031_v47 = vpop.f32.mrf.mxu1  ;;  %v5459_v53 = vsel %vm5446_vm11, %v9130_v52, -inf }
 0x484   : > { %v5186_v13 = vsel %vm5164_vm10, %v9137_v3, -inf  ;;  %v5309_v58 = vsel %vm5287_vm9, %v9137_v3, -inf  ;;  %v9152_v10 = vadd.f32 %v9084_v24, %v5031_v47  ;;  %v5627_v36 = vsel %vm5605_vm12, %v9137_v3, -inf }
 0x485   : > { %5298 = vmax.xlane.f32.xlu1 %v5297_v16  ;;  %5289 = vmax.xlane.f32.xlu0 %v5288_v31  ;;  %v5468_v6 = vsel %vm5446_vm11, %v9137_v3, -inf }
 0x486   : > { %v5180_v27 = vsel %vm5164_vm10, %v9152_v10, -inf  ;;  %v5303_v57 = vsel %vm5287_vm9, %v9152_v10, -inf  ;;  %v5621_v14 = vsel %vm5605_vm12, %v9152_v10, -inf  ;;  %v5462_v28 = vsel %vm5446_vm11, %v9152_v10, -inf }
 0x489   : > { %5616 = vmax.xlane.f32.xlu1 %v5615_v39  ;;  %5448 = vmax.xlane.f32.xlu0 %v5447_v0 }
 0x48d   : > { %5292 = vmax.xlane.f32.xlu1 %v5291_v62  ;;  %5607 = vmax.xlane.f32.xlu0 %v5606_v5 }
 0x490   : > { %v5158_v1 = vpop.f32.mrf.mxu0 }
 0x491   : > { %5451 = vmax.xlane.f32.xlu1 %v5450_v12  ;;  %5457 = vmax.xlane.f32.xlu0 %v5456_v23  ;;  %v9169_v38 = vadd.f32 %v5158_v1, %v5075_v46 }
 0x492   : > { %v7219_v63 = vpop.f32.mrf.mxu0 }
 0x493   : > { %v5590_v33 = vsel %vm5589_vm13, %v9169_v38, -inf  ;;  %v5276_v20 = vsel %vm5275_vm14, %v9169_v38, -inf  ;;  %v5431_v44 = vsel %vm5430_vm15, %v9169_v38, -inf  ;;  %v5749_v34 = vsel %vm5748_vm0, %v9169_v38, -inf }
 0x494   : > { %v5161_v7 = vpop.f32.mrf.mxu0 }
 0x495   : > { %5169 = vmax.xlane.f32.xlu0 %v5168_v19  ;;  %5625 = vmax.xlane.f32.xlu1 %v5624_v25 }
 0x496   : > { %v7220_v37 = vpop.f32.mrf.mxu0 }
 0x499   : > { %5610 = vmax.xlane.f32.xlu0 %v5609_v9  ;;  %5619 = vmax.xlane.f32.xlu1 %v5618_v26 }
 0x49d   : > { %5184 = vmax.xlane.f32.xlu0 %v5183_v22  ;;  %5187 = vmax.xlane.f32.xlu1 %v5186_v13 }
 0x4a1   : > { %5307 = vmax.xlane.f32.xlu0 %v5306_v60  ;;  %5310 = vmax.xlane.f32.xlu1 %v5309_v58 }
 0x4a5   : > { %5466 = vmax.xlane.f32.xlu0 %v5465_v32  ;;  %5628 = vmax.xlane.f32.xlu1 %v5627_v36 }
 0x4a9   : > { %5181 = vmax.xlane.f32.xlu1 %v5180_v27  ;;  %5178 = vmax.xlane.f32.xlu0 %v5177_v59 }
 0x4ad   : > { %5304 = vmax.xlane.f32.xlu1 %v5303_v57  ;;  %5301 = vmax.xlane.f32.xlu0 %v5300_v56 }
 0x4b1   : > { %5622 = vmax.xlane.f32.xlu1 %v5621_v14  ;;  %5460 = vmax.xlane.f32.xlu0 %v5459_v53 }
 0x4b5   : > { %5591 = vmax.xlane.f32.xlu1 %v5590_v33  ;;  %5469 = vmax.xlane.f32.xlu0 %v5468_v6 }
 0x4b9   : > { %5463 = vmax.xlane.f32.xlu0 %v5462_v28 }
 0x4bd   : > { %5277 = vmax.xlane.f32.xlu0 %v5276_v20 }
 0x4c1   : > { %5432 = vmax.xlane.f32.xlu0 %v5431_v44 }
 0x4c5   : > { %5750 = vmax.xlane.f32.xlu0 %v5749_v34 }
 0x502   : > { %v5296_v61 = vpop.xlane.xlu0 %5295  ;;  %v5173_v15 = vpop.xlane.xlu1 %5172 }
 0x503   : > { %v5314_v4 = vsub.f32 %v9087_v41, %v5296_v61  ;;  %v5191_v63 = vsub.f32 %v9087_v41, %v5173_v15 }
 0x505   : > { %v5324_v50 = vmul.f32 1.442695, %v5314_v4  ;;  %v5201_v19 = vmul.f32 1.442695, %v5191_v63 }
 0x506   : > { %v5455_v35 = vpop.xlane.xlu0 %5454  ;;  %v5614_v24 = vpop.xlane.xlu1 %5613 }
 0x507   : > { %7433 = vpow2.f32 %v5324_v50  ;;  %v5473_v2 = vsub.f32 %v9087_v41, %v5455_v35  ;;  %v5632_v45 = vsub.f32 %v9087_v41, %v5614_v24 }
 0x509   : > { %v5483_v43 = vmul.f32 1.442695, %v5473_v2  ;;  %v5642_v42 = vmul.f32 1.442695, %v5632_v45 }
 0x50a   : > { %v9187_v11 = vpop.xlane.xlu0 %5166  ;;  %v5176_v54 = vpop.xlane.xlu1 %5175 }
 0x50b   : > { %7435 = vpow2.f32 %v5483_v43  ;;  %v5192_v13 = vsub.f32 %v9097_v8, %v5176_v54  ;;  %v5189_v46 = vsub.f32 %v9094_v21, %v9187_v11 }
 0x50c   : > { %7437 = vpow2.f32 %v5642_v42 }
 0x50d   : > { %v5203_v58 = vmul.f32 1.442695, %v5192_v13  ;;  %v5197_v6 = vmul.f32 1.442695, %v5189_v46 }
 0x50e   : > { %v5290_v51 = vpop.xlane.xlu0 %5289  ;;  %v5299_v31 = vpop.xlane.xlu1 %5298 }
 0x50f   : > { %v5315_v5 = vsub.f32 %v9097_v8, %v5299_v31  ;;  %v5312_v22 = vsub.f32 %v9094_v21, %v5290_v51 }
 0x511   : > { %v5326_v23 = vmul.f32 1.442695, %v5315_v5  ;;  %v5320_v60 = vmul.f32 1.442695, %v5312_v22 }
 0x512   : > { %v5449_v18 = vpop.xlane.xlu0 %5448  ;;  %v5617_v47 = vpop.xlane.xlu1 %5616 }
 0x513   : > { %v5471_v17 = vsub.f32 %v9094_v21, %v5449_v18  ;;  %v5633_v15 = vsub.f32 %v9097_v8, %v5617_v47 }
 0x514   : > { %v9190_v16 = vpop.eup %7433 }
 0x515   : > { %v5479_v30 = vmul.f32 1.442695, %v5471_v17  ;;  %5348 = vrot.lane.b32.xlu1 %v9190_v16, %s7590_s26  ;;  %v5644_v50 = vmul.f32 1.442695, %v5633_v15 }
 0x516   : > { %v5608_v39 = vpop.xlane.xlu0 %5607  ;;  %v5293_v27 = vpop.xlane.xlu1 %5292 }
 0x517   : > { %v5630_v0 = vsub.f32 %v9094_v21, %v5608_v39  ;;  %7439 = vpow2.f32 %v5479_v30  ;;  %v5313_v59 = vsub.f32 %v9112_v55, %v5293_v27 }
 0x518   : > { %v9195_v62 = vpop.eup %7435 }
 0x519   : > { %v9198_v49 = vpop.eup %7437  ;;  %v5638_v1 = vmul.f32 1.442695, %v5630_v0  ;;  %5507 = vrot.lane.b32.xlu1 %v9195_v62, %s7591_s29  ;;  %v5322_v14 = vmul.f32 1.442695, %v5313_v59 }
 0x51a   : > { %5666 = vrot.lane.b32.xlu0 %v9198_v49, %s7592_s27  ;;  %v5458_v12 = vpop.xlane.xlu0 %5457  ;;  %v5452_v34 = vpop.xlane.xlu1 %5451 }
 0x51b   : > { %7441 = vpow2.f32 %v5638_v1  ;;  %v5474_v40 = vsub.f32 %v9097_v8, %v5458_v12  ;;  %v5472_v35 = vsub.f32 %v9112_v55, %v5452_v34 }
 0x51c   : > { %7443 = vpow2.f32 %v5326_v23 }
 0x51d   : > { %v5485_v7 = vmul.f32 1.442695, %v5474_v40  ;;  %v5481_v43 = vmul.f32 1.442695, %v5472_v35 }
 0x51e   : > { %v5170_v32 = vpop.xlane.xlu0 %5169  ;;  %v5626_v24 = vpop.xlane.xlu1 %5625 }
 0x51f   : > { %7445 = vpow2.f32 %v5485_v7  ;;  %v5190_v2 = vsub.f32 %v9112_v55, %v5170_v32  ;;  %v5636_v42 = vsub.f32 %v9123_v29, %v5626_v24 }
 0x520   : > { %7447 = vpow2.f32 %v5201_v19 }
 0x521   : > { %7449 = vpow2.f32 %v5320_v60  ;;  %v5199_v11 = vmul.f32 1.442695, %v5190_v2  ;;  %v5650_v51 = vmul.f32 1.442695, %v5636_v42 }
 0x522   : > { %7451 = vpow2.f32 %v5203_v58  ;;  %v5611_v56 = vpop.xlane.xlu0 %5610  ;;  %v5620_v32 = vpop.xlane.xlu1 %5619 }
 0x523   : > { %v5631_v53 = vsub.f32 %v9112_v55, %v5611_v56  ;;  %7453 = vpow2.f32 %v5322_v14  ;;  %v5634_v46 = vsub.f32 %v9130_v52, %v5620_v32 }
 0x524   : > { %v9206_v25 = vpop.eup %7439  ;;  %7455 = vpow2.f32 %v5197_v6 }
 0x525   : > { %5503 = vrot.lane.b32.xlu1 %v9206_v25, %s7591_s29  ;;  %v5640_v28 = vmul.f32 1.442695, %v5631_v53 }
 0x526   : > { %v5185_v4 = vpop.xlane.xlu0 %5184  ;;  %v5188_v53 = vpop.xlane.xlu1 %5187 }
 0x527   : > { %7457 = vpow2.f32 %v5640_v28  ;;  %v5195_v23 = vsub.f32 %v9123_v29, %v5185_v4  ;;  %v5196_v28 = vsub.f32 %v9137_v3, %v5188_v53 }
 0x528   : > { %v9210_v48 = vpop.eup %7441  ;;  %7459 = vpow2.f32 %v5644_v50 }
 0x529   : > { %5662 = vrot.lane.b32.xlu1 %v9210_v48, %s7592_s27  ;;  %v9214_v37 = vpop.eup %7443  ;;  %7461 = vpow2.f32 %v5481_v43  ;;  %v5209_v19 = vmul.f32 1.442695, %v5195_v23  ;;  %v5211_v34 = vmul.f32 1.442695, %v5196_v28 }
 0x52a   : > { %v5308_v45 = vpop.xlane.xlu0 %5307  ;;  %7463 = vpow2.f32 %v5199_v11  ;;  %v5311_v6 = vpop.xlane.xlu1 %5310 }
 0x52b   : > { %7465 = vpow2.f32 %v5650_v51  ;;  %v5318_v30 = vsub.f32 %v9123_v29, %v5308_v45 }
 0x52c   : > { %v9218_v41 = vpop.eup %7445 }
 0x52d   : > { %5350 = vrot.lane.b32.xlu1 %v9214_v37, %s7590_s26  ;;  %v9222_v9 = vpop.eup %7447  ;;  %v5332_v5 = vmul.f32 1.442695, %v5318_v30 }
 0x52e   : > { %v5219_v26 = vsel %vm5164_vm10, %v9222_v9, 0.0  ;;  %v9228_v36 = vpop.eup %7449  ;;  %v5467_v54 = vpop.xlane.xlu0 %5466 }
 0x52f   : > { %v9233_v57 = vpop.eup %7451  ;;  %v5477_v1 = vsub.f32 %v9123_v29, %v5467_v54  ;;  %7467 = vpow2.f32 %v5332_v5 }
 0x530   : > { %v5222_v33 = vsel %vm5164_vm10, %v9233_v57, 0.0  ;;  %v9240_v20 = vpop.eup %7453 }
 0x531   : > { %5509 = vrot.lane.b32.xlu1 %v9218_v41, %s7591_s29  ;;  %v9244_v44 = vpop.eup %7455  ;;  %v5491_v40 = vmul.f32 1.442695, %v5477_v1  ;;  %v5319_v1 = vsub.f32 %v9137_v3, %v5311_v6 }
 0x532   : > { %v5213_v61 = vsel %vm5164_vm10, %v9244_v44, 0.0  ;;  %v5179_v8 = vpop.xlane.xlu0 %5178 }
 0x533   : > { %7469 = vpow2.f32 %v5491_v40  ;;  %v5193_v24 = vsub.f32 %v9130_v52, %v5179_v8  ;;  %v5334_v23 = vmul.f32 1.442695, %v5319_v1 }
 0x534   : > { %v9246_v21 = vpop.eup %7457  ;;  %7471 = vpow2.f32 %v5209_v19 }
 0x535   : > { %v9256_v18 = vpop.eup %7459  ;;  %v5205_v42 = vmul.f32 1.442695, %v5193_v24 }
 0x536   : > { %v9260_v17 = vpop.eup %7461  ;;  %v5302_v55 = vpop.xlane.xlu0 %5301 }
 0x537   : > { %v9264_v31 = vpop.eup %7463  ;;  %v5316_v56 = vsub.f32 %v9130_v52, %v5302_v55 }
 0x538   : > { %v9267_v39 = vpop.eup %7465  ;;  %v5216_v12 = vsel %vm5164_vm10, %v9264_v31, 0.0 }
 0x539   : > { %5220 = vadd.xlane.f32.xlu0 %v5219_v26  ;;  %v5328_v14 = vmul.f32 1.442695, %v5316_v56 }
 0x53a   : > { %v5461_v0 = vpop.xlane.xlu0 %5460 }
 0x53b   : > { %v5475_v63 = vsub.f32 %v9130_v52, %v5461_v0 }
 0x53c   : > { %v9277_v60 = vpop.eup %7467 }
 0x53d   : > { %v5487_v26 = vmul.f32 1.442695, %v5475_v63 }
 0x53e   : > { %v5470_v7 = vpop.xlane.xlu0 %5469 }
 0x53f   : > { %v5478_v22 = vsub.f32 %v9137_v3, %v5470_v7  ;;  %7473 = vpow2.f32 %v5487_v26 }
 0x540   : > { %v9281_v29 = vpop.eup %7469 }
 0x541   : > { %v5493_v13 = vmul.f32 1.442695, %v5478_v22  ;;  %v9285_v58 = vpop.eup %7471 }
 0x542   : > { %v5231_v27 = vsel %vm5164_vm10, %v9285_v58, 0.0  ;;  %v5464_v43 = vpop.xlane.xlu0 %5463 }
 0x543   : > { %7475 = vpow2.f32 %v5493_v13  ;;  %v5476_v51 = vsub.f32 %v9152_v10, %v5464_v43 }
 0x544   : > { %7477 = vpow2.f32 %v5328_v14 }
 0x545   : > { %v5489_v55 = vmul.f32 1.442695, %v5476_v51 }
 0x54c   : > { %v9287_v47 = vpop.eup %7473 }
 0x54f   : > { %5344 = vrot.lane.b32.xlu0 %v9228_v36, %s7590_s26 }
 0x550   : > { %v9293_v59 = vpop.eup %7475 }
 0x551   : > { %v9300_v15 = vpop.eup %7477 }
 0x555   : > { %5223 = vadd.xlane.f32.xlu1 %v5222_v33  ;;  %v5646_v33 = vmul.f32 1.442695, %v5634_v46 }
 0x557   : > { %7479 = vpow2.f32 %v5646_v33 }
 0x558   : > { %7481 = vpow2.f32 %v5211_v34 }
 0x559   : > { %7483 = vpow2.f32 %v5205_v42 }
 0x564   : > { %v9304_v50 = vpop.eup %7479 }
 0x565   : > { %v9310_v45 = vpop.eup %7481 }
 0x566   : > { %5346 = vrot.lane.b32.xlu1 %v9240_v20, %s7590_s26  ;;  %v5234_v54 = vsel %vm5164_vm10, %v9310_v45, 0.0  ;;  %v9315_v0 = vpop.eup %7483 }
 0x567   : > { %v5225_v8 = vsel %vm5164_vm10, %v9315_v0, 0.0 }
 0x56a   : > { %5664 = vrot.lane.b32.xlu1 %v9246_v21, %s7592_s27 }
 0x56e   : > { %5214 = vadd.xlane.f32.xlu0 %v5213_v61  ;;  %v5629_v61 = vpop.xlane.xlu1 %5628 }
 0x56f   : > { %v5637_v40 = vsub.f32 %v9137_v3, %v5629_v61  ;;  %v5278_v3 = vpop.xlane.xlu0 %5277 }
 0x571   : > { %v5652_v7 = vmul.f32 1.442695, %v5637_v40 }
 0x572   : > { %v5182_v4 = vpop.xlane.xlu1 %5181 }
 0x573   : > { %v5194_v22 = vsub.f32 %v9152_v10, %v5182_v4  ;;  %v5433_v33 = vpop.xlane.xlu0 %5432 }
 0x574   : > { %v5434_v4 = vsub.f32 %v9169_v38, %v5433_v33 }
 0x575   : > { %v5207_v56 = vmul.f32 1.442695, %v5194_v22 }
 0x576   : > { %v5305_v35 = vpop.xlane.xlu1 %5304  ;;  %v5435_v43 = vmul.f32 1.442695, %v5434_v4 }
 0x577   : > { %v5317_v2 = vsub.f32 %v9152_v10, %v5305_v35  ;;  %v5751_v28 = vpop.xlane.xlu0 %5750 }
 0x578   : > { %v5752_v42 = vsub.f32 %v9169_v38, %v5751_v28 }
 0x579   : > { %v5330_v11 = vmul.f32 1.442695, %v5317_v2 }
 0x57a   : > { %v5623_v30 = vpop.xlane.xlu1 %5622 }
 0x57b   : > { %7485 = vpow2.f32 %v5330_v11  ;;  %v5635_v19 = vsub.f32 %v9152_v10, %v5623_v30 }
 0x57c   : > { %7487 = vpow2.f32 %v5489_v55  ;;  %v5753_v55 = vmul.f32 1.442695, %v5752_v42  ;;  %v5279_v42 = vsub.f32 %v9169_v38, %v5278_v3 }
 0x57d   : > { %7489 = vpow2.f32 %v5334_v23  ;;  %v5648_v13 = vmul.f32 1.442695, %v5635_v19 }
 0x57e   : > { %7491 = vpow2.f32 %v5652_v7 }
 0x57f   : > { %7493 = vpow2.f32 %v5648_v13 }
 0x580   : > { %7495 = vpow2.f32 %v5207_v56 }
 0x584   : > { %5668 = vrot.lane.b32.xlu0 %v9256_v18, %s7592_s27 }
 0x588   : > { %5505 = vrot.lane.b32.xlu0 %v9260_v17, %s7591_s29  ;;  %v9317_v52 = vpop.eup %7485 }
 0x589   : > { %v9323_v5 = vpop.eup %7487 }
 0x58a   : > { %v9338_v53 = vpop.eup %7489 }
 0x58b   : > { %v9342_v10 = vpop.eup %7491 }
 0x58c   : > { %5674 = vrot.lane.b32.xlu0 %v9267_v39, %s7592_s27  ;;  %v9346_v34 = vpop.eup %7493  ;;  %v5667_v35 = vpop.permute.xlu0 %5666 }
 0x58d   : > { %v9350_v61 = vpop.eup %7495  ;;  %v5692_v13 = vsel %vm5164_vm10, %v5667_v35, 0.0 }
 0x58e   : > { %5217 = vadd.xlane.f32.xlu1 %v5216_v12  ;;  %v5592_v12 = vpop.xlane.xlu1 %5591 }
 0x58f   : > { %v5593_v32 = vsub.f32 %v9169_v38, %v5592_v12 }
 0x591   : > { %v5594_v46 = vmul.f32 1.442695, %v5593_v32 }
 0x592   : > { %v9329_v63 = vpop.permute.xlu1 %5348 }
 0x593   : > { %7497 = vpow2.f32 %v5594_v46 }
 0x594   : > { %7499 = vpow2.f32 %v5435_v43 }
 0x595   : > { %7501 = vpow2.f32 %v5753_v55 }
 0x596   : > { %v9332_v26 = vpop.permute.xlu1 %5507 }
 0x59f   : > { %5356 = vrot.lane.b32.xlu1 %v9277_v60, %s7590_s26 }
 0x5a0   : > { %v9355_v2 = vpop.eup %7497 }
 0x5a1   : > { %v9362_v40 = vpop.eup %7499 }
 0x5a2   : > { %v9366_v7 = vpop.eup %7501 }
 0x5a3   : > { %5515 = vrot.lane.b32.xlu1 %v9281_v29, %s7591_s29 }
 0x5a7   : > { %5511 = vrot.lane.b32.xlu1 %v9287_v47, %s7591_s29 }
 0x5ab   : > { %5232 = vadd.xlane.f32.xlu0 %v5231_v27  ;;  %5517 = vrot.lane.b32.xlu1 %v9293_v59, %s7591_s29  ;;  %v9336_v27 = vpop.permute.xlu1 %5503 }
 0x5af   : > { %v5663_v14 = vpop.permute.xlu1 %5662 }
 0x5b0   : > { %v5686_v43 = vsel %vm5164_vm10, %v5663_v14, 0.0 }
 0x5b3   : > { %v5351_v6 = vpop.permute.xlu1 %5350 }
 0x5b7   : > { %v9353_v24 = vpop.permute.xlu1 %5509 }
 0x5c1   : > { %5352 = vrot.lane.b32.xlu0 %v9300_v15, %s7590_s26 }
 0x5c2   : > { %v5221_v11 = vpop.xlane.xlu0 %5220 }
 0x5c5   : > { %5670 = vrot.lane.b32.xlu0 %v9304_v50, %s7592_s27 }
 0x5c6   : > { %v5345_v30 = vpop.permute.xlu0 %5344 }
 0x5cf   : > { %5235 = vadd.xlane.f32.xlu1 %v5234_v54  ;;  %v5228_v54 = vsel %vm5164_vm10, %v9350_v61, 0.0 }
 0x5de   : > { %v5224_v51 = vpop.xlane.xlu1 %5223 }
 0x5e0   : > { %5354 = vrot.lane.b32.xlu1 %v9317_v52, %s7590_s26 }
 0x5e4   : > { %5226 = vadd.xlane.f32.xlu0 %v5225_v8  ;;  %5513 = vrot.lane.b32.xlu1 %v9323_v5, %s7591_s29  ;;  %v5347_v8 = vpop.permute.xlu1 %5346 }
 0x5e5   : > { %v5371_v3 = vsel %vm5164_vm10, %v5347_v8, 0.0  ;;  %v5374_v8 = vsel %vm5164_vm10, %v9329_v63, 0.0 }
 0x5e8   : > { %v5665_v12 = vpop.permute.xlu1 %5664 }
 0x5f7   : > { %v5215_v1 = vpop.xlane.xlu0 %5214 }
 0x5f8   : > { %7503 = vrcp.f32 %v5215_v1  ;;  %v5280_v1 = vmul.f32 1.442695, %v5279_v42 }
 0x5f9   : > { %7505 = vrcp.f32 %v5221_v11 }
 0x5fa   : > { %5358 = vrot.lane.b32.xlu0 %v9338_v53, %s7590_s26  ;;  %7507 = vrcp.f32 %v5224_v51 }
 0x5fb   : > { %v5669_v28 = vpop.permute.xlu0 %5668 }
 0x5fc   : > { %v5695_v38 = vsel %vm5164_vm10, %v5669_v28, 0.0  ;;  %v5527_v28 = vsel %vm5164_vm10, %v9336_v27, 0.0 }
 0x5fe   : > { %5676 = vrot.lane.b32.xlu0 %v9342_v10, %s7592_s27 }
 0x602   : > { %5672 = vrot.lane.b32.xlu0 %v9346_v34, %s7592_s27 }
 0x605   : > { %v7504_v19 = vpop.eup %7503 }
 0x606   : > { %5597 = vrot.lane.b32.xlu0 %v9355_v2, %s7591_s29  ;;  %v7506_v22 = vpop.eup %7505  ;;  %v5238_v56 = vmul.f32 %v7504_v19, %v9244_v44 }
 0x607   : > { %v7508_v32 = vpop.eup %7507  ;;  %v5242_v33 = vmul.f32 %v7506_v22, %v9222_v9  ;;  %v5377_v9 = vsel %vm5164_vm10, %v5351_v6, 0.0  ;;  %v5689_v6 = vsel %vm5164_vm10, %v5665_v12, 0.0  ;;  %v5368_v12 = vsel %vm5164_vm10, %v5345_v30, 0.0 }
 0x608   : > { %5229 = vadd.xlane.f32.xlu1 %v5228_v54  ;;  %v5244_v11 = vmul.f32 %v7508_v32, %v9233_v57  ;;  %v5253_v51 = vsel %vm5164_vm10, %v5238_v56, 0.0 }
 0x609   : > { %v5256_v44 = vsel %vm5164_vm10, %v5242_v33, 0.0  ;;  %v5533_v33 = vsel %vm5164_vm10, %v9332_v26, 0.0 }
 0x617   : > { %v5218_v23 = vpop.xlane.xlu1 %5217 }
 0x618   : > { %7509 = vrcp.f32 %v5218_v23  ;;  %v5506_v23 = vpop.permute.xlu0 %5505 }
 0x619   : > { %5438 = vrot.lane.b32.xlu1 %v9362_v40, %s7590_s26  ;;  %7511 = vpow2.f32 %v5280_v1  ;;  %v5530_v22 = vsel %vm5164_vm10, %v5506_v23, 0.0 }
 0x61c   : > { %v5675_v57 = vpop.permute.xlu0 %5674 }
 0x61d   : > { %5756 = vrot.lane.b32.xlu1 %v9366_v7, %s7592_s27 }
 0x625   : > { %5693 = vadd.xlane.f32.xlu0 %v5692_v13  ;;  %v7510_v46 = vpop.eup %7509 }
 0x626   : > { %v5240_v4 = vmul.f32 %v7510_v46, %v9264_v31  ;;  %v5258_v31 = vsel %vm5164_vm10, %v5244_v11, 0.0  ;;  %v9388_v32 = vpop.eup %7511 }
 0x627   : > { %v5282_v46 = vsel %vm5275_vm14, %v9388_v32, 0.0 }
 0x628   : > { %v5254_v35 = vsel %vm5164_vm10, %v5240_v4, 0.0  ;;  %v5357_v4 = vpop.permute.xlu1 %5356 }
 0x629   : > { %5687 = vadd.xlane.f32.xlu0 %v5686_v43  ;;  %v5255_v54 = vadd.f32 %v5254_v35, %v5253_v51  ;;  %v5536_v43 = vsel %vm5164_vm10, %v9353_v24, 0.0  ;;  %v5386_v63 = vsel %vm5164_vm10, %v5357_v4, 0.0 }
 0x62b   : > { %v5257_v55 = vadd.f32 %v5256_v44, %v5255_v54  ;;  %v5704_v54 = vsel %vm5164_vm10, %v5675_v57, 0.0 }
 0x62c   : > { %v5516_v42 = vpop.permute.xlu1 %5515 }
 0x62d   : > { %5378 = vadd.xlane.f32.xlu0 %v5377_v9  ;;  %v9382_v14 = vadd.f32 %v5258_v31, %v5257_v55  ;;  %v5545_v11 = vsel %vm5164_vm10, %v5516_v42, 0.0 }
 0x630   : > { %v5512_v26 = vpop.permute.xlu1 %5511 }
 0x631   : > { %5696 = vadd.xlane.f32.xlu0 %v5695_v38  ;;  %v5539_v30 = vsel %vm5164_vm10, %v5512_v26, 0.0 }
 0x634   : > { %v5233_v19 = vpop.xlane.xlu0 %5232  ;;  %v5518_v35 = vpop.permute.xlu1 %5517 }
 0x635   : > { %5372 = vadd.xlane.f32.xlu0 %v5371_v3 }
 0x638   : > { %v5353_v13 = vpop.permute.xlu0 %5352 }
 0x639   : > { %5531 = vadd.xlane.f32.xlu0 %v5530_v22  ;;  %v5380_v56 = vsel %vm5164_vm10, %v5353_v13, 0.0 }
 0x63c   : > { %v5671_v51 = vpop.permute.xlu0 %5670 }
 0x63d   : > { %5690 = vadd.xlane.f32.xlu0 %v5689_v6  ;;  %v5698_v27 = vsel %vm5164_vm10, %v5671_v51, 0.0 }
 0x641   : > { %5381 = vadd.xlane.f32.xlu0 %v5380_v56  ;;  %5283 = vadd.xlane.f32.xlu1 %v5282_v46 }
 0x645   : > { %5375 = vadd.xlane.f32.xlu1 %v5374_v8 }
 0x649   : > { %5534 = vadd.xlane.f32.xlu1 %v5533_v33 }
 0x64d   : > { %5369 = vadd.xlane.f32.xlu1 %v5368_v12 }
 0x651   : > { %5528 = vadd.xlane.f32.xlu1 %v5527_v28  ;;  %v5548_v28 = vsel %vm5164_vm10, %v5518_v35, 0.0 }
 0x655   : > { %5537 = vadd.xlane.f32.xlu1 %v5536_v43 }
 0x658   : > { %v5236_v24 = vpop.xlane.xlu1 %5235 }
 0x659   : > { %5387 = vadd.xlane.f32.xlu1 %v5386_v63 }
 0x65c   : > { %v5355_v55 = vpop.permute.xlu1 %5354 }
 0x65d   : > { %5546 = vadd.xlane.f32.xlu1 %v5545_v11  ;;  %v5383_v23 = vsel %vm5164_vm10, %v5355_v55, 0.0 }
 0x660   : > { %v5514_v3 = vpop.permute.xlu1 %5513 }
 0x661   : > { %5540 = vadd.xlane.f32.xlu1 %v5539_v30  ;;  %v5542_v57 = vsel %vm5164_vm10, %v5514_v3, 0.0 }
 0x665   : > { %5699 = vadd.xlane.f32.xlu1 %v5698_v27 }
 0x669   : > { %5705 = vadd.xlane.f32.xlu1 %v5704_v54 }
 0x66d   : > { %v5227_v44 = vpop.xlane.xlu0 %5226 }
 0x66e   : > { %7513 = vrcp.f32 %v5227_v44 }
 0x66f   : > { %7515 = vrcp.f32 %v5233_v19 }
 0x670   : > { %7517 = vrcp.f32 %v5236_v24 }
 0x671   : > { %v5359_v9 = vpop.permute.xlu0 %5358 }
 0x672   : > { %v5389_v1 = vsel %vm5164_vm10, %v5359_v9, 0.0 }
 0x673   : > { %5390 = vadd.xlane.f32.xlu0 %v5389_v1 }
 0x675   : > { %v5677_v31 = vpop.permute.xlu0 %5676 }
 0x676   : > { %v5707_v38 = vsel %vm5164_vm10, %v5677_v31, 0.0 }
 0x677   : > { %5384 = vadd.xlane.f32.xlu0 %v5383_v23  ;;  %5708 = vadd.xlane.f32.xlu1 %v5707_v38 }
 0x679   : > { %v5673_v22 = vpop.permute.xlu0 %5672 }
 0x67a   : > { %v5701_v8 = vsel %vm5164_vm10, %v5673_v22, 0.0 }
 0x67b   : > { %v7514_v6 = vpop.eup %7513  ;;  %5543 = vadd.xlane.f32.xlu0 %v5542_v57 }
 0x67c   : > { %v5246_v13 = vmul.f32 %v7514_v6, %v9315_v0  ;;  %v7516_v11 = vpop.eup %7515 }
 0x67d   : > { %v5598_v56 = vpop.permute.xlu0 %5597  ;;  %v7518_v26 = vpop.eup %7517  ;;  %v5250_v30 = vmul.f32 %v7516_v11, %v9285_v58 }
 0x67e   : > { %v5260_v46 = vsel %vm5164_vm10, %v5246_v13, 0.0  ;;  %v5600_v33 = vsel %vm5275_vm14, %v5598_v56, 0.0  ;;  %v5252_v19 = vmul.f32 %v7518_v26, %v9310_v45 }
 0x67f   : > { %v5261_v12 = vadd.f32 %v5260_v46, %v9382_v14  ;;  %5702 = vadd.xlane.f32.xlu0 %v5701_v8  ;;  %5601 = vadd.xlane.f32.xlu1 %v5600_v33  ;;  %v5264_v54 = vsel %vm5164_vm10, %v5250_v30, 0.0 }
 0x680   : > { %v5266_v44 = vsel %vm5164_vm10, %v5252_v19, 0.0 }
 0x683   : > { %5549 = vadd.xlane.f32.xlu0 %v5548_v28 }
 0x691   : > { %v5230_v4 = vpop.xlane.xlu1 %5229 }
 0x692   : > { %7519 = vrcp.f32 %v5230_v4 }
 0x695   : > { %v5439_v43 = vpop.permute.xlu1 %5438 }
 0x696   : > { %v5441_v0 = vsel %vm5275_vm14, %v5439_v43, 0.0 }
 0x697   : > { %5442 = vadd.xlane.f32.xlu0 %v5441_v0 }
 0x699   : > { %v5757_v42 = vpop.permute.xlu1 %5756 }
 0x69a   : > { %v5759_v63 = vsel %vm5275_vm14, %v5757_v42, 0.0 }
 0x69b   : > { %5760 = vadd.xlane.f32.xlu0 %v5759_v63 }
 0x69f   : > { %v7520_v14 = vpop.eup %7519 }
 0x6a0   : > { %v5248_v51 = vmul.f32 %v7520_v14, %v9350_v61 }
 0x6a2   : > { %v5262_v27 = vsel %vm5164_vm10, %v5248_v51, 0.0 }
 0x6a3   : > { %v5263_v35 = vadd.f32 %v5262_v27, %v5261_v12 }
 0x6a5   : > { %v5265_v24 = vadd.f32 %v5264_v54, %v5263_v35 }
 0x6a7   : > { %v9425_v55 = vadd.f32 %v5266_v44, %v5265_v24 }
 0x6ae   : > { %v5694_v1 = vpop.xlane.xlu0 %5693 }
 0x6b2   : > { %v5688_v58 = vpop.xlane.xlu0 %5687 }
 0x6b6   : > { %v5379_v61 = vpop.xlane.xlu0 %5378 }
 0x6ba   : > { %v5697_v45 = vpop.xlane.xlu0 %5696 }
 0x6be   : > { %v5373_v57 = vpop.xlane.xlu0 %5372 }
 0x6c2   : > { %v5532_v13 = vpop.xlane.xlu0 %5531 }
 0x6c6   : > { %v5691_v46 = vpop.xlane.xlu0 %5690 }
 0x6ca   : > { %v9427_v9 = vpop.xlane.xlu1 %5283  ;;  %v5382_v33 = vpop.xlane.xlu0 %5381 }
 0x6ce   : > { %v5376_v31 = vpop.xlane.xlu1 %5375 }
 0x6d2   : > { %v5535_v23 = vpop.xlane.xlu1 %5534 }
 0x6d6   : > { %v5370_v38 = vpop.xlane.xlu1 %5369 }
 0x6d7   : > { %7521 = vrcp.f32 %v5370_v38 }
 0x6d8   : > { %7523 = vrcp.f32 %v5373_v57 }
 0x6d9   : > { %7525 = vrcp.f32 %v5694_v1 }
 0x6da   : > { %v5529_v3 = vpop.xlane.xlu1 %5528  ;;  %7527 = vrcp.f32 %v5376_v31 }
 0x6db   : > { %7529 = vrcp.f32 %v5529_v3 }
 0x6dc   : > { %7531 = vrcp.f32 %v5379_v61 }
 0x6dd   : > { %7533 = vrcp.f32 %v5532_v13 }
 0x6de   : > { %v5538_v22 = vpop.xlane.xlu1 %5537  ;;  %7535 = vrcp.f32 %v5691_v46 }
 0x6df   : > { %7537 = vrcp.f32 %v5688_v58 }
 0x6e0   : > { %7539 = vrcp.f32 %v5697_v45 }
 0x6e1   : > { %7541 = vrcp.f32 %v5535_v23 }
 0x6e2   : > { %v5388_v6 = vpop.xlane.xlu1 %5387  ;;  %7543 = vrcp.f32 %v5382_v33 }
 0x6e3   : > { %7545 = vrcp.f32 %v5538_v22 }
 0x6e4   : > { %v7522_v12 = vpop.eup %7521  ;;  %7547 = vrcp.f32 %v5388_v6 }
 0x6e5   : > { %v7524_v43 = vpop.eup %7523  ;;  %v5393_v0 = vmul.f32 %v7522_v12, %v9228_v36 }
 0x6e6   : > { %v5547_v56 = vpop.xlane.xlu1 %5546  ;;  %v7526_v42 = vpop.eup %7525  ;;  %v5395_v63 = vmul.f32 %v7524_v43, %v9240_v20 }
 0x6e7   : > { %v7528_v26 = vpop.eup %7527  ;;  %v5408_v30 = vsel %vm5287_vm9, %v5393_v0, 0.0  ;;  %v5715_v43 = vmul.f32 %v7526_v42, %v9198_v49 }
 0x6e8   : > { %v7530_v14 = vpop.eup %7529  ;;  %v5409_v35 = vsel %vm5287_vm9, %v5395_v63, 0.0  ;;  %v5397_v36 = vmul.f32 %v7528_v26, %v9190_v16 }
 0x6e9   : > { %v7532_v19 = vpop.eup %7531  ;;  %v5410_v44 = vadd.f32 %v5409_v35, %v5408_v30  ;;  %v5552_v20 = vmul.f32 %v7530_v14, %v9206_v25  ;;  %v5729_v42 = vsel %vm5605_vm12, %v5715_v43, 0.0 }
 0x6ea   : > { %v5541_v8 = vpop.xlane.xlu1 %5540  ;;  %v7534_v27 = vpop.eup %7533  ;;  %v5399_v61 = vmul.f32 %v7532_v19, %v9214_v37  ;;  %v5411_v45 = vsel %vm5287_vm9, %v5397_v36, 0.0 }
 0x6eb   : > { %7549 = vrcp.f32 %v5541_v8  ;;  %v7536_v24 = vpop.eup %7535  ;;  %v5554_v58 = vmul.f32 %v7534_v27, %v9260_v17  ;;  %v5412_v57 = vadd.f32 %v5411_v45, %v5410_v44  ;;  %v5567_v25 = vsel %vm5446_vm11, %v5552_v20, 0.0 }
 0x6ec   : > { %v7538_v1 = vpop.eup %7537  ;;  %v5713_v3 = vmul.f32 %v7536_v24, %v9246_v21  ;;  %v5413_v21 = vsel %vm5287_vm9, %v5399_v61, 0.0 }
 0x6ed   : > { %v7540_v23 = vpop.eup %7539  ;;  %v5711_v13 = vmul.f32 %v7538_v1, %v9210_v48  ;;  %v5414_v0 = vadd.f32 %v5413_v21, %v5412_v57 }
 0x6ee   : > { %v5700_v28 = vpop.xlane.xlu1 %5699  ;;  %v7542_v38 = vpop.eup %7541  ;;  %v5727_v8 = vsel %vm5605_vm12, %v5713_v3, 0.0 }
 0x6ef   : > { %7551 = vrcp.f32 %v5700_v28  ;;  %v7544_v22 = vpop.eup %7543  ;;  %v5556_v37 = vmul.f32 %v7542_v38, %v9195_v62 }
 0x6f0   : > { %v7546_v6 = vpop.eup %7545  ;;  %v5401_v33 = vmul.f32 %v7544_v22, %v9300_v15 }
 0x6f1   : > { %v7548_v17 = vpop.eup %7547  ;;  %v5558_v48 = vmul.f32 %v7546_v6, %v9218_v41  ;;  %v5570_v14 = vsel %vm5446_vm11, %v5556_v37, 0.0  ;;  %v5268_v41 = vrot.slane %v9425_v55, 4 }
 0x6f2   : > { %v5706_v51 = vpop.xlane.xlu1 %5705  ;;  %v5415_v15 = vsel %vm5287_vm9, %v5401_v33, 0.0  ;;  %v5405_v19 = vmul.f32 %v7548_v17, %v9277_v60 }
 0x6f3   : > { %v5572_v27 = vsel %vm5446_vm11, %v5558_v48, 0.0  ;;  %v5416_v35 = vadd.f32 %v5415_v15, %v5414_v0  ;;  %v5269_v3 = vadd.f32 %v5268_v41, %v9425_v55 }
 0x6f4   : > { %v5419_v38 = vsel %vm5287_vm9, %v5405_v19, 0.0 }
 0x6f5   : > { %v5270_v21 = vrot.slane %v5269_v3, 2 }
 0x6f8   : > { %v7550_v46 = vpop.eup %7549 }
 0x6f9   : > { %v5560_v30 = vmul.f32 %v7550_v46, %v9287_v47 }
 0x6fb   : > { %v5574_v60 = vsel %vm5446_vm11, %v5560_v30, 0.0 }
 0x6fc   : > { %v5391_v4 = vpop.xlane.xlu0 %5390 }
 0x6fd   : > { %7553 = vrcp.f32 %v5391_v4  ;;  %v7552_v4 = vpop.eup %7551 }
 0x6fe   : > { %v5719_v24 = vmul.f32 %v7552_v4, %v9304_v50 }
 0x700   : > { %v5385_v11 = vpop.xlane.xlu0 %5384  ;;  %v5709_v31 = vpop.xlane.xlu1 %5708 }
 0x701   : > { %7555 = vrcp.f32 %v5385_v11  ;;  %v5726_v11 = vsel %vm5605_vm12, %v5711_v13, 0.0 }
 0x702   : > { %v5728_v26 = vadd.f32 %v5727_v8, %v5726_v11 }
 0x704   : > { %v5544_v54 = vpop.xlane.xlu0 %5543  ;;  %v5730_v20 = vadd.f32 %v5729_v42, %v5728_v26 }
 0x705   : > { %7557 = vrcp.f32 %v5544_v54  ;;  %v5717_v54 = vmul.f32 %v7540_v23, %v9256_v18 }
 0x706   : > { %7559 = vrcp.f32 %v5547_v56  ;;  %v5568_v56 = vsel %vm5446_vm11, %v5554_v58, 0.0 }
 0x707   : > { %7561 = vrcp.f32 %v5706_v51  ;;  %v5569_v12 = vadd.f32 %v5568_v56, %v5567_v25 }
 0x708   : > { %v5703_v16 = vpop.xlane.xlu0 %5702  ;;  %7563 = vrcp.f32 %v5709_v31 }
 0x709   : > { %7565 = vrcp.f32 %v5703_v16  ;;  %v5571_v51 = vadd.f32 %v5570_v14, %v5569_v12  ;;  %v5733_v16 = vsel %vm5605_vm12, %v5719_v24, 0.0  ;;  %v5602_v14 = vpop.xlane.xlu1 %5601 }
 0x70a   : > { %v7554_v63 = vpop.eup %7553 }
 0x70b   : > { %v5407_v47 = vmul.f32 %v7554_v63, %v9338_v53  ;;  %v5573_v58 = vadd.f32 %v5572_v27, %v5571_v51  ;;  %v5731_v53 = vsel %vm5605_vm12, %v5717_v54, 0.0 }
 0x70c   : > { %v5550_v28 = vpop.xlane.xlu0 %5549  ;;  %v5732_v25 = vadd.f32 %v5731_v53, %v5730_v20 }
 0x70d   : > { %7567 = vrcp.f32 %v5550_v28  ;;  %v5575_v45 = vadd.f32 %v5574_v60, %v5573_v58  ;;  %v5421_v22 = vsel %vm5287_vm9, %v5407_v47, 0.0 }
 0x70e   : > { %v7556_v62 = vpop.eup %7555  ;;  %v5734_v56 = vadd.f32 %v5733_v16, %v5732_v25  ;;  %7569 = vrcp.f32 %v9427_v9 }
 0x70f   : > { %v5403_v49 = vmul.f32 %v7556_v62, %v9317_v52  ;;  %v5271_v62 = vadd.f32 %v5270_v21, %v5269_v3 }
 0x711   : > { %v5417_v44 = vsel %vm5287_vm9, %v5403_v49, 0.0  ;;  %v5272_v49 = vrot.slane %v5271_v62, 1 }
 0x712   : > { %v7558_v36 = vpop.eup %7557  ;;  %v5418_v52 = vadd.f32 %v5417_v44, %v5416_v35 }
 0x713   : > { %v5562_v1 = vmul.f32 %v7558_v36, %v9323_v5  ;;  %v7560_v31 = vpop.eup %7559  ;;  %v5273_v24 = vadd.f32 %v5272_v49, %v5271_v62 }
 0x714   : > { %v7562_v61 = vpop.eup %7561  ;;  %v5420_v18 = vadd.f32 %v5419_v38, %v5418_v52  ;;  %v5564_v5 = vmul.f32 %v7560_v31, %v9281_v29 }
 0x715   : > { %v5576_v50 = vsel %vm5446_vm11, %v5562_v1, 0.0  ;;  %v7564_v23 = vpop.eup %7563  ;;  %v5723_v13 = vmul.f32 %v7562_v61, %v9267_v39  ;;  %v5274_v52 = vmul.f32 0.015625, %v5273_v24 }
 0x716   : > { %v7566_v57 = vpop.eup %7565  ;;  %v5422_v6 = vadd.f32 %v5421_v22, %v5420_v18  ;;  %v5577_v17 = vadd.f32 %v5576_v50, %v5575_v45  ;;  %v5725_v8 = vmul.f32 %v7564_v23, %v9342_v10  ;;  %v5578_v12 = vsel %vm5446_vm11, %v5564_v5, 0.0 }
 0x717   : > { %v5721_v55 = vmul.f32 %v7566_v57, %v9346_v34  ;;  %v5737_v43 = vsel %vm5605_vm12, %v5723_v13, 0.0 }
 0x718   : > { %v5423_v37 = vrot.slane %v5422_v6, 4  ;;  %v5579_v39 = vadd.f32 %v5578_v12, %v5577_v17  ;;  %v5739_v63 = vsel %vm5605_vm12, %v5725_v8, 0.0 }
 0x719   : > { %v5735_v33 = vsel %vm5605_vm12, %v5721_v55, 0.0 }
 0x71a   : > { %v7568_v46 = vpop.eup %7567  ;;  %v5424_v28 = vadd.f32 %v5423_v37, %v5422_v6  ;;  %v5736_v4 = vadd.f32 %v5735_v33, %v5734_v56 }
 0x71b   : > { %v5566_v29 = vmul.f32 %v7568_v46, %v9293_v59  ;;  %v7570_v58 = vpop.eup %7569 }
 0x71c   : > { %v5425_v48 = vrot.slane %v5424_v28, 2  ;;  %v5738_v0 = vadd.f32 %v5737_v43, %v5736_v4  ;;  %v5286_v53 = vmul.f32 %v7570_v58, %v9388_v32 }
 0x71d   : > { %v5580_v34 = vsel %vm5446_vm11, %v5566_v29, 0.0 }
 0x71e   : > { %v5581_v11 = vadd.f32 %v5580_v34, %v5579_v39  ;;  %v5426_v10 = vadd.f32 %v5425_v48, %v5424_v28  ;;  %v5740_v26 = vadd.f32 %v5739_v63, %v5738_v0 }
 0x720   : > { %v5582_v30 = vrot.slane %v5581_v11, 4  ;;  %v5427_v15 = vrot.slane %v5426_v10, 1  ;;  %v5741_v51 = vrot.slane %v5740_v26, 4  ;;  %v5443_v59 = vpop.xlane.xlu0 %5442 }
 0x721   : > { %7571 = vrcp.f32 %v5443_v59 }
 0x722   : > { %v5583_v19 = vadd.f32 %v5582_v30, %v5581_v11  ;;  %7573 = vrcp.f32 %v5602_v14  ;;  %v5742_v41 = vadd.f32 %v5741_v51, %v5740_v26  ;;  %v5428_v27 = vadd.f32 %v5427_v15, %v5426_v10 }
 0x724   : > { %v5584_v42 = vrot.slane %v5583_v19, 2  ;;  %v5743_v35 = vrot.slane %v5742_v41, 2  ;;  %v5761_v36 = vpop.xlane.xlu0 %5760  ;;  %v5429_v44 = vmul.f32 0.015625, %v5428_v27 }
 0x725   : > { %7575 = vrcp.f32 %v5761_v36 }
 0x726   : > { %v5585_v54 = vadd.f32 %v5584_v42, %v5583_v19  ;;  %v5744_v47 = vadd.f32 %v5743_v35, %v5742_v41  ;;  %v5764_v61 = vsel %vm5164_vm10, %v5274_v52, %v5429_v44 }
 0x728   : > { %v5586_v9 = vrot.slane %v5585_v54, 1  ;;  %v5745_v20 = vrot.slane %v5744_v47, 1 }
 0x72a   : > { %v5587_v60 = vadd.f32 %v5586_v9, %v5585_v54  ;;  %v5746_v1 = vadd.f32 %v5745_v20, %v5744_v47 }
 0x72c   : > { %v5588_v31 = vmul.f32 0.015625, %v5587_v60  ;;  %v5747_v38 = vmul.f32 0.015625, %v5746_v1 }
 0x72e   : > { %v5766_v3 = vsel %vm5765_vm1, %v5764_v61, %v5588_v31  ;;  %v7572_v18 = vpop.eup %7571 }
 0x72f   : > { %v5768_v50 = vsel %vm5767_vm2, %v5766_v3, %v5747_v38  ;;  %v7574_v23 = vpop.eup %7573  ;;  %v5445_v45 = vmul.f32 %v7572_v18, %v9362_v40 }
 0x730   : > { %5770 = vst.msk [vmem:[%s496_s16] sm:$0x1] %vm5769_vm3, %v5768_v50  ;;  %v5604_v57 = vmul.f32 %v7574_v23, %v9355_v2 }
 0x731   : > { %v5771_v16 = vsel %vm5164_vm10, %v5286_v53, %v5445_v45 }
 0x732   : > { %v7576_v22 = vpop.eup %7575  ;;  %v5772_v25 = vsel %vm5765_vm1, %v5771_v16, %v5604_v57 }
 0x733   : > { %v5763_v5 = vmul.f32 %v7576_v22, %v9366_v7 }
 0x735   : > { %v5773_v6 = vsel %vm5767_vm2, %v5772_v25, %v5763_v5 }
 0x736   : > { %5774 = vst.msk [vmem:[%s499_s21] sm:$0x1] %vm5769_vm3, %v5773_v6 }
 0x737 PF: > { %s26_s18 = sadd.s32 1, %s7583_s18  }
 0x738   : > { %p23_p4 = scmp.ge.s32.totalorder %s26_s18, 4  }
 0x73a   :  { %25 = sbr.rel (!%p23_p4) target bundleno = 1 (0x1), region = 134 }

</bundles_post_ra>
